<compile_context>
chip_gen: v7x
topology: tpu7x:2x2x1
jax: 0.10.0
libtpu: 0.0.40
codegen_flags: <defaults>
</compile_context>

<pallas_src>
import jax
import jax.numpy as jnp
from jax.experimental import pallas as pl
from jax.experimental.pallas import tpu as pltpu

# --------------------------------------------------------------------------
# Config (stands in for the yaml-driven `args`)
# --------------------------------------------------------------------------
B = 2                  # batch
N = 8                  # number of graph nodes (rows/cols of Ahs)
T = 8                  # args.history
INPUT_DIM = 4          # args.input_dim
EMB_DIM = 32           # args.emb_dim
OUT_DIM = 4            # args.out_dim
BLOCKS_PER_LAYER = 2   # args.block_per_layers
LAYERS_PER_MODEL = 2   # args.layers_per_model
HIDDEN = 64            # STGSA.out1 hidden width
BN_EPS = 1e-5
NT = N * T
BNT = B * NT
NUM_STACKS = 2                                           # layers1, layers2
NUM_BLOCKS = NUM_STACKS * LAYERS_PER_MODEL * BLOCKS_PER_LAYER


# --------------------------------------------------------------------------
# Fused Pallas kernel (single invocation, everything resident in VMEM)
# --------------------------------------------------------------------------
def _stgsa_fused_kernel(xT_ref, temp_lanes_ref,
                        emb_w_ref, emb_b_ref,
                        ks_ref, wtemp_lanes_ref,
                        wcat_ref, bcat_ref,
                        bn_w_ref, bn_b_ref,
                        o1w_ref, o1b_ref, o2w_ref, o2b_ref,
                        o_ref):
    f32 = jnp.float32

    ks = ks_ref[...]                       # (BNT, BNT) static spatial kron
    temp_lanes = temp_lanes_ref[...]       # (T, BNT)  temp tiled along lanes

    # embedding: (EMB, IN) @ (IN, B*N*T) -> (EMB, B*N*T), lane-dense
    h = jnp.dot(emb_w_ref[...], xT_ref[...],
                preferred_element_type=f32) + emb_b_ref[...]

    j = 0                                   # flat block index (static unroll)
    for stack in range(NUM_STACKS):
        stack_out = None
        for _chain in range(LAYERS_PER_MODEL):
            hc = h
            for _blk in range(BLOCKS_PER_LAYER):
                # Build the fused spatio-temporal mixing operator in VMEM:
                #   M_j[r, c] = Ks[r, c] * (temp * Wtemp_j)[r % T, c % T]
                at_lanes = wtemp_lanes_ref[j] * temp_lanes          # (T, BNT)
                at_big = jnp.concatenate([at_lanes] * (B * N), axis=0)
                mix = ks * at_big                                   # (BNT,BNT)

                # spatio-temporal mix: one full-slab matmul
                tem = jnp.dot(hc, mix, preferred_element_type=f32)  # (EMB,BNT)

                # fused gated linear layers: single (2E,2E)@(2E,BNT) matmul
                hcat = jnp.concatenate([tem, hc], axis=0)           # (2E,BNT)
                s = jnp.dot(wcat_ref[j], hcat,
                            preferred_element_type=f32) + bcat_ref[j]
                hc = s[:EMB_DIM, :] * jax.nn.sigmoid(s[EMB_DIM:, :])
                j += 1
            stack_out = hc if stack_out is None else jnp.maximum(stack_out, hc)

        # BatchNorm2d (training-mode batch stats over all B*N*T positions).
        # Two independent reductions (sum, sum-of-squares) so they can issue
        # back-to-back on the XLU; var = E[x^2] - mean^2 in f32.
        sum_x = jnp.sum(stack_out, axis=1, keepdims=True)
        sum_xx = jnp.sum(stack_out * stack_out, axis=1, keepdims=True)
        mean = sum_x * (1.0 / BNT)
        var = jnp.maximum(sum_xx * (1.0 / BNT) - mean * mean, 0.0)
        scale = bn_w_ref[stack] * jax.lax.rsqrt(var + BN_EPS)
        h = stack_out * scale + (bn_b_ref[stack] - mean * scale)

    # head: out1 -> LeakyReLU(0.01) -> out2
    y = jnp.dot(o1w_ref[...], h, preferred_element_type=f32) + o1b_ref[...]
    y = jnp.where(y > 0, y, 0.01 * y)
    o_ref[...] = jnp.dot(o2w_ref[...], y,
                         preferred_element_type=f32) + o2b_ref[...]


# --------------------------------------------------------------------------
# One-time parameter packing (hoisted out of the per-step forward path)
# --------------------------------------------------------------------------
def prepare_packed(params):
    d = EMB_DIM
    # flat block list in kernel traversal order: stack -> chain -> block
    blocks = [blk
              for stack in (params["layers1"], params["layers2"])
              for chain in stack
              for blk in chain]

    # Static part of the mixing operator (shared by all blocks):
    #   Ks = kron(kron(I_B, Ahs), ones(T, T))       shape (B*N*T, B*N*T)
    ks = jnp.kron(jnp.kron(jnp.eye(B, dtype=jnp.float32), params["Ahs"]),
                  jnp.ones((T, T), jnp.float32))

    # Wtemp tiled along the lane axis: Wtemp_lanes[j, i, c] = Wtemp_j[i, c%T]
    wtemp_lanes = jnp.stack(
        [jnp.tile(blk["wtemp"], (1, B * N)) for blk in blocks])

    # Fused gated weight: rows 0:d -> fea_emb1[:d, :], rows d:2d -> fea_emb2[d:, :]
    wcat = jnp.stack(
        [jnp.concatenate([blk["W1"][:d, :], blk["W2"][d:, :]], axis=0)
         for blk in blocks])
    bcat = jnp.stack(
        [jnp.concatenate([blk["b1"][:d], blk["b2"][d:]]).reshape(2 * d, 1)
         for blk in blocks])

    bn_w = jnp.stack([params["bn1_w"].reshape(d, 1),
                      params["bn2_w"].reshape(d, 1)])
    bn_b = jnp.stack([params["bn1_b"].reshape(d, 1),
                      params["bn2_b"].reshape(d, 1)])

    return {
        "emb_w": params["emb_w"],
        "emb_b": params["emb_b"].reshape(d, 1),
        "ks": ks,
        "wtemp_lanes": wtemp_lanes,
        "wcat": wcat,
        "bcat": bcat,
        "bn_w": bn_w,
        "bn_b": bn_b,
        "out1_w": params["out1_w"],
        "out1_b": params["out1_b"].reshape(HIDDEN, 1),
        "out2_w": params["out2_w"],
        "out2_b": params["out2_b"].reshape(OUT_DIM, 1),
    }


# --------------------------------------------------------------------------
# Model forward (thin wrapper: transpose X, tile temp, single pallas_call)
# --------------------------------------------------------------------------
def stgsa_forward(packed, X, temp):
    b, n, t, _ = X.shape

    # lane-dense activations: column index = b*N*T + n*T + t
    xT = X.reshape(b * n * t, INPUT_DIM).T              # (IN, B*N*T)
    # temp tiled along lanes: temp_lanes[i, c] = temp[i, c % T]
    temp_lanes = jnp.tile(temp, (1, B * N))             # (T, B*N*T)

    outT = pl.pallas_call(
        _stgsa_fused_kernel,
        out_shape=jax.ShapeDtypeStruct((OUT_DIM, b * n * t), jnp.float32),
        compiler_params=pltpu.CompilerParams(vmem_limit_bytes=8 * 1024 * 1024),
    )(xT, temp_lanes,
      packed["emb_w"], packed["emb_b"],
      packed["ks"], packed["wtemp_lanes"],
      packed["wcat"], packed["bcat"],
      packed["bn_w"], packed["bn_b"],
      packed["out1_w"], packed["out1_b"],
      packed["out2_w"], packed["out2_b"])

    return outT.T.reshape(b, n, t, OUT_DIM)


# --------------------------------------------------------------------------
# Deterministic parameter init (mirrors torch shapes; no checkpoint load)
# --------------------------------------------------------------------------
def init_params(key):
    ks = iter(jax.random.split(key, 128))

    def uniform(shape, lo, hi):
        return jax.random.uniform(next(ks), shape, jnp.float32, lo, hi)

    def linear(fan_in, fan_out):
        bound = fan_in ** -0.5
        w = uniform((fan_out, fan_in), -bound, bound)   # torch layout (out, in)
        b = uniform((fan_out,), -bound, bound)
        return w, b

    def block_params():
        w1, b1 = linear(2 * EMB_DIM, 2 * EMB_DIM)
        w2, b2 = linear(2 * EMB_DIM, 2 * EMB_DIM)
        return {"wtemp": uniform((T, T), 0.0, 1.0),     # torch.rand
                "W1": w1, "b1": b1, "W2": w2, "b2": b2}

    emb_w, emb_b = linear(INPUT_DIM, EMB_DIM)
    layers1 = [[block_params() for _ in range(BLOCKS_PER_LAYER)]
               for _ in range(LAYERS_PER_MODEL)]
    layers2 = [[block_params() for _ in range(BLOCKS_PER_LAYER)]
               for _ in range(LAYERS_PER_MODEL)]
    out1_w, out1_b = linear(EMB_DIM, HIDDEN)
    out2_w, out2_b = linear(HIDDEN, OUT_DIM)
    ahs = uniform((N, N), 0.0, 1.0)                      # fixed adjacency Ahs

    return {
        "emb_w": emb_w, "emb_b": emb_b,
        "layers1": layers1, "layers2": layers2,
        "bn1_w": jnp.ones((EMB_DIM,), jnp.float32),
        "bn1_b": jnp.zeros((EMB_DIM,), jnp.float32),
        "bn2_w": jnp.ones((EMB_DIM,), jnp.float32),
        "bn2_b": jnp.zeros((EMB_DIM,), jnp.float32),
        "out1_w": out1_w, "out1_b": out1_b,
        "out2_w": out2_w, "out2_b": out2_b,
        "Ahs": ahs,
    }


# --------------------------------------------------------------------------
# Pure-JAX reference (mirrors the PyTorch forward op-for-op)
# --------------------------------------------------------------------------
def _block_ref(X, temp, Ahs, blk):
    d = EMB_DIM
    adapAt = temp * blk["wtemp"]
    spa = jnp.einsum('bntc,nm->bmtc', X, Ahs)
    spa_tem = jnp.einsum('bmtc,tl->bmlc', spa, adapAt)
    H = jnp.concatenate([spa_tem, X], axis=-1)
    y1 = H @ blk["W1"].T + blk["b1"]
    y2 = H @ blk["W2"].T + blk["b2"]
    return y1[..., :d] * jax.nn.sigmoid(y2[..., d:])


def _layer_ref(X, temp, layer_params, Ahs):
    outs = []
    for chain in layer_params:
        h = X
        for blk in chain:
            h = _block_ref(h, temp, Ahs, blk)
        outs.append(h)
    return jnp.max(jnp.stack(outs, axis=-1), axis=-1)


def _bn_ref(X, w, b):
    mean = jnp.mean(X, axis=(0, 1, 2), keepdims=True)
    var = jnp.mean((X - mean) ** 2, axis=(0, 1, 2), keepdims=True)
    return (X - mean) * jax.lax.rsqrt(var + BN_EPS) * w + b


def stgsa_ref(params, X, temp):
    Ahs = params["Ahs"]
    x = X @ params["emb_w"].T + params["emb_b"]
    x = _layer_ref(x, temp, params["layers1"], Ahs)
    x = _bn_ref(x, params["bn1_w"], params["bn1_b"])
    x = _layer_ref(x, temp, params["layers2"], Ahs)
    x = _bn_ref(x, params["bn2_w"], params["bn2_b"])
    h = x @ params["out1_w"].T + params["out1_b"]
    h = jnp.where(h > 0, h, 0.01 * h)
    return h @ params["out2_w"].T + params["out2_b"]


# --------------------------------------------------------------------------
if __name__ == "__main__":
    params = init_params(jax.random.PRNGKey(1))
    packed = prepare_packed(params)            # one-time packing, off the step

    kx, kt = jax.random.split(jax.random.PRNGKey(0))
    X = jax.random.normal(kx, (B, N, T, INPUT_DIM), jnp.float32)
    temp = jax.random.uniform(kt, (T, T), jnp.float32)

    forward = jax.jit(stgsa_forward)
    out = forward(packed, X, temp)
    out = jax.block_until_ready(out)
    assert out.shape == (B, N, T, OUT_DIM)

    ref = stgsa_ref(params, X, temp)
    if not bool(jnp.allclose(out, ref, rtol=1e-3, atol=1e-3)):
        raise AssertionError(
            "Pallas output mismatch vs reference, max abs diff = %g"
            % float(jnp.max(jnp.abs(out - ref))))

    print("KERNEL_OK")
</pallas_src>

<mosaic_0001>
module attributes {stable_mosaic.version = 11 : i64} {
  func.func @_stgsa_fused_kernel(%arg0: memref<4x128xf32, #tpu.memory_space<vmem>>, %arg1: memref<8x128xf32, #tpu.memory_space<vmem>>, %arg2: memref<32x4xf32, #tpu.memory_space<vmem>>, %arg3: memref<32x1xf32, #tpu.memory_space<vmem>>, %arg4: memref<128x128xf32, #tpu.memory_space<vmem>>, %arg5: memref<8x8x128xf32, #tpu.memory_space<vmem>>, %arg6: memref<8x64x64xf32, #tpu.memory_space<vmem>>, %arg7: memref<8x64x1xf32, #tpu.memory_space<vmem>>, %arg8: memref<2x32x1xf32, #tpu.memory_space<vmem>>, %arg9: memref<2x32x1xf32, #tpu.memory_space<vmem>>, %arg10: memref<64x32xf32, #tpu.memory_space<vmem>>, %arg11: memref<64x1xf32, #tpu.memory_space<vmem>>, %arg12: memref<4x64xf32, #tpu.memory_space<vmem>>, %arg13: memref<4x1xf32, #tpu.memory_space<vmem>>, %arg14: memref<4x128xf32, #tpu.memory_space<vmem>>) attributes {dimension_semantics = [], scalar_prefetch = 0 : i64, scratch_operands = 0 : i64, tpu.core_type = #tpu.core_type<tc>} {
    %c0 = arith.constant 0 : index
    %c0_0 = arith.constant 0 : index
    %0 = vector.load %arg4[%c0, %c0_0] : memref<128x128xf32, #tpu.memory_space<vmem>>, vector<128x128xf32>
    %c0_1 = arith.constant 0 : index
    %c0_2 = arith.constant 0 : index
    %1 = vector.load %arg1[%c0_1, %c0_2] : memref<8x128xf32, #tpu.memory_space<vmem>>, vector<8x128xf32>
    %c0_3 = arith.constant 0 : index
    %c0_4 = arith.constant 0 : index
    %2 = vector.load %arg2[%c0_3, %c0_4] : memref<32x4xf32, #tpu.memory_space<vmem>>, vector<32x4xf32>
    %c0_5 = arith.constant 0 : index
    %c0_6 = arith.constant 0 : index
    %3 = vector.load %arg0[%c0_5, %c0_6] : memref<4x128xf32, #tpu.memory_space<vmem>>, vector<4x128xf32>
    %cst = arith.constant dense<0.000000e+00> : vector<32x128xf32>
    %4 = tpu.matmul %2, %3, %cst {dimension_numbers = #tpu.dot_dimension_numbers<[1], [0], [0], [1], [0, 0, 1, 1], [], []>} : vector<32x4xf32>, vector<4x128xf32>, vector<32x128xf32> -> vector<32x128xf32>
    %c0_7 = arith.constant 0 : index
    %c0_8 = arith.constant 0 : index
    %5 = vector.load %arg3[%c0_7, %c0_8] : memref<32x1xf32, #tpu.memory_space<vmem>>, vector<32x1xf32>
    %6 = vector.broadcast %5 : vector<32x1xf32> to vector<32x128xf32>
    %7 = arith.addf %4, %6 : vector<32x128xf32>
    %c0_9 = arith.constant 0 : index
    %c0_10 = arith.constant 0 : index
    %c0_11 = arith.constant 0 : index
    %8 = vector.load %arg5[%c0_9, %c0_10, %c0_11] : memref<8x8x128xf32, #tpu.memory_space<vmem>>, vector<1x8x128xf32>
    %9 = vector.shape_cast %8 : vector<1x8x128xf32> to vector<8x128xf32>
    %10 = arith.mulf %9, %1 : vector<8x128xf32>
    %11 = tpu.concatenate %10, %10, %10, %10, %10, %10, %10, %10, %10, %10, %10, %10, %10, %10, %10, %10 in 0 : vector<8x128xf32>, vector<8x128xf32>, vector<8x128xf32>, vector<8x128xf32>, vector<8x128xf32>, vector<8x128xf32>, vector<8x128xf32>, vector<8x128xf32>, vector<8x128xf32>, vector<8x128xf32>, vector<8x128xf32>, vector<8x128xf32>, vector<8x128xf32>, vector<8x128xf32>, vector<8x128xf32>, vector<8x128xf32> -> vector<128x128xf32>
    %12 = arith.mulf %0, %11 : vector<128x128xf32>
    %cst_12 = arith.constant dense<0.000000e+00> : vector<32x128xf32>
    %13 = tpu.matmul %7, %12, %cst_12 {dimension_numbers = #tpu.dot_dimension_numbers<[1], [0], [0], [1], [0, 0, 1, 1], [], []>} : vector<32x128xf32>, vector<128x128xf32>, vector<32x128xf32> -> vector<32x128xf32>
    %14 = tpu.concatenate %13, %7 in 0 : vector<32x128xf32>, vector<32x128xf32> -> vector<64x128xf32>
    %c0_13 = arith.constant 0 : index
    %c0_14 = arith.constant 0 : index
    %c0_15 = arith.constant 0 : index
    %15 = vector.load %arg6[%c0_13, %c0_14, %c0_15] : memref<8x64x64xf32, #tpu.memory_space<vmem>>, vector<1x64x64xf32>
    %16 = vector.shape_cast %15 : vector<1x64x64xf32> to vector<64x64xf32>
    %cst_16 = arith.constant dense<0.000000e+00> : vector<64x128xf32>
    %17 = tpu.matmul %16, %14, %cst_16 {dimension_numbers = #tpu.dot_dimension_numbers<[1], [0], [0], [1], [0, 0, 1, 1], [], []>} : vector<64x64xf32>, vector<64x128xf32>, vector<64x128xf32> -> vector<64x128xf32>
    %c0_17 = arith.constant 0 : index
    %c0_18 = arith.constant 0 : index
    %c0_19 = arith.constant 0 : index
    %18 = vector.load %arg7[%c0_17, %c0_18, %c0_19] : memref<8x64x1xf32, #tpu.memory_space<vmem>>, vector<1x64x1xf32>
    %19 = vector.shape_cast %18 : vector<1x64x1xf32> to vector<64x1xf32>
    %20 = vector.broadcast %19 : vector<64x1xf32> to vector<64x128xf32>
    %21 = arith.addf %17, %20 : vector<64x128xf32>
    %22 = vector.extract_strided_slice %21 {offsets = [0, 0], sizes = [32, 128], strides = [1, 1]} : vector<64x128xf32> to vector<32x128xf32>
    %23 = vector.extract_strided_slice %21 {offsets = [32, 0], sizes = [32, 128], strides = [1, 1]} : vector<64x128xf32> to vector<32x128xf32>
    %24 = arith.negf %23 : vector<32x128xf32>
    %25 = math.exp %24 : vector<32x128xf32>
    %cst_20 = arith.constant 1.000000e+00 : f32
    %26 = vector.broadcast %cst_20 : f32 to vector<32x128xf32>
    %27 = arith.addf %26, %25 : vector<32x128xf32>
    %28 = arith.divf %26, %27 : vector<32x128xf32>
    %29 = arith.mulf %22, %28 : vector<32x128xf32>
    %c1 = arith.constant 1 : index
    %c0_21 = arith.constant 0 : index
    %c0_22 = arith.constant 0 : index
    %30 = vector.load %arg5[%c1, %c0_21, %c0_22] : memref<8x8x128xf32, #tpu.memory_space<vmem>>, vector<1x8x128xf32>
    %31 = vector.shape_cast %30 : vector<1x8x128xf32> to vector<8x128xf32>
    %32 = arith.mulf %31, %1 : vector<8x128xf32>
    %33 = tpu.concatenate %32, %32, %32, %32, %32, %32, %32, %32, %32, %32, %32, %32, %32, %32, %32, %32 in 0 : vector<8x128xf32>, vector<8x128xf32>, vector<8x128xf32>, vector<8x128xf32>, vector<8x128xf32>, vector<8x128xf32>, vector<8x128xf32>, vector<8x128xf32>, vector<8x128xf32>, vector<8x128xf32>, vector<8x128xf32>, vector<8x128xf32>, vector<8x128xf32>, vector<8x128xf32>, vector<8x128xf32>, vector<8x128xf32> -> vector<128x128xf32>
    %34 = arith.mulf %0, %33 : vector<128x128xf32>
    %cst_23 = arith.constant dense<0.000000e+00> : vector<32x128xf32>
    %35 = tpu.matmul %29, %34, %cst_23 {dimension_numbers = #tpu.dot_dimension_numbers<[1], [0], [0], [1], [0, 0, 1, 1], [], []>} : vector<32x128xf32>, vector<128x128xf32>, vector<32x128xf32> -> vector<32x128xf32>
    %36 = tpu.concatenate %35, %29 in 0 : vector<32x128xf32>, vector<32x128xf32> -> vector<64x128xf32>
    %c1_24 = arith.constant 1 : index
    %c0_25 = arith.constant 0 : index
    %c0_26 = arith.constant 0 : index
    %37 = vector.load %arg6[%c1_24, %c0_25, %c0_26] : memref<8x64x64xf32, #tpu.memory_space<vmem>>, vector<1x64x64xf32>
    %38 = vector.shape_cast %37 : vector<1x64x64xf32> to vector<64x64xf32>
    %cst_27 = arith.constant dense<0.000000e+00> : vector<64x128xf32>
    %39 = tpu.matmul %38, %36, %cst_27 {dimension_numbers = #tpu.dot_dimension_numbers<[1], [0], [0], [1], [0, 0, 1, 1], [], []>} : vector<64x64xf32>, vector<64x128xf32>, vector<64x128xf32> -> vector<64x128xf32>
    %c1_28 = arith.constant 1 : index
    %c0_29 = arith.constant 0 : index
    %c0_30 = arith.constant 0 : index
    %40 = vector.load %arg7[%c1_28, %c0_29, %c0_30] : memref<8x64x1xf32, #tpu.memory_space<vmem>>, vector<1x64x1xf32>
    %41 = vector.shape_cast %40 : vector<1x64x1xf32> to vector<64x1xf32>
    %42 = vector.broadcast %41 : vector<64x1xf32> to vector<64x128xf32>
    %43 = arith.addf %39, %42 : vector<64x128xf32>
    %44 = vector.extract_strided_slice %43 {offsets = [0, 0], sizes = [32, 128], strides = [1, 1]} : vector<64x128xf32> to vector<32x128xf32>
    %45 = vector.extract_strided_slice %43 {offsets = [32, 0], sizes = [32, 128], strides = [1, 1]} : vector<64x128xf32> to vector<32x128xf32>
    %46 = arith.negf %45 : vector<32x128xf32>
    %47 = math.exp %46 : vector<32x128xf32>
    %cst_31 = arith.constant 1.000000e+00 : f32
    %48 = vector.broadcast %cst_31 : f32 to vector<32x128xf32>
    %49 = arith.addf %48, %47 : vector<32x128xf32>
    %50 = arith.divf %48, %49 : vector<32x128xf32>
    %51 = arith.mulf %44, %50 : vector<32x128xf32>
    %c2 = arith.constant 2 : index
    %c0_32 = arith.constant 0 : index
    %c0_33 = arith.constant 0 : index
    %52 = vector.load %arg5[%c2, %c0_32, %c0_33] : memref<8x8x128xf32, #tpu.memory_space<vmem>>, vector<1x8x128xf32>
    %53 = vector.shape_cast %52 : vector<1x8x128xf32> to vector<8x128xf32>
    %54 = arith.mulf %53, %1 : vector<8x128xf32>
    %55 = tpu.concatenate %54, %54, %54, %54, %54, %54, %54, %54, %54, %54, %54, %54, %54, %54, %54, %54 in 0 : vector<8x128xf32>, vector<8x128xf32>, vector<8x128xf32>, vector<8x128xf32>, vector<8x128xf32>, vector<8x128xf32>, vector<8x128xf32>, vector<8x128xf32>, vector<8x128xf32>, vector<8x128xf32>, vector<8x128xf32>, vector<8x128xf32>, vector<8x128xf32>, vector<8x128xf32>, vector<8x128xf32>, vector<8x128xf32> -> vector<128x128xf32>
    %56 = arith.mulf %0, %55 : vector<128x128xf32>
    %cst_34 = arith.constant dense<0.000000e+00> : vector<32x128xf32>
    %57 = tpu.matmul %7, %56, %cst_34 {dimension_numbers = #tpu.dot_dimension_numbers<[1], [0], [0], [1], [0, 0, 1, 1], [], []>} : vector<32x128xf32>, vector<128x128xf32>, vector<32x128xf32> -> vector<32x128xf32>
    %58 = tpu.concatenate %57, %7 in 0 : vector<32x128xf32>, vector<32x128xf32> -> vector<64x128xf32>
    %c2_35 = arith.constant 2 : index
    %c0_36 = arith.constant 0 : index
    %c0_37 = arith.constant 0 : index
    %59 = vector.load %arg6[%c2_35, %c0_36, %c0_37] : memref<8x64x64xf32, #tpu.memory_space<vmem>>, vector<1x64x64xf32>
    %60 = vector.shape_cast %59 : vector<1x64x64xf32> to vector<64x64xf32>
    %cst_38 = arith.constant dense<0.000000e+00> : vector<64x128xf32>
    %61 = tpu.matmul %60, %58, %cst_38 {dimension_numbers = #tpu.dot_dimension_numbers<[1], [0], [0], [1], [0, 0, 1, 1], [], []>} : vector<64x64xf32>, vector<64x128xf32>, vector<64x128xf32> -> vector<64x128xf32>
    %c2_39 = arith.constant 2 : index
    %c0_40 = arith.constant 0 : index
    %c0_41 = arith.constant 0 : index
    %62 = vector.load %arg7[%c2_39, %c0_40, %c0_41] : memref<8x64x1xf32, #tpu.memory_space<vmem>>, vector<1x64x1xf32>
    %63 = vector.shape_cast %62 : vector<1x64x1xf32> to vector<64x1xf32>
    %64 = vector.broadcast %63 : vector<64x1xf32> to vector<64x128xf32>
    %65 = arith.addf %61, %64 : vector<64x128xf32>
    %66 = vector.extract_strided_slice %65 {offsets = [0, 0], sizes = [32, 128], strides = [1, 1]} : vector<64x128xf32> to vector<32x128xf32>
    %67 = vector.extract_strided_slice %65 {offsets = [32, 0], sizes = [32, 128], strides = [1, 1]} : vector<64x128xf32> to vector<32x128xf32>
    %68 = arith.negf %67 : vector<32x128xf32>
    %69 = math.exp %68 : vector<32x128xf32>
    %cst_42 = arith.constant 1.000000e+00 : f32
    %70 = vector.broadcast %cst_42 : f32 to vector<32x128xf32>
    %71 = arith.addf %70, %69 : vector<32x128xf32>
    %72 = arith.divf %70, %71 : vector<32x128xf32>
    %73 = arith.mulf %66, %72 : vector<32x128xf32>
    %c3 = arith.constant 3 : index
    %c0_43 = arith.constant 0 : index
    %c0_44 = arith.constant 0 : index
    %74 = vector.load %arg5[%c3, %c0_43, %c0_44] : memref<8x8x128xf32, #tpu.memory_space<vmem>>, vector<1x8x128xf32>
    %75 = vector.shape_cast %74 : vector<1x8x128xf32> to vector<8x128xf32>
    %76 = arith.mulf %75, %1 : vector<8x128xf32>
    %77 = tpu.concatenate %76, %76, %76, %76, %76, %76, %76, %76, %76, %76, %76, %76, %76, %76, %76, %76 in 0 : vector<8x128xf32>, vector<8x128xf32>, vector<8x128xf32>, vector<8x128xf32>, vector<8x128xf32>, vector<8x128xf32>, vector<8x128xf32>, vector<8x128xf32>, vector<8x128xf32>, vector<8x128xf32>, vector<8x128xf32>, vector<8x128xf32>, vector<8x128xf32>, vector<8x128xf32>, vector<8x128xf32>, vector<8x128xf32> -> vector<128x128xf32>
    %78 = arith.mulf %0, %77 : vector<128x128xf32>
    %cst_45 = arith.constant dense<0.000000e+00> : vector<32x128xf32>
    %79 = tpu.matmul %73, %78, %cst_45 {dimension_numbers = #tpu.dot_dimension_numbers<[1], [0], [0], [1], [0, 0, 1, 1], [], []>} : vector<32x128xf32>, vector<128x128xf32>, vector<32x128xf32> -> vector<32x128xf32>
    %80 = tpu.concatenate %79, %73 in 0 : vector<32x128xf32>, vector<32x128xf32> -> vector<64x128xf32>
    %c3_46 = arith.constant 3 : index
    %c0_47 = arith.constant 0 : index
    %c0_48 = arith.constant 0 : index
    %81 = vector.load %arg6[%c3_46, %c0_47, %c0_48] : memref<8x64x64xf32, #tpu.memory_space<vmem>>, vector<1x64x64xf32>
    %82 = vector.shape_cast %81 : vector<1x64x64xf32> to vector<64x64xf32>
    %cst_49 = arith.constant dense<0.000000e+00> : vector<64x128xf32>
    %83 = tpu.matmul %82, %80, %cst_49 {dimension_numbers = #tpu.dot_dimension_numbers<[1], [0], [0], [1], [0, 0, 1, 1], [], []>} : vector<64x64xf32>, vector<64x128xf32>, vector<64x128xf32> -> vector<64x128xf32>
    %c3_50 = arith.constant 3 : index
    %c0_51 = arith.constant 0 : index
    %c0_52 = arith.constant 0 : index
    %84 = vector.load %arg7[%c3_50, %c0_51, %c0_52] : memref<8x64x1xf32, #tpu.memory_space<vmem>>, vector<1x64x1xf32>
    %85 = vector.shape_cast %84 : vector<1x64x1xf32> to vector<64x1xf32>
    %86 = vector.broadcast %85 : vector<64x1xf32> to vector<64x128xf32>
    %87 = arith.addf %83, %86 : vector<64x128xf32>
    %88 = vector.extract_strided_slice %87 {offsets = [0, 0], sizes = [32, 128], strides = [1, 1]} : vector<64x128xf32> to vector<32x128xf32>
    %89 = vector.extract_strided_slice %87 {offsets = [32, 0], sizes = [32, 128], strides = [1, 1]} : vector<64x128xf32> to vector<32x128xf32>
    %90 = arith.negf %89 : vector<32x128xf32>
    %91 = math.exp %90 : vector<32x128xf32>
    %cst_53 = arith.constant 1.000000e+00 : f32
    %92 = vector.broadcast %cst_53 : f32 to vector<32x128xf32>
    %93 = arith.addf %92, %91 : vector<32x128xf32>
    %94 = arith.divf %92, %93 : vector<32x128xf32>
    %95 = arith.mulf %88, %94 : vector<32x128xf32>
    %96 = arith.maximumf %51, %95 : vector<32x128xf32>
    %cst_54 = arith.constant dense<0.000000e+00> : vector<32xf32>
    %97 = vector.multi_reduction <add>, %96, %cst_54 [1] : vector<32x128xf32> to vector<32xf32>
    %98 = vector.shape_cast %97 : vector<32xf32> to vector<32x1xf32>
    %99 = arith.mulf %96, %96 : vector<32x128xf32>
    %cst_55 = arith.constant dense<0.000000e+00> : vector<32xf32>
    %100 = vector.multi_reduction <add>, %99, %cst_55 [1] : vector<32x128xf32> to vector<32xf32>
    %101 = vector.shape_cast %100 : vector<32xf32> to vector<32x1xf32>
    %cst_56 = arith.constant 7.812500e-03 : f32
    %102 = vector.broadcast %cst_56 : f32 to vector<32x1xf32>
    %103 = arith.mulf %98, %102 : vector<32x1xf32>
    %cst_57 = arith.constant 7.812500e-03 : f32
    %104 = vector.broadcast %cst_57 : f32 to vector<32x1xf32>
    %105 = arith.mulf %101, %104 : vector<32x1xf32>
    %106 = arith.mulf %103, %103 : vector<32x1xf32>
    %107 = arith.subf %105, %106 : vector<32x1xf32>
    %cst_58 = arith.constant 0.000000e+00 : f32
    %108 = vector.broadcast %cst_58 : f32 to vector<32x1xf32>
    %109 = arith.maximumf %107, %108 : vector<32x1xf32>
    %c0_59 = arith.constant 0 : index
    %c0_60 = arith.constant 0 : index
    %c0_61 = arith.constant 0 : index
    %110 = vector.load %arg8[%c0_59, %c0_60, %c0_61] : memref<2x32x1xf32, #tpu.memory_space<vmem>>, vector<1x32x1xf32>
    %111 = vector.shape_cast %110 : vector<1x32x1xf32> to vector<32x1xf32>
    %cst_62 = arith.constant 9.99999974E-6 : f32
    %112 = vector.broadcast %cst_62 : f32 to vector<32x1xf32>
    %113 = arith.addf %109, %112 : vector<32x1xf32>
    %114 = math.rsqrt %113 : vector<32x1xf32>
    %115 = arith.mulf %111, %114 : vector<32x1xf32>
    %116 = vector.broadcast %115 : vector<32x1xf32> to vector<32x128xf32>
    %117 = arith.mulf %96, %116 : vector<32x128xf32>
    %c0_63 = arith.constant 0 : index
    %c0_64 = arith.constant 0 : index
    %c0_65 = arith.constant 0 : index
    %118 = vector.load %arg9[%c0_63, %c0_64, %c0_65] : memref<2x32x1xf32, #tpu.memory_space<vmem>>, vector<1x32x1xf32>
    %119 = vector.shape_cast %118 : vector<1x32x1xf32> to vector<32x1xf32>
    %120 = arith.mulf %103, %115 : vector<32x1xf32>
    %121 = arith.subf %119, %120 : vector<32x1xf32>
    %122 = vector.broadcast %121 : vector<32x1xf32> to vector<32x128xf32>
    %123 = arith.addf %117, %122 : vector<32x128xf32>
    %c4 = arith.constant 4 : index
    %c0_66 = arith.constant 0 : index
    %c0_67 = arith.constant 0 : index
    %124 = vector.load %arg5[%c4, %c0_66, %c0_67] : memref<8x8x128xf32, #tpu.memory_space<vmem>>, vector<1x8x128xf32>
    %125 = vector.shape_cast %124 : vector<1x8x128xf32> to vector<8x128xf32>
    %126 = arith.mulf %125, %1 : vector<8x128xf32>
    %127 = tpu.concatenate %126, %126, %126, %126, %126, %126, %126, %126, %126, %126, %126, %126, %126, %126, %126, %126 in 0 : vector<8x128xf32>, vector<8x128xf32>, vector<8x128xf32>, vector<8x128xf32>, vector<8x128xf32>, vector<8x128xf32>, vector<8x128xf32>, vector<8x128xf32>, vector<8x128xf32>, vector<8x128xf32>, vector<8x128xf32>, vector<8x128xf32>, vector<8x128xf32>, vector<8x128xf32>, vector<8x128xf32>, vector<8x128xf32> -> vector<128x128xf32>
    %128 = arith.mulf %0, %127 : vector<128x128xf32>
    %cst_68 = arith.constant dense<0.000000e+00> : vector<32x128xf32>
    %129 = tpu.matmul %123, %128, %cst_68 {dimension_numbers = #tpu.dot_dimension_numbers<[1], [0], [0], [1], [0, 0, 1, 1], [], []>} : vector<32x128xf32>, vector<128x128xf32>, vector<32x128xf32> -> vector<32x128xf32>
    %130 = tpu.concatenate %129, %123 in 0 : vector<32x128xf32>, vector<32x128xf32> -> vector<64x128xf32>
    %c4_69 = arith.constant 4 : index
    %c0_70 = arith.constant 0 : index
    %c0_71 = arith.constant 0 : index
    %131 = vector.load %arg6[%c4_69, %c0_70, %c0_71] : memref<8x64x64xf32, #tpu.memory_space<vmem>>, vector<1x64x64xf32>
    %132 = vector.shape_cast %131 : vector<1x64x64xf32> to vector<64x64xf32>
    %cst_72 = arith.constant dense<0.000000e+00> : vector<64x128xf32>
    %133 = tpu.matmul %132, %130, %cst_72 {dimension_numbers = #tpu.dot_dimension_numbers<[1], [0], [0], [1], [0, 0, 1, 1], [], []>} : vector<64x64xf32>, vector<64x128xf32>, vector<64x128xf32> -> vector<64x128xf32>
    %c4_73 = arith.constant 4 : index
    %c0_74 = arith.constant 0 : index
    %c0_75 = arith.constant 0 : index
    %134 = vector.load %arg7[%c4_73, %c0_74, %c0_75] : memref<8x64x1xf32, #tpu.memory_space<vmem>>, vector<1x64x1xf32>
    %135 = vector.shape_cast %134 : vector<1x64x1xf32> to vector<64x1xf32>
    %136 = vector.broadcast %135 : vector<64x1xf32> to vector<64x128xf32>
    %137 = arith.addf %133, %136 : vector<64x128xf32>
    %138 = vector.extract_strided_slice %137 {offsets = [0, 0], sizes = [32, 128], strides = [1, 1]} : vector<64x128xf32> to vector<32x128xf32>
    %139 = vector.extract_strided_slice %137 {offsets = [32, 0], sizes = [32, 128], strides = [1, 1]} : vector<64x128xf32> to vector<32x128xf32>
    %140 = arith.negf %139 : vector<32x128xf32>
    %141 = math.exp %140 : vector<32x128xf32>
    %cst_76 = arith.constant 1.000000e+00 : f32
    %142 = vector.broadcast %cst_76 : f32 to vector<32x128xf32>
    %143 = arith.addf %142, %141 : vector<32x128xf32>
    %144 = arith.divf %142, %143 : vector<32x128xf32>
    %145 = arith.mulf %138, %144 : vector<32x128xf32>
    %c5 = arith.constant 5 : index
    %c0_77 = arith.constant 0 : index
    %c0_78 = arith.constant 0 : index
    %146 = vector.load %arg5[%c5, %c0_77, %c0_78] : memref<8x8x128xf32, #tpu.memory_space<vmem>>, vector<1x8x128xf32>
    %147 = vector.shape_cast %146 : vector<1x8x128xf32> to vector<8x128xf32>
    %148 = arith.mulf %147, %1 : vector<8x128xf32>
    %149 = tpu.concatenate %148, %148, %148, %148, %148, %148, %148, %148, %148, %148, %148, %148, %148, %148, %148, %148 in 0 : vector<8x128xf32>, vector<8x128xf32>, vector<8x128xf32>, vector<8x128xf32>, vector<8x128xf32>, vector<8x128xf32>, vector<8x128xf32>, vector<8x128xf32>, vector<8x128xf32>, vector<8x128xf32>, vector<8x128xf32>, vector<8x128xf32>, vector<8x128xf32>, vector<8x128xf32>, vector<8x128xf32>, vector<8x128xf32> -> vector<128x128xf32>
    %150 = arith.mulf %0, %149 : vector<128x128xf32>
    %cst_79 = arith.constant dense<0.000000e+00> : vector<32x128xf32>
    %151 = tpu.matmul %145, %150, %cst_79 {dimension_numbers = #tpu.dot_dimension_numbers<[1], [0], [0], [1], [0, 0, 1, 1], [], []>} : vector<32x128xf32>, vector<128x128xf32>, vector<32x128xf32> -> vector<32x128xf32>
    %152 = tpu.concatenate %151, %145 in 0 : vector<32x128xf32>, vector<32x128xf32> -> vector<64x128xf32>
    %c5_80 = arith.constant 5 : index
    %c0_81 = arith.constant 0 : index
    %c0_82 = arith.constant 0 : index
    %153 = vector.load %arg6[%c5_80, %c0_81, %c0_82] : memref<8x64x64xf32, #tpu.memory_space<vmem>>, vector<1x64x64xf32>
    %154 = vector.shape_cast %153 : vector<1x64x64xf32> to vector<64x64xf32>
    %cst_83 = arith.constant dense<0.000000e+00> : vector<64x128xf32>
    %155 = tpu.matmul %154, %152, %cst_83 {dimension_numbers = #tpu.dot_dimension_numbers<[1], [0], [0], [1], [0, 0, 1, 1], [], []>} : vector<64x64xf32>, vector<64x128xf32>, vector<64x128xf32> -> vector<64x128xf32>
    %c5_84 = arith.constant 5 : index
    %c0_85 = arith.constant 0 : index
    %c0_86 = arith.constant 0 : index
    %156 = vector.load %arg7[%c5_84, %c0_85, %c0_86] : memref<8x64x1xf32, #tpu.memory_space<vmem>>, vector<1x64x1xf32>
    %157 = vector.shape_cast %156 : vector<1x64x1xf32> to vector<64x1xf32>
    %158 = vector.broadcast %157 : vector<64x1xf32> to vector<64x128xf32>
    %159 = arith.addf %155, %158 : vector<64x128xf32>
    %160 = vector.extract_strided_slice %159 {offsets = [0, 0], sizes = [32, 128], strides = [1, 1]} : vector<64x128xf32> to vector<32x128xf32>
    %161 = vector.extract_strided_slice %159 {offsets = [32, 0], sizes = [32, 128], strides = [1, 1]} : vector<64x128xf32> to vector<32x128xf32>
    %162 = arith.negf %161 : vector<32x128xf32>
    %163 = math.exp %162 : vector<32x128xf32>
    %cst_87 = arith.constant 1.000000e+00 : f32
    %164 = vector.broadcast %cst_87 : f32 to vector<32x128xf32>
    %165 = arith.addf %164, %163 : vector<32x128xf32>
    %166 = arith.divf %164, %165 : vector<32x128xf32>
    %167 = arith.mulf %160, %166 : vector<32x128xf32>
    %c6 = arith.constant 6 : index
    %c0_88 = arith.constant 0 : index
    %c0_89 = arith.constant 0 : index
    %168 = vector.load %arg5[%c6, %c0_88, %c0_89] : memref<8x8x128xf32, #tpu.memory_space<vmem>>, vector<1x8x128xf32>
    %169 = vector.shape_cast %168 : vector<1x8x128xf32> to vector<8x128xf32>
    %170 = arith.mulf %169, %1 : vector<8x128xf32>
    %171 = tpu.concatenate %170, %170, %170, %170, %170, %170, %170, %170, %170, %170, %170, %170, %170, %170, %170, %170 in 0 : vector<8x128xf32>, vector<8x128xf32>, vector<8x128xf32>, vector<8x128xf32>, vector<8x128xf32>, vector<8x128xf32>, vector<8x128xf32>, vector<8x128xf32>, vector<8x128xf32>, vector<8x128xf32>, vector<8x128xf32>, vector<8x128xf32>, vector<8x128xf32>, vector<8x128xf32>, vector<8x128xf32>, vector<8x128xf32> -> vector<128x128xf32>
    %172 = arith.mulf %0, %171 : vector<128x128xf32>
    %cst_90 = arith.constant dense<0.000000e+00> : vector<32x128xf32>
    %173 = tpu.matmul %123, %172, %cst_90 {dimension_numbers = #tpu.dot_dimension_numbers<[1], [0], [0], [1], [0, 0, 1, 1], [], []>} : vector<32x128xf32>, vector<128x128xf32>, vector<32x128xf32> -> vector<32x128xf32>
    %174 = tpu.concatenate %173, %123 in 0 : vector<32x128xf32>, vector<32x128xf32> -> vector<64x128xf32>
    %c6_91 = arith.constant 6 : index
    %c0_92 = arith.constant 0 : index
    %c0_93 = arith.constant 0 : index
    %175 = vector.load %arg6[%c6_91, %c0_92, %c0_93] : memref<8x64x64xf32, #tpu.memory_space<vmem>>, vector<1x64x64xf32>
    %176 = vector.shape_cast %175 : vector<1x64x64xf32> to vector<64x64xf32>
    %cst_94 = arith.constant dense<0.000000e+00> : vector<64x128xf32>
    %177 = tpu.matmul %176, %174, %cst_94 {dimension_numbers = #tpu.dot_dimension_numbers<[1], [0], [0], [1], [0, 0, 1, 1], [], []>} : vector<64x64xf32>, vector<64x128xf32>, vector<64x128xf32> -> vector<64x128xf32>
    %c6_95 = arith.constant 6 : index
    %c0_96 = arith.constant 0 : index
    %c0_97 = arith.constant 0 : index
    %178 = vector.load %arg7[%c6_95, %c0_96, %c0_97] : memref<8x64x1xf32, #tpu.memory_space<vmem>>, vector<1x64x1xf32>
    %179 = vector.shape_cast %178 : vector<1x64x1xf32> to vector<64x1xf32>
    %180 = vector.broadcast %179 : vector<64x1xf32> to vector<64x128xf32>
    %181 = arith.addf %177, %180 : vector<64x128xf32>
    %182 = vector.extract_strided_slice %181 {offsets = [0, 0], sizes = [32, 128], strides = [1, 1]} : vector<64x128xf32> to vector<32x128xf32>
    %183 = vector.extract_strided_slice %181 {offsets = [32, 0], sizes = [32, 128], strides = [1, 1]} : vector<64x128xf32> to vector<32x128xf32>
    %184 = arith.negf %183 : vector<32x128xf32>
    %185 = math.exp %184 : vector<32x128xf32>
    %cst_98 = arith.constant 1.000000e+00 : f32
    %186 = vector.broadcast %cst_98 : f32 to vector<32x128xf32>
    %187 = arith.addf %186, %185 : vector<32x128xf32>
    %188 = arith.divf %186, %187 : vector<32x128xf32>
    %189 = arith.mulf %182, %188 : vector<32x128xf32>
    %c7 = arith.constant 7 : index
    %c0_99 = arith.constant 0 : index
    %c0_100 = arith.constant 0 : index
    %190 = vector.load %arg5[%c7, %c0_99, %c0_100] : memref<8x8x128xf32, #tpu.memory_space<vmem>>, vector<1x8x128xf32>
    %191 = vector.shape_cast %190 : vector<1x8x128xf32> to vector<8x128xf32>
    %192 = arith.mulf %191, %1 : vector<8x128xf32>
    %193 = tpu.concatenate %192, %192, %192, %192, %192, %192, %192, %192, %192, %192, %192, %192, %192, %192, %192, %192 in 0 : vector<8x128xf32>, vector<8x128xf32>, vector<8x128xf32>, vector<8x128xf32>, vector<8x128xf32>, vector<8x128xf32>, vector<8x128xf32>, vector<8x128xf32>, vector<8x128xf32>, vector<8x128xf32>, vector<8x128xf32>, vector<8x128xf32>, vector<8x128xf32>, vector<8x128xf32>, vector<8x128xf32>, vector<8x128xf32> -> vector<128x128xf32>
    %194 = arith.mulf %0, %193 : vector<128x128xf32>
    %cst_101 = arith.constant dense<0.000000e+00> : vector<32x128xf32>
    %195 = tpu.matmul %189, %194, %cst_101 {dimension_numbers = #tpu.dot_dimension_numbers<[1], [0], [0], [1], [0, 0, 1, 1], [], []>} : vector<32x128xf32>, vector<128x128xf32>, vector<32x128xf32> -> vector<32x128xf32>
    %196 = tpu.concatenate %195, %189 in 0 : vector<32x128xf32>, vector<32x128xf32> -> vector<64x128xf32>
    %c7_102 = arith.constant 7 : index
    %c0_103 = arith.constant 0 : index
    %c0_104 = arith.constant 0 : index
    %197 = vector.load %arg6[%c7_102, %c0_103, %c0_104] : memref<8x64x64xf32, #tpu.memory_space<vmem>>, vector<1x64x64xf32>
    %198 = vector.shape_cast %197 : vector<1x64x64xf32> to vector<64x64xf32>
    %cst_105 = arith.constant dense<0.000000e+00> : vector<64x128xf32>
    %199 = tpu.matmul %198, %196, %cst_105 {dimension_numbers = #tpu.dot_dimension_numbers<[1], [0], [0], [1], [0, 0, 1, 1], [], []>} : vector<64x64xf32>, vector<64x128xf32>, vector<64x128xf32> -> vector<64x128xf32>
    %c7_106 = arith.constant 7 : index
    %c0_107 = arith.constant 0 : index
    %c0_108 = arith.constant 0 : index
    %200 = vector.load %arg7[%c7_106, %c0_107, %c0_108] : memref<8x64x1xf32, #tpu.memory_space<vmem>>, vector<1x64x1xf32>
    %201 = vector.shape_cast %200 : vector<1x64x1xf32> to vector<64x1xf32>
    %202 = vector.broadcast %201 : vector<64x1xf32> to vector<64x128xf32>
    %203 = arith.addf %199, %202 : vector<64x128xf32>
    %204 = vector.extract_strided_slice %203 {offsets = [0, 0], sizes = [32, 128], strides = [1, 1]} : vector<64x128xf32> to vector<32x128xf32>
    %205 = vector.extract_strided_slice %203 {offsets = [32, 0], sizes = [32, 128], strides = [1, 1]} : vector<64x128xf32> to vector<32x128xf32>
    %206 = arith.negf %205 : vector<32x128xf32>
    %207 = math.exp %206 : vector<32x128xf32>
    %cst_109 = arith.constant 1.000000e+00 : f32
    %208 = vector.broadcast %cst_109 : f32 to vector<32x128xf32>
    %209 = arith.addf %208, %207 : vector<32x128xf32>
    %210 = arith.divf %208, %209 : vector<32x128xf32>
    %211 = arith.mulf %204, %210 : vector<32x128xf32>
    %212 = arith.maximumf %167, %211 : vector<32x128xf32>
    %cst_110 = arith.constant dense<0.000000e+00> : vector<32xf32>
    %213 = vector.multi_reduction <add>, %212, %cst_110 [1] : vector<32x128xf32> to vector<32xf32>
    %214 = vector.shape_cast %213 : vector<32xf32> to vector<32x1xf32>
    %215 = arith.mulf %212, %212 : vector<32x128xf32>
    %cst_111 = arith.constant dense<0.000000e+00> : vector<32xf32>
    %216 = vector.multi_reduction <add>, %215, %cst_111 [1] : vector<32x128xf32> to vector<32xf32>
    %217 = vector.shape_cast %216 : vector<32xf32> to vector<32x1xf32>
    %cst_112 = arith.constant 7.812500e-03 : f32
    %218 = vector.broadcast %cst_112 : f32 to vector<32x1xf32>
    %219 = arith.mulf %214, %218 : vector<32x1xf32>
    %cst_113 = arith.constant 7.812500e-03 : f32
    %220 = vector.broadcast %cst_113 : f32 to vector<32x1xf32>
    %221 = arith.mulf %217, %220 : vector<32x1xf32>
    %222 = arith.mulf %219, %219 : vector<32x1xf32>
    %223 = arith.subf %221, %222 : vector<32x1xf32>
    %cst_114 = arith.constant 0.000000e+00 : f32
    %224 = vector.broadcast %cst_114 : f32 to vector<32x1xf32>
    %225 = arith.maximumf %223, %224 : vector<32x1xf32>
    %c1_115 = arith.constant 1 : index
    %c0_116 = arith.constant 0 : index
    %c0_117 = arith.constant 0 : index
    %226 = vector.load %arg8[%c1_115, %c0_116, %c0_117] : memref<2x32x1xf32, #tpu.memory_space<vmem>>, vector<1x32x1xf32>
    %227 = vector.shape_cast %226 : vector<1x32x1xf32> to vector<32x1xf32>
    %cst_118 = arith.constant 9.99999974E-6 : f32
    %228 = vector.broadcast %cst_118 : f32 to vector<32x1xf32>
    %229 = arith.addf %225, %228 : vector<32x1xf32>
    %230 = math.rsqrt %229 : vector<32x1xf32>
    %231 = arith.mulf %227, %230 : vector<32x1xf32>
    %232 = vector.broadcast %231 : vector<32x1xf32> to vector<32x128xf32>
    %233 = arith.mulf %212, %232 : vector<32x128xf32>
    %c1_119 = arith.constant 1 : index
    %c0_120 = arith.constant 0 : index
    %c0_121 = arith.constant 0 : index
    %234 = vector.load %arg9[%c1_119, %c0_120, %c0_121] : memref<2x32x1xf32, #tpu.memory_space<vmem>>, vector<1x32x1xf32>
    %235 = vector.shape_cast %234 : vector<1x32x1xf32> to vector<32x1xf32>
    %236 = arith.mulf %219, %231 : vector<32x1xf32>
    %237 = arith.subf %235, %236 : vector<32x1xf32>
    %238 = vector.broadcast %237 : vector<32x1xf32> to vector<32x128xf32>
    %239 = arith.addf %233, %238 : vector<32x128xf32>
    %c0_122 = arith.constant 0 : index
    %c0_123 = arith.constant 0 : index
    %240 = vector.load %arg10[%c0_122, %c0_123] : memref<64x32xf32, #tpu.memory_space<vmem>>, vector<64x32xf32>
    %cst_124 = arith.constant dense<0.000000e+00> : vector<64x128xf32>
    %241 = tpu.matmul %240, %239, %cst_124 {dimension_numbers = #tpu.dot_dimension_numbers<[1], [0], [0], [1], [0, 0, 1, 1], [], []>} : vector<64x32xf32>, vector<32x128xf32>, vector<64x128xf32> -> vector<64x128xf32>
    %c0_125 = arith.constant 0 : index
    %c0_126 = arith.constant 0 : index
    %242 = vector.load %arg11[%c0_125, %c0_126] : memref<64x1xf32, #tpu.memory_space<vmem>>, vector<64x1xf32>
    %243 = vector.broadcast %242 : vector<64x1xf32> to vector<64x128xf32>
    %244 = arith.addf %241, %243 : vector<64x128xf32>
    %cst_127 = arith.constant 0.000000e+00 : f32
    %245 = vector.broadcast %cst_127 : f32 to vector<64x128xf32>
    %246 = arith.cmpf ogt, %244, %245 : vector<64x128xf32>
    %cst_128 = arith.constant 0.00999999977 : f32
    %247 = vector.broadcast %cst_128 : f32 to vector<64x128xf32>
    %248 = arith.mulf %247, %244 : vector<64x128xf32>
    %249 = arith.select %246, %244, %248 : vector<64x128xi1>, vector<64x128xf32>
    %c0_129 = arith.constant 0 : index
    %c0_130 = arith.constant 0 : index
    %250 = vector.load %arg12[%c0_129, %c0_130] : memref<4x64xf32, #tpu.memory_space<vmem>>, vector<4x64xf32>
    %cst_131 = arith.constant dense<0.000000e+00> : vector<4x128xf32>
    %251 = tpu.matmul %250, %249, %cst_131 {dimension_numbers = #tpu.dot_dimension_numbers<[1], [0], [0], [1], [0, 0, 1, 1], [], []>} : vector<4x64xf32>, vector<64x128xf32>, vector<4x128xf32> -> vector<4x128xf32>
    %c0_132 = arith.constant 0 : index
    %c0_133 = arith.constant 0 : index
    %252 = vector.load %arg13[%c0_132, %c0_133] : memref<4x1xf32, #tpu.memory_space<vmem>>, vector<4x1xf32>
    %253 = vector.broadcast %252 : vector<4x1xf32> to vector<4x128xf32>
    %254 = arith.addf %251, %253 : vector<4x128xf32>
    %c0_134 = arith.constant 0 : index
    %c0_135 = arith.constant 0 : index
    %255 = vector.load %arg14[%c0_134, %c0_135] : memref<4x128xf32, #tpu.memory_space<vmem>>, vector<4x128xf32>
    tpu.vector_store %arg14[%c0_134, %c0_135], %254 {strides = array<i32>} : memref<4x128xf32, #tpu.memory_space<vmem>>, vector<4x128xf32>,
    return
  }
}

</mosaic_0001>

<bundles_post_ra>
// kernel: tile.9
= control target key start
LH: loop header
LB: loop body
LE: loop exit
PB: predicated region body
PF: predicated region fallthrough
CT: control target
= control target key end

     0   :  { %vm6_vm0 = vcmask 1043458   ;;  %vm10_vm1 = vcmask 1045508   ;;  %vm14_vm2 = vcmask 1047558   ;;  %s19_s6 = smov 3  ;;  %s22_s7 = smov 12  ;;  %vm16_vm3 = vcmask 64512   ;;  %s736_s0 = inlined_call_operand.vmem [shape: f32[8,16,8], index: 0, kind: input, shape index: {}]   ;;  %s737_s1 = inlined_call_operand.vmem [shape: f32[8,128], index: 1, kind: output, shape index: {}]  }
   0x1   :  { %v348_v0 = vld [vmem:[%s736_s0 + $0xf] ss:$16 sm:%s19_s6]   ;;  %s27_s12 = smov 48  ;;  %s32_s13 = smov 192  ;;  %vm38_vm4 = vcmask 1048512   ;;  %vm60_vm5 = vcmask 982912  }
   0x2   :  { %v349_v1 = vld [vmem:[%s736_s0 + $0xf] ss:$16 sm:%s22_s7]   ;;  %s63_s18 = smov 3  ;;  %s66_s21 = smov 12  ;;  %vm82_vm6 = vcmask 917312   ;;  %vm104_vm7 = vcmask 851712  }
   0x3   :  { %v25_v2 = vsel %vm6_vm0, %v349_v1, %v348_v0  ;;  %v350_v3 = vld [vmem:[%s736_s0 + $0xf] ss:$16 sm:%s27_s12]   ;;  %v356_v6 = vld [vmem:[%s736_s0 + $0xd] ss:$16 sm:%s63_s18]   ;;  %s71_s22 = smov 48  ;;  %s76_s27 = smov 192 }
   0x4   :  { %v351_v4 = vld [vmem:[%s736_s0 + $0xf] ss:$16 sm:%s32_s13]   ;;  %v30_v5 = vsel %vm10_vm1, %v350_v3, %v25_v2  ;;  %v357_v8 = vld [vmem:[%s736_s0 + $0xd] ss:$16 sm:%s66_s21]   ;;  %s423_s28 = smov 120   ;;  %s41_s2 = smov 3 }
   0x5   :  { %v35_v7 = vsel %vm14_vm2, %v351_v4, %v30_v5  ;;  %v358_v9 = vld [vmem:[%s736_s0 + $0xd] ss:$16 sm:%s71_s22]   ;;  %v69_v10 = vsel %vm6_vm0, %v357_v8, %v356_v6  ;;  %s44_s3 = smov 12  ;;  %v352_v13 = vld [vmem:[%s736_s0 + $0xe] ss:$16 sm:%s41_s2]   ;;  %s49_s8 = smov 48 }
   0x6   :  { %36 = vrot.lane.b32.xlu0 %v35_v7, %s423_s28  ;;  %v359_v11 = vld [vmem:[%s736_s0 + $0xd] ss:$16 sm:%s76_s27]   ;;  %v74_v12 = vsel %vm10_vm1, %v358_v9, %v69_v10  ;;  %s54_s9 = smov 192  ;;  %s85_s14 = smov 3  ;;  %vm126_vm8 = vcmask 786112   ;;  %vm148_vm9 = vcmask 720512  }
   0x7   :  { %v353_v14 = vld [vmem:[%s736_s0 + $0xe] ss:$16 sm:%s44_s3]   ;;  %v79_v15 = vsel %vm14_vm2, %v359_v11, %v74_v12  ;;  %s424_s15 = smov 104   ;;  %v360_v20 = vld [vmem:[%s736_s0 + $0xc] ss:$16 sm:%s85_s14]   ;;  %s88_s18 = smov 12 }
   0x8   :  { %v47_v16 = vsel %vm6_vm0, %v353_v14, %v352_v13  ;;  %v354_v17 = vld [vmem:[%s736_s0 + $0xe] ss:$16 sm:%s49_s8]   ;;  %80 = vrot.lane.b32.xlu1 %v79_v15, %s424_s15  ;;  %s93_s19 = smov 48  ;;  %s98_s24 = smov 192  ;;  %vm170_vm10 = vcmask 654912   ;;  %vm192_vm11 = vcmask 589312  }
   0x9   :  { %v355_v18 = vld [vmem:[%s736_s0 + $0xe] ss:$16 sm:%s54_s9]   ;;  %v52_v19 = vsel %vm10_vm1, %v354_v17, %v47_v16  ;;  %v361_v22 = vld [vmem:[%s736_s0 + $0xc] ss:$16 sm:%s88_s18]   ;;  %s425_s25 = smov 112   ;;  %s107_s28 = smov 3 }
   0xa   :  { %v57_v21 = vsel %vm14_vm2, %v355_v18, %v52_v19  ;;  %v362_v23 = vld [vmem:[%s736_s0 + $0xc] ss:$16 sm:%s93_s19]   ;;  %v91_v24 = vsel %vm6_vm0, %v361_v22, %v360_v20  ;;  %s110_s29 = smov 12  ;;  %v364_v27 = vld [vmem:[%s736_s0 + $0xb] ss:$16 sm:%s107_s28]   ;;  %s115_s5 = smov 48 }
   0xb   :  { %58 = vrot.lane.b32.xlu0 %v57_v21, %s425_s25  ;;  %v363_v25 = vld [vmem:[%s736_s0 + $0xc] ss:$16 sm:%s98_s24]   ;;  %v96_v26 = vsel %vm10_vm1, %v362_v23, %v91_v24  ;;  %s120_s6 = smov 192  ;;  %s129_s11 = smov 3  ;;  %vm214_vm12 = vcmask 523712   ;;  %vm236_vm13 = vcmask 458112  }
   0xc   :  { %v365_v28 = vld [vmem:[%s736_s0 + $0xb] ss:$16 sm:%s110_s29]   ;;  %v101_v29 = vsel %vm14_vm2, %v363_v25, %v96_v26  ;;  %s426_s12 = smov 96   ;;  %v368_v34 = vld [vmem:[%s736_s0 + $0xa] ss:$16 sm:%s129_s11]   ;;  %s132_s15 = smov 12 }
   0xd   :  { %v113_v30 = vsel %vm6_vm0, %v365_v28, %v364_v27  ;;  %v366_v31 = vld [vmem:[%s736_s0 + $0xb] ss:$16 sm:%s115_s5]   ;;  %102 = vrot.lane.b32.xlu1 %v101_v29, %s426_s12  ;;  %s137_s16 = smov 48  ;;  %s142_s21 = smov 192  ;;  %vm258_vm14 = vcmask 392512   ;;  %vm280_vm15 = vcmask 326912  }
   0xe   :  { %v367_v32 = vld [vmem:[%s736_s0 + $0xb] ss:$16 sm:%s120_s6]   ;;  %v118_v33 = vsel %vm10_vm1, %v366_v31, %v113_v30  ;;  %v369_v36 = vld [vmem:[%s736_s0 + $0xa] ss:$16 sm:%s132_s15]   ;;  %s427_s22 = smov 88   ;;  %s151_s25 = smov 3 }
   0xf   :  { %v123_v35 = vsel %vm14_vm2, %v367_v32, %v118_v33  ;;  %v370_v37 = vld [vmem:[%s736_s0 + $0xa] ss:$16 sm:%s137_s16]   ;;  %v135_v38 = vsel %vm6_vm0, %v369_v36, %v368_v34  ;;  %s154_s26 = smov 12  ;;  %v372_v41 = vld [vmem:[%s736_s0 + $0x9] ss:$16 sm:%s151_s25]   ;;  %s159_s2 = smov 48 }
  0x10   :  { %124 = vrot.lane.b32.xlu0 %v123_v35, %s427_s22  ;;  %v371_v39 = vld [vmem:[%s736_s0 + $0xa] ss:$16 sm:%s142_s21]   ;;  %v140_v40 = vsel %vm10_vm1, %v370_v37, %v135_v38  ;;  %s164_s3 = smov 192  ;;  %s173_s8 = smov 3 }
  0x11   :  { %v373_v42 = vld [vmem:[%s736_s0 + $0x9] ss:$16 sm:%s154_s26]   ;;  %v145_v43 = vsel %vm14_vm2, %v371_v39, %v140_v40  ;;  %s428_s9 = smov 80   ;;  %v376_v48 = vld [vmem:[%s736_s0 + $0x8] ss:$16 sm:%s173_s8]   ;;  %s176_s12 = smov 12 }
  0x12   :  { %v157_v44 = vsel %vm6_vm0, %v373_v42, %v372_v41  ;;  %v374_v45 = vld [vmem:[%s736_s0 + $0x9] ss:$16 sm:%s159_s2]   ;;  %146 = vrot.lane.b32.xlu1 %v145_v43, %s428_s9  ;;  %s181_s13 = smov 48  ;;  %s186_s18 = smov 192 }
  0x13   :  { %v375_v46 = vld [vmem:[%s736_s0 + $0x9] ss:$16 sm:%s164_s3]   ;;  %v162_v47 = vsel %vm10_vm1, %v374_v45, %v157_v44  ;;  %v377_v50 = vld [vmem:[%s736_s0 + $0x8] ss:$16 sm:%s176_s12]   ;;  %s429_s19 = smov 72   ;;  %s195_s22 = smov 3 }
  0x14   :  { %v167_v49 = vsel %vm14_vm2, %v375_v46, %v162_v47  ;;  %v378_v51 = vld [vmem:[%s736_s0 + $0x8] ss:$16 sm:%s181_s13]   ;;  %v179_v52 = vsel %vm6_vm0, %v377_v50, %v376_v48  ;;  %s198_s23 = smov 12  ;;  %v380_v55 = vld [vmem:[%s736_s0 + $0x7] ss:$16 sm:%s195_s22]   ;;  %s203_s28 = smov 48 }
  0x15   :  { %168 = vrot.lane.b32.xlu0 %v167_v49, %s429_s19  ;;  %v379_v53 = vld [vmem:[%s736_s0 + $0x8] ss:$16 sm:%s186_s18]   ;;  %v184_v54 = vsel %vm10_vm1, %v378_v51, %v179_v52  ;;  %s208_s29 = smov 192  ;;  %s217_s5 = smov 3 }
  0x16   :  { %v381_v56 = vld [vmem:[%s736_s0 + $0x7] ss:$16 sm:%s198_s23]   ;;  %v189_v57 = vsel %vm14_vm2, %v379_v53, %v184_v54  ;;  %s430_s6 = smov 64   ;;  %v384_v62 = vld [vmem:[%s736_s0 + $0x6] ss:$16 sm:%s217_s5]   ;;  %s220_s9 = smov 12 }
  0x17   :  { %v201_v58 = vsel %vm6_vm0, %v381_v56, %v380_v55  ;;  %v382_v59 = vld [vmem:[%s736_s0 + $0x7] ss:$16 sm:%s203_s28]   ;;  %190 = vrot.lane.b32.xlu1 %v189_v57, %s430_s6  ;;  %s225_s10 = smov 48  ;;  %s230_s15 = smov 192 }
  0x18   :  { %v383_v60 = vld [vmem:[%s736_s0 + $0x7] ss:$16 sm:%s208_s29]   ;;  %v206_v61 = vsel %vm10_vm1, %v382_v59, %v201_v58  ;;  %v385_v0 = vld [vmem:[%s736_s0 + $0x6] ss:$16 sm:%s220_s9]   ;;  %s431_s16 = smov 56   ;;  %s239_s19 = smov 3 }
  0x19   :  { %v211_v63 = vsel %vm14_vm2, %v383_v60, %v206_v61  ;;  %v386_v1 = vld [vmem:[%s736_s0 + $0x6] ss:$16 sm:%s225_s10]   ;;  %v223_v2 = vsel %vm6_vm0, %v385_v0, %v384_v62  ;;  %s242_s20 = smov 12  ;;  %v388_v5 = vld [vmem:[%s736_s0 + $0x5] ss:$16 sm:%s239_s19]   ;;  %s247_s25 = smov 48 }
  0x1a   :  { %212 = vrot.lane.b32.xlu0 %v211_v63, %s431_s16  ;;  %v387_v3 = vld [vmem:[%s736_s0 + $0x6] ss:$16 sm:%s230_s15]   ;;  %v228_v4 = vsel %vm10_vm1, %v386_v1, %v223_v2  ;;  %s252_s26 = smov 192  ;;  %s261_s2 = smov 3 }
  0x1b   :  { %v389_v6 = vld [vmem:[%s736_s0 + $0x5] ss:$16 sm:%s242_s20]   ;;  %v233_v7 = vsel %vm14_vm2, %v387_v3, %v228_v4  ;;  %s432_s3 = smov 48   ;;  %v392_v12 = vld [vmem:[%s736_s0 + $0x4] ss:$16 sm:%s261_s2]   ;;  %s264_s6 = smov 12 }
  0x1c   :  { %v245_v8 = vsel %vm6_vm0, %v389_v6, %v388_v5  ;;  %v390_v9 = vld [vmem:[%s736_s0 + $0x5] ss:$16 sm:%s247_s25]   ;;  %234 = vrot.lane.b32.xlu1 %v233_v7, %s432_s3  ;;  %s269_s7 = smov 48  ;;  %s274_s12 = smov 192 }
  0x1d   :  { %v391_v10 = vld [vmem:[%s736_s0 + $0x5] ss:$16 sm:%s252_s26]   ;;  %v250_v11 = vsel %vm10_vm1, %v390_v9, %v245_v8  ;;  %v393_v14 = vld [vmem:[%s736_s0 + $0x4] ss:$16 sm:%s264_s6]   ;;  %s433_s13 = smov 40   ;;  %s283_s16 = smov 3 }
  0x1e   :  { %v255_v13 = vsel %vm14_vm2, %v391_v10, %v250_v11  ;;  %v394_v15 = vld [vmem:[%s736_s0 + $0x4] ss:$16 sm:%s269_s7]   ;;  %v267_v16 = vsel %vm6_vm0, %v393_v14, %v392_v12  ;;  %s286_s17 = smov 12  ;;  %v396_v19 = vld [vmem:[%s736_s0 + $0x3] ss:$16 sm:%s283_s16]   ;;  %s291_s22 = smov 48 }
  0x1f   :  { %256 = vrot.lane.b32.xlu0 %v255_v13, %s433_s13  ;;  %v395_v17 = vld [vmem:[%s736_s0 + $0x4] ss:$16 sm:%s274_s12]   ;;  %v272_v18 = vsel %vm10_vm1, %v394_v15, %v267_v16  ;;  %s296_s23 = smov 192  ;;  %s305_s28 = smov 3 }
  0x20   :  { %v397_v20 = vld [vmem:[%s736_s0 + $0x3] ss:$16 sm:%s286_s17]   ;;  %v277_v21 = vsel %vm14_vm2, %v395_v17, %v272_v18  ;;  %s434_s29 = smov 32   ;;  %v400_v26 = vld [vmem:[%s736_s0 + $0x2] ss:$16 sm:%s305_s28]   ;;  %s308_s3 = smov 12 }
  0x21   :  { %v289_v22 = vsel %vm6_vm0, %v397_v20, %v396_v19  ;;  %v398_v23 = vld [vmem:[%s736_s0 + $0x3] ss:$16 sm:%s291_s22]   ;;  %278 = vrot.lane.b32.xlu1 %v277_v21, %s434_s29  ;;  %s313_s4 = smov 48  ;;  %s318_s9 = smov 192 }
  0x22   :  { %v399_v24 = vld [vmem:[%s736_s0 + $0x3] ss:$16 sm:%s296_s23]   ;;  %v294_v25 = vsel %vm10_vm1, %v398_v23, %v289_v22  ;;  %v401_v28 = vld [vmem:[%s736_s0 + $0x2] ss:$16 sm:%s308_s3]   ;;  %s435_s10 = smov 24   ;;  %s327_s13 = smov 3 }
  0x23   :  { %v299_v27 = vsel %vm14_vm2, %v399_v24, %v294_v25  ;;  %v402_v29 = vld [vmem:[%s736_s0 + $0x2] ss:$16 sm:%s313_s4]   ;;  %v311_v30 = vsel %vm6_vm0, %v401_v28, %v400_v26  ;;  %s330_s14 = smov 12  ;;  %v404_v33 = vld [vmem:[%s736_s0 + $0x1] ss:$16 sm:%s327_s13]   ;;  %s335_s19 = smov 48 }
  0x24   :  { %300 = vrot.lane.b32.xlu0 %v299_v27, %s435_s10  ;;  %v403_v31 = vld [vmem:[%s736_s0 + $0x2] ss:$16 sm:%s318_s9]   ;;  %v316_v32 = vsel %vm10_vm1, %v402_v29, %v311_v30  ;;  %s340_s20 = smov 192  ;;  %s2_s25 = smov 3 }
  0x25   :  { %v405_v34 = vld [vmem:[%s736_s0 + $0x1] ss:$16 sm:%s330_s14]   ;;  %v321_v35 = vsel %vm14_vm2, %v403_v31, %v316_v32  ;;  %s436_s26 = smov 16   ;;  %s4_s27 = smov 12  ;;  %v3_v40 = vld [vmem:[%s736_s0] ss:$16 sm:%s2_s25]  }
  0x26   :  { %v333_v36 = vsel %vm6_vm0, %v405_v34, %v404_v33  ;;  %v406_v37 = vld [vmem:[%s736_s0 + $0x1] ss:$16 sm:%s335_s19]   ;;  %322 = vrot.lane.b32.xlu1 %v321_v35, %s436_s26  ;;  %s8_s28 = smov 48  ;;  %s12_s2 = smov 192 }
  0x27   :  { %v407_v38 = vld [vmem:[%s736_s0 + $0x1] ss:$16 sm:%s340_s20]   ;;  %v338_v39 = vsel %vm10_vm1, %v406_v37, %v333_v36  ;;  %v5_v42 = vld [vmem:[%s736_s0] ss:$16 sm:%s4_s27]   ;;  %s437_s7 = smov 8  }
  0x28   :  { %v343_v41 = vsel %vm14_vm2, %v407_v38, %v338_v39  ;;  %v9_v43 = vld [vmem:[%s736_s0] ss:$16 sm:%s8_s28]   ;;  %v7_v44 = vsel %vm6_vm0, %v5_v42, %v3_v40  ;;  %vm302_vm0 = vcmask 261312  }
  0x29   :  { %344 = vrot.lane.b32.xlu0 %v343_v41, %s437_s7  ;;  %v13_v45 = vld [vmem:[%s736_s0] ss:$16 sm:%s12_s2]   ;;  %v11_v46 = vsel %vm10_vm1, %v9_v43, %v7_v44  ;;  %vm324_vm1 = vcmask 195712  }
  0x2a   :  { %v15_v47 = vsel %vm14_vm2, %v13_v45, %v11_v46  ;;  %vm346_vm2 = vcmask 130112  }
  0x2b   :  { %17 = vst.msk [vmem:[%s737_s1] sm:$0xff] %vm16_vm3, %v15_v47  }
  0x78   :  { %v37_v48 = vpop.permute.xlu0 %36  }
  0x79   :  { %39 = vst.msk [vmem:[%s737_s1] sm:$0xff] %vm38_vm4, %v37_v48  }
  0x7a   :  { %v81_v49 = vpop.permute.xlu1 %80  }
  0x7d   :  { %v59_v50 = vpop.permute.xlu0 %58  }
  0x7e   :  { %61 = vst.msk [vmem:[%s737_s1] sm:$0xff] %vm60_vm5, %v59_v50  }
  0x7f   :  { %83 = vst.msk [vmem:[%s737_s1] sm:$0xff] %vm82_vm6, %v81_v49   ;;  %v103_v51 = vpop.permute.xlu1 %102  }
  0x80   :  { %105 = vst.msk [vmem:[%s737_s1] sm:$0xff] %vm104_vm7, %v103_v51  }
  0x82   :  { %v125_v52 = vpop.permute.xlu0 %124  }
  0x83   :  { %127 = vst.msk [vmem:[%s737_s1] sm:$0xff] %vm126_vm8, %v125_v52  }
  0x84   :  { %v147_v53 = vpop.permute.xlu1 %146  }
  0x85   :  { %149 = vst.msk [vmem:[%s737_s1] sm:$0xff] %vm148_vm9, %v147_v53  }
  0x87   :  { %v169_v54 = vpop.permute.xlu0 %168  }
  0x88   :  { %171 = vst.msk [vmem:[%s737_s1] sm:$0xff] %vm170_vm10, %v169_v54  }
  0x89   :  { %v191_v55 = vpop.permute.xlu1 %190  }
  0x8a   :  { %193 = vst.msk [vmem:[%s737_s1] sm:$0xff] %vm192_vm11, %v191_v55  }
  0x8c   :  { %v213_v56 = vpop.permute.xlu0 %212  }
  0x8d   :  { %215 = vst.msk [vmem:[%s737_s1] sm:$0xff] %vm214_vm12, %v213_v56  }
  0x8e   :  { %v235_v57 = vpop.permute.xlu1 %234  }
  0x8f   :  { %237 = vst.msk [vmem:[%s737_s1] sm:$0xff] %vm236_vm13, %v235_v57  }
  0x91   :  { %v257_v58 = vpop.permute.xlu0 %256  }
  0x92   :  { %259 = vst.msk [vmem:[%s737_s1] sm:$0xff] %vm258_vm14, %v257_v58  }
  0x93   :  { %v279_v59 = vpop.permute.xlu1 %278  }
  0x94   :  { %281 = vst.msk [vmem:[%s737_s1] sm:$0xff] %vm280_vm15, %v279_v59  }
  0x96   :  { %v301_v60 = vpop.permute.xlu0 %300  }
  0x97   :  { %303 = vst.msk [vmem:[%s737_s1] sm:$0xff] %vm302_vm0, %v301_v60  }
  0x98   :  { %v323_v61 = vpop.permute.xlu1 %322  }
  0x99   :  { %325 = vst.msk [vmem:[%s737_s1] sm:$0xff] %vm324_vm1, %v323_v61  }
  0x9b   :  { %v345_v62 = vpop.permute.xlu0 %344  }
  0x9c   :  { %347 = vst.msk [vmem:[%s737_s1] sm:$0xff] %vm346_vm2, %v345_v62  }

// kernel: stgsa_forward.1
= control target key start
LH: loop header
LB: loop body
LE: loop exit
PB: predicated region body
PF: predicated region fallthrough
CT: control target
= control target key end

     0   :  { %vm106_vm0 = vcmask 1043456   ;;  %vm93_vm1 = vcmask 31744   ;;  %v4979_v3 = vmov 0   ;;  %vm354_vm2 = vcmask 523264   ;;  %s6217_s0 = inlined_call_operand.vmem [shape: f32[4,128], index: 0, kind: input, shape index: {}]   ;;  %s6218_s2 = inlined_call_operand.vmem [shape: f32[32,4], index: 2, kind: input, shape index: {}]   ;;  %s6219_s3 = inlined_call_operand.vmem [shape: f32[32,1], index: 3, kind: input, shape index: {}]   ;;  %s6220_s7 = inlined_call_operand.vmem [shape: f32[8,64,1], index: 7, kind: input, shape index: {}]   ;;  %s6221_s1 = inlined_call_operand.vmem [shape: f32[8,128], index: 1, kind: input, shape index: {}]   ;;  %s6222_s4 = inlined_call_operand.vmem [shape: f32[128,128], index: 4, kind: input, shape index: {}]   ;;  %s6223_s5 = inlined_call_operand.vmem [shape: f32[8,8,128], index: 5, kind: input, shape index: {}]   ;;  %s6224_s6 = inlined_call_operand.vmem [shape: f32[8,64,64], index: 6, kind: input, shape index: {}]   ;;  %s6225_s8 = inlined_call_operand.vmem [shape: f32[2,32,1], index: 8, kind: input, shape index: {}]   ;;  %s6226_s9 = inlined_call_operand.vmem [shape: f32[2,32,1], index: 9, kind: input, shape index: {}]   ;;  %s6227_s11 = inlined_call_operand.vmem [shape: f32[64,1], index: 11, kind: input, shape index: {}]   ;;  %s6228_s13 = inlined_call_operand.vmem [shape: f32[4,1], index: 13, kind: input, shape index: {}]   ;;  %s6229_s10 = inlined_call_operand.vmem [shape: f32[64,32], index: 10, kind: input, shape index: {}]   ;;  %s6230_s12 = inlined_call_operand.vmem [shape: f32[4,64], index: 12, kind: input, shape index: {}]   ;;  %s6231_s14 = inlined_call_operand.vmem [shape: f32[4,128], index: 14, kind: output, shape index: {}]  }
   0x1   :  { %v68_v0 = vld [vmem:[%s6217_s0] sm:$0xf]  ;;  %v65_v2 = vld [vmem:[%s6218_s2 + $0x8] sm:$0xff]  ;;  %4816 = vset.pattern.permute.xlu0 %v4979_v3  ;;  %4817 = vset.pattern.permute.xlu1 %v4979_v3  ;;  %v66_v4 = vld [vmem:[%s6218_s2 + $0x10] sm:$0xff]  ;;  %vm3043_vm3 = vcmask 261120   ;;  %vm4981_vm4 = vmmov 0  }
   0x2   :  { %v64_v1 = vld [vmem:[%s6218_s2] sm:$0xff]  ;;  %3833 = vmatprep.subr.msk.mxu1 %vm106_vm0, %v68_v0  ;;  %v71_v6 = vld [vmem:[%s6219_s3 + $0x10] sm:$0xff]  ;;  %v70_v7 = vld [vmem:[%s6219_s3 + $0x8] sm:$0xff] }
   0x3   :  { %3835 = vmatprep.mubr.msk.f32.mxu1 %vm93_vm1, %v64_v1  ;;  %v69_v5 = vld [vmem:[%s6219_s3] sm:$0xff]  ;;  %3834 = vmatpush3.msk.msra.mxu1 %vm106_vm0, %v68_v0  ;;  %v67_v8 = vld [vmem:[%s6218_s2 + $0x18] sm:$0xff]  ;;  %v311_v11 = vld [vmem:[%s6220_s7 + $0x28] sm:$0xff] }
   0x4   :  { %75 = vperm.xlu0 %4816, %v69_v5   ;;  %3836 = vmatmul.mubr.msk.f32.vlgmr.msra.gmra.mrb[0].mxu1 %vm93_vm1, %v65_v2  ;;  %v72_v9 = vld [vmem:[%s6219_s3 + $0x18] sm:$0xff]  ;;  %v310_v10 = vld [vmem:[%s6220_s7 + $0x20] sm:$0xff]  ;;  %v312_v12 = vld [vmem:[%s6220_s7 + $0x30] sm:$0xff] }
   0x5   :  { %85 = vperm.xlu1 %4817, %v71_v6   ;;  %3838 = vmatprep.mubr.msk.f32.mxu1 %vm93_vm1, %v66_v4  ;;  %v313_v13 = vld [vmem:[%s6220_s7 + $0x38] sm:$0xff]  ;;  %v306_v14 = vld [vmem:[%s6220_s7] sm:$0xff]  ;;  %v307_v15 = vld [vmem:[%s6220_s7 + $0x8] sm:$0xff] }
   0x6   :  { %v308_v16 = vld [vmem:[%s6220_s7 + $0x10] sm:$0xff]  ;;  %v309_v17 = vld [vmem:[%s6220_s7 + $0x18] sm:$0xff]  ;;  %v3341_v18 = vld [vmem:[%s6220_s7 + $0xa0] sm:$0xff] }
   0x7   :  { %v3342_v19 = vld [vmem:[%s6220_s7 + $0xa8] sm:$0xff]  ;;  %v3343_v20 = vld [vmem:[%s6220_s7 + $0xb0] sm:$0xff]  ;;  %v3344_v21 = vld [vmem:[%s6220_s7 + $0xb8] sm:$0xff] }
   0x8   :  { %80 = vperm.xlu0 %4816, %v70_v7   ;;  %3839 = vmatmul.mubr.msk.f32.gmra.mrb[2].mxu1 %vm93_vm1, %v67_v8  ;;  %v3337_v22 = vld [vmem:[%s6220_s7 + $0x80] sm:$0xff]  ;;  %v3338_v23 = vld [vmem:[%s6220_s7 + $0x88] sm:$0xff]  ;;  %v3339_v24 = vld [vmem:[%s6220_s7 + $0x90] sm:$0xff] }
   0x9   :  { %90 = vperm.xlu1 %4817, %v72_v9   ;;  %v3340_v25 = vld [vmem:[%s6220_s7 + $0x98] sm:$0xff]  ;;  %v3312_v26 = vld [vmem:[%s6220_s7 + $0x60] sm:$0xff]  ;;  %v3313_v28 = vld [vmem:[%s6220_s7 + $0x68] sm:$0xff] }
   0xa   :  { %v3370_v27 = vld [vmem:[%s6220_s7 + $0xe0] sm:$0xff]  ;;  %v5159_v31 = vld [vmem:[%s6222_s4 + $0x8] sm:$0xff]  ;;  %v5173_v35 = vld [vmem:[%s6222_s4 + $0x10] sm:$0xff] }
   0xb   :  { %v5149_v29 = vld [vmem:[%s6221_s1] sm:$0xff]  ;;  %v3371_v33 = vld [vmem:[%s6220_s7 + $0xe8] sm:$0xff]  ;;  %v5178_v36 = vld [vmem:[%s6222_s4 + $0x18] sm:$0xff] }
   0xc   :  { %336 = vperm.xlu0 %4816, %v310_v10   ;;  %v5154_v30 = vld [vmem:[%s6222_s4] sm:$0xff]  ;;  %v3314_v41 = vld [vmem:[%s6220_s7 + $0x70] sm:$0xff]  ;;  %v5202_v46 = vld [vmem:[%s6222_s4 + $0x28] sm:$0xff] }
   0xd   :  { %341 = vperm.xlu1 %4817, %v311_v11   ;;  %v195_v32 = vld [vmem:[%s6223_s5] sm:$0xff]  ;;  %v3372_v42 = vld [vmem:[%s6220_s7 + $0xf0] sm:$0xff]  ;;  %v3315_v49 = vld [vmem:[%s6220_s7 + $0x78] sm:$0xff] }
   0xe   :  { %v5168_v34 = vmul.f32 %v195_v32, %v5149_v29  ;;  %v5197_v45 = vld [vmem:[%s6222_s4 + $0x20] sm:$0xff]  ;;  %v3373_v50 = vld [vmem:[%s6220_s7 + $0xf8] sm:$0xff]  ;;  %v5217_v52 = vld [vmem:[%s6222_s4 + $0x30] sm:$0xff] }
   0xf   :  { %v5222_v53 = vld [vmem:[%s6222_s4 + $0x38] sm:$0xff]  ;;  %v3308_v56 = vld [vmem:[%s6220_s7 + $0x40] sm:$0xff]  ;;  %v5242_v60 = vld [vmem:[%s6222_s4 + $0x48] sm:$0xff] }
  0x10   :  { %346 = vperm.xlu0 %4816, %v312_v12   ;;  %v197_v37 = vmul.f32 %v5168_v34, %v5154_v30  ;;  %v198_v38 = vmul.f32 %v5168_v34, %v5159_v31  ;;  %v199_v39 = vmul.f32 %v5168_v34, %v5173_v35  ;;  %v200_v40 = vmul.f32 %v5168_v34, %v5178_v36  ;;  %v3366_v57 = vld [vmem:[%s6220_s7 + $0xc0] sm:$0xff]  ;;  %v3309_v63 = vld [vmem:[%s6220_s7 + $0x48] sm:$0xff]  ;;  %v5257_v2 = vld [vmem:[%s6222_s4 + $0x50] sm:$0xff] }
  0x11   :  { %351 = vperm.xlu1 %4817, %v313_v13   ;;  %v201_v47 = vmul.f32 %v5168_v34, %v5197_v45  ;;  %v202_v48 = vmul.f32 %v5168_v34, %v5202_v46  ;;  %v203_v54 = vmul.f32 %v5168_v34, %v5217_v52  ;;  %v204_v55 = vmul.f32 %v5168_v34, %v5222_v53  ;;  %v5237_v59 = vld [vmem:[%s6222_s4 + $0x40] sm:$0xff]  ;;  %v3367_v0 = vld [vmem:[%s6220_s7 + $0xc8] sm:$0xff]  ;;  %v5262_v3 = vld [vmem:[%s6222_s4 + $0x58] sm:$0xff] }
  0x12   :  { %v4408_v43 = vpack.c.bf16 %v198_v38, %v197_v37  ;;  %v4412_v44 = vpack.c.bf16 %v200_v40, %v199_v39  ;;  %v205_v61 = vmul.f32 %v5168_v34, %v5237_v59  ;;  %v206_v62 = vmul.f32 %v5168_v34, %v5242_v60  ;;  %v3310_v6 = vld [vmem:[%s6220_s7 + $0x50] sm:$0xff]  ;;  %v5277_v9 = vld [vmem:[%s6222_s4 + $0x60] sm:$0xff]  ;;  %v5282_v10 = vld [vmem:[%s6222_s4 + $0x68] sm:$0xff] }
  0x13   :  { %v4416_v51 = vpack.c.bf16 %v202_v48, %v201_v47  ;;  %v4420_v58 = vpack.c.bf16 %v204_v55, %v203_v54  ;;  %v207_v4 = vmul.f32 %v5168_v34, %v5257_v2  ;;  %v208_v5 = vmul.f32 %v5168_v34, %v5262_v3  ;;  %v3368_v7 = vld [vmem:[%s6220_s7 + $0xd0] sm:$0xff]  ;;  %v3311_v13 = vld [vmem:[%s6220_s7 + $0x58] sm:$0xff]  ;;  %v298_v38 = vld [vmem:[%s6224_s6] sm:$0xff] }
  0x14   :  { %316 = vperm.xlu0 %4816, %v306_v14   ;;  %4409 = vmatprep.subr.bf16.mxu1 %v4408_v43  ;;  %v4424_v1 = vpack.c.bf16 %v206_v62, %v205_v61  ;;  %v209_v11 = vmul.f32 %v5168_v34, %v5277_v9  ;;  %v210_v12 = vmul.f32 %v5168_v34, %v5282_v10  ;;  %v3369_v14 = vld [vmem:[%s6220_s7 + $0xd8] sm:$0xff]  ;;  %v302_v54 = vld [vmem:[%s6224_s6 + $0x20] sm:$0xff]  ;;  %v303_v55 = vld [vmem:[%s6224_s6 + $0x28] sm:$0xff] }
  0x15   :  { %321 = vperm.xlu1 %4817, %v307_v15   ;;  %4411 = vmatpush3.bf16.msra.mxu1 %v4408_v43  ;;  %v4428_v8 = vpack.c.bf16 %v208_v5, %v207_v4 }
  0x16   :  { %4413 = vmatprep.subr.bf16.mxu1 %v4412_v44  ;;  %v4432_v15 = vpack.c.bf16 %v210_v12, %v209_v11  ;;  %3895 = vmatprep.mubr.msk.f32.mxu0 %vm354_vm2, %v298_v38 }
  0x18   :  { %326 = vperm.xlu0 %4816, %v308_v16   ;;  %v5297_v16 = vld [vmem:[%s6222_s4 + $0x70] sm:$0xff] }
  0x19   :  { %331 = vperm.xlu1 %4817, %v309_v17   ;;  %4415 = vmatpush3.bf16.msra.mxu1 %v4412_v44  ;;  %v5302_v17 = vld [vmem:[%s6222_s4 + $0x78] sm:$0xff] }
  0x1a   :  { %4417 = vmatprep.subr.bf16.mxu1 %v4416_v51 }
  0x1c   :  { %975 = vperm.xlu0 %4816, %v3341_v18   ;;  %v211_v18 = vmul.f32 %v5168_v34, %v5297_v16 }
  0x1d   :  { %980 = vperm.xlu1 %4817, %v3342_v19   ;;  %4419 = vmatpush3.bf16.msra.mxu1 %v4416_v51  ;;  %v212_v19 = vmul.f32 %v5168_v34, %v5302_v17  ;;  %v301_v51 = vld [vmem:[%s6224_s6 + $0x18] sm:$0xff] }
  0x1e   :  { %4421 = vmatprep.subr.bf16.mxu1 %v4420_v58 }
  0x20   :  { %985 = vperm.xlu0 %4816, %v3343_v20   ;;  %v4436_v20 = vpack.c.bf16 %v212_v19, %v211_v18 }
  0x21   :  { %990 = vperm.xlu1 %4817, %v3344_v21   ;;  %4423 = vmatpush3.bf16.msra.mxu1 %v4420_v58  ;;  %v3299_v58 = vld [vmem:[%s6223_s5 + $0x8] sm:$0xff] }
  0x22   :  { %4425 = vmatprep.subr.bf16.mxu1 %v4424_v1  ;;  %v514_v61 = vmul.f32 %v3299_v58, %v5149_v29 }
  0x24   :  { %955 = vperm.xlu0 %4816, %v3337_v22   ;;  %v515_v62 = vmul.f32 %v514_v61, %v5154_v30  ;;  %v518_v4 = vmul.f32 %v514_v61, %v5178_v36  ;;  %v521_v11 = vmul.f32 %v514_v61, %v5217_v52  ;;  %v522_v12 = vmul.f32 %v514_v61, %v5222_v53 }
  0x25   :  { %960 = vperm.xlu1 %4817, %v3338_v23   ;;  %4427 = vmatpush3.bf16.msra.mxu1 %v4424_v1  ;;  %v517_v1 = vmul.f32 %v514_v61, %v5173_v35  ;;  %v525_v19 = vmul.f32 %v514_v61, %v5257_v2 }
  0x26   :  { %4429 = vmatprep.subr.bf16.mxu1 %v4428_v8 }
  0x27   :  { %v4460_v5 = vpack.c.bf16 %v518_v4, %v517_v1 }
  0x28   :  { %965 = vperm.xlu0 %4816, %v3339_v24  }
  0x29   :  { %970 = vperm.xlu1 %4817, %v3340_v25   ;;  %4431 = vmatpush3.bf16.msra.mxu1 %v4428_v8 }
  0x2a   :  { %4433 = vmatprep.subr.bf16.mxu1 %v4432_v15 }
  0x2c   :  { %656 = vperm.xlu0 %4816, %v3312_v26  }
  0x2d   :  { %1294 = vperm.xlu1 %4817, %v3370_v27   ;;  %4435 = vmatpush3.bf16.msra.mxu1 %v4432_v15  ;;  %v524_v15 = vmul.f32 %v514_v61, %v5242_v60 }
  0x2e   :  { %4437 = vmatprep.subr.bf16.mxu1 %v4436_v20 }
  0x30   :  { %661 = vperm.xlu0 %4816, %v3313_v28  }
  0x31   :  { %1299 = vperm.xlu1 %4817, %v3371_v33   ;;  %4439 = vmatpush3.bf16.msra.mxu1 %v4436_v20  ;;  %v526_v20 = vmul.f32 %v514_v61, %v5262_v3 }
  0x34   :  { %666 = vperm.xlu0 %4816, %v3314_v41  }
  0x35   :  { %1304 = vperm.xlu1 %4817, %v3372_v42  }
  0x38   :  { %671 = vperm.xlu0 %4816, %v3315_v49   ;;  %v299_v49 = vld [vmem:[%s6224_s6 + $0x8] sm:$0xff] }
  0x39   :  { %1309 = vperm.xlu1 %4817, %v3373_v50   ;;  %v300_v50 = vld [vmem:[%s6224_s6 + $0x10] sm:$0xff] }
  0x3c   :  { %636 = vperm.xlu0 %4816, %v3308_v56   ;;  %v304_v56 = vld [vmem:[%s6224_s6 + $0x30] sm:$0xff] }
  0x3d   :  { %1274 = vperm.xlu1 %4817, %v3366_v57   ;;  %v305_v57 = vld [vmem:[%s6224_s6 + $0x38] sm:$0xff] }
  0x40   :  { %641 = vperm.xlu0 %4816, %v3309_v63   ;;  %v516_v63 = vmul.f32 %v514_v61, %v5159_v31 }
  0x41   :  { %1279 = vperm.xlu1 %4817, %v3367_v0  }
  0x42   :  { %v4456_v0 = vpack.c.bf16 %v516_v63, %v515_v62 }
  0x44   :  { %646 = vperm.xlu0 %4816, %v3310_v6   ;;  %v519_v6 = vmul.f32 %v514_v61, %v5197_v45 }
  0x45   :  { %1284 = vperm.xlu1 %4817, %v3368_v7   ;;  %v520_v7 = vmul.f32 %v514_v61, %v5202_v46 }
  0x47   :  { %v4464_v8 = vpack.c.bf16 %v520_v7, %v519_v6 }
  0x48   :  { %651 = vperm.xlu0 %4816, %v3311_v13   ;;  %v4468_v13 = vpack.c.bf16 %v522_v12, %v521_v11 }
  0x49   :  { %1289 = vperm.xlu1 %4817, %v3369_v14   ;;  %v523_v14 = vmul.f32 %v514_v61, %v5237_v59 }
  0x4b   :  { %v4472_v18 = vpack.c.bf16 %v524_v15, %v523_v14 }
  0x83   :  { %v76_v21 = vpop.permute.xlu0 %75 }
  0x84   :  { %v86_v22 = vpop.permute.xlu1 %85 }
  0x87   :  { %v81_v25 = vpop.permute.xlu0 %80 }
  0x88   :  { %v91_v33 = vpop.permute.xlu1 %90 }
  0xd7   :  { %v3837_v23 = vpop.f32.mrb[0].mxu1 }
  0xd8   :  { %v176_v24 = vpop.f32.mrb[1].mxu1  ;;  %v5310_v27 = vadd.f32 %v3837_v23, %v81_v25  ;;  %v528_v23 = vmul.f32 %v514_v61, %v5282_v10  ;;  %v529_v25 = vmul.f32 %v514_v61, %v5297_v16 }
  0xd9   :  { %v5308_v26 = vadd.f32 %v176_v24, %v76_v21  ;;  %v4476_v21 = vpack.c.bf16 %v526_v20, %v525_v19 }
  0xdb   :  { %v3840_v28 = vpop.f32.mrb[2].mxu1  ;;  %3873 = vmatprep.mubr.f32.mxu1 %v5308_v26  ;;  %v5326_v47 = vpack.c.bf16 %v5310_v27, %v5308_v26 }
  0xdc   :  { %v186_v32 = vpop.f32.mrb[3].mxu1  ;;  %3874 = vmatmul.mubr.f32.vlgmr.msra.gmra.mrb[4].mxu1 %v5310_v27  ;;  %v5316_v37 = vadd.f32 %v3840_v28, %v91_v33  ;;  %v530_v28 = vmul.f32 %v514_v61, %v5302_v17 }
  0xdd   :  { %v5314_v34 = vadd.f32 %v186_v32, %v86_v22  ;;  %v527_v22 = vmul.f32 %v514_v61, %v5277_v9 }
  0xde   :  { %v4484_v32 = vpack.c.bf16 %v530_v28, %v529_v25 }
  0xdf   :  { %3876 = vmatprep.mubr.f32.mxu1 %v5314_v34  ;;  %v5331_v48 = vpack.c.bf16 %v5316_v37, %v5314_v34  ;;  %v4480_v24 = vpack.c.bf16 %v528_v23, %v527_v22 }
  0xe0   :  { %3877 = vmatmul.mubr.f32.gmra.mrb[6].mxu1 %v5316_v37 }
 0x1af   :  { %v3875_v39 = vpop.f32.mrb[4].mxu1 }
 0x1b0   :  { %v279_v40 = vpop.f32.mrb[5].mxu1 }
 0x1b1   :  { %v4440_v41 = vpack.c.bf16 %v3875_v39, %v279_v40 }
 0x1b3   :  { %v3878_v42 = vpop.f32.mrb[6].mxu1  ;;  %4441 = vmatprep.subr.bf16.mxu0 %v4440_v41 }
 0x1b4   :  { %v289_v43 = vpop.f32.mrb[7].mxu1  ;;  %4443 = vmatpush3.bf16.msra.mxu0 %v4440_v41  ;;  %v342_v41 = vpop.permute.xlu1 %341 }
 0x1b5   :  { %v4444_v44 = vpack.c.bf16 %v3878_v42, %v289_v43  ;;  %v337_v42 = vpop.permute.xlu0 %336 }
 0x1b7   :  { %4445 = vmatprep.subr.bf16.mxu0 %v4444_v44 }
 0x1b8   :  { %4447 = vmatpush3.bf16.msra.mxu0 %v4444_v44 }
 0x1b9   :  { %4449 = vmatprep.subr.bf16.mxu0 %v5326_v47 }
 0x1bc   :  { %4451 = vmatpush3.bf16.msra.mxu0 %v5326_v47 }
 0x1bd   :  { %4453 = vmatprep.subr.bf16.mxu0 %v5331_v48 }
 0x1c0   :  { %4455 = vmatpush3.bf16.msra.mxu0 %v5331_v48 }
 0x1c1   :  { %4457 = vmatprep.subr.bf16.mxu0 %v4456_v0 }
 0x1c3   :  { %3896 = vmatmul.mubr.msk.f32.vlgmr.msra.gmra.mrb[0].mxu0 %vm354_vm2, %v299_v49 }
 0x1c4   :  { %3898 = vmatprep.mubr.msk.f32.mxu0 %vm354_vm2, %v300_v50  ;;  %4459 = vmatpush3.bf16.msra.mxu0 %v4456_v0 }
 0x1c5   :  { %4461 = vmatprep.subr.bf16.mxu0 %v4460_v5 }
 0x1c7   :  { %3899 = vmatmul.mubr.msk.f32.gmra.mrb[2].mxu0 %vm354_vm2, %v301_v51 }
 0x1c8   :  { %3901 = vmatprep.mubr.msk.f32.mxu0 %vm354_vm2, %v302_v54  ;;  %4463 = vmatpush3.bf16.msra.mxu0 %v4460_v5  ;;  %v352_v54 = vpop.permute.xlu1 %351 }
 0x1c9   :  { %4465 = vmatprep.subr.bf16.mxu0 %v4464_v8 }
 0x1cb   :  { %3902 = vmatmul.mubr.msk.f32.gmra.mrb[4].mxu0 %vm354_vm2, %v303_v55 }
 0x1cc   :  { %3904 = vmatprep.mubr.msk.f32.mxu0 %vm354_vm2, %v304_v56  ;;  %4467 = vmatpush3.bf16.msra.mxu0 %v4464_v8 }
 0x1cd   :  { %4469 = vmatprep.subr.bf16.mxu0 %v4468_v13 }
 0x1cf   :  { %3905 = vmatmul.mubr.msk.f32.gmra.mrb[6].mxu0 %vm354_vm2, %v305_v57  ;;  %v347_v57 = vpop.permute.xlu0 %346 }
 0x1d0   :  { %4471 = vmatpush3.bf16.msra.mxu0 %v4468_v13  ;;  %v322_v13 = vpop.permute.xlu1 %321 }
 0x1d1   :  { %4473 = vmatprep.subr.bf16.mxu0 %v4472_v18 }
 0x1d3   :  { %v317_v14 = vpop.permute.xlu0 %316 }
 0x1d4   :  { %4475 = vmatpush3.bf16.msra.mxu0 %v4472_v18  ;;  %v332_v22 = vpop.permute.xlu1 %331 }
 0x1d5   :  { %4477 = vmatprep.subr.bf16.mxu0 %v4476_v21 }
 0x1d8   :  { %4479 = vmatpush3.bf16.msra.mxu0 %v4476_v21 }
 0x1d9   :  { %4481 = vmatprep.subr.bf16.mxu0 %v4480_v24 }
 0x1dc   :  { %4483 = vmatpush3.bf16.msra.mxu0 %v4480_v24  ;;  %v327_v24 = vpop.permute.xlu0 %326 }
 0x1dd   :  { %4485 = vmatprep.subr.bf16.mxu0 %v4484_v32 }
 0x1e0   :  { %4487 = vmatpush3.bf16.msra.mxu0 %v4484_v32 }
 0x296   :  { %v3897_v33 = vpop.f32.mrb[0].mxu0 }
 0x297   :  { %v445_v38 = vpop.f32.mrb[1].mxu0  ;;  %v451_v15 = vadd.f32 %v3897_v33, %v322_v13  ;;  %v3300_v33 = vld [vmem:[%s6224_s6 + $0x40] sm:$0xff] }
 0x298   :  { %v446_v19 = vadd.f32 %v445_v38, %v317_v14  ;;  %3961 = vmatprep.mubr.msk.f32.mxu1 %vm354_vm2, %v3300_v33  ;;  %v3305_v14 = vld [vmem:[%s6224_s6 + $0x68] sm:$0xff] }
 0x29a   :  { %v3900_v39 = vpop.f32.mrb[2].mxu0 }
 0x29b   :  { %v455_v40 = vpop.f32.mrb[3].mxu0  ;;  %v461_v25 = vadd.f32 %v3900_v39, %v332_v22 }
 0x29c   :  { %v456_v32 = vadd.f32 %v455_v40, %v327_v24  ;;  %v3328_v40 = vld [vmem:[%s6223_s5 + $0x10] sm:$0xff] }
 0x29e   :  { %v3903_v43 = vpop.f32.mrb[4].mxu0 }
 0x29f   :  { %v471_v44 = vadd.f32 %v3903_v43, %v342_v41  ;;  %v465_v49 = vpop.f32.mrb[5].mxu0 }
 0x2a0   :  { %v466_v50 = vadd.f32 %v465_v49, %v337_v42 }
 0x2a1   :  { %v3296_v51 = vmul.f32 -1.442695, %v471_v44 }
 0x2a2   :  { %v3295_v55 = vmul.f32 -1.442695, %v466_v50  ;;  %v3906_v56 = vpop.f32.mrb[6].mxu0 }
 0x2a3   :  { %4818 = vpow2.f32 %v3296_v51  ;;  %v481_v58 = vadd.f32 %v3906_v56, %v352_v54  ;;  %v475_v61 = vpop.f32.mrb[7].mxu0  ;;  %v833_v56 = vmul.f32 %v3328_v40, %v5149_v29 }
 0x2a4   :  { %4820 = vpow2.f32 %v3295_v55  ;;  %v476_v62 = vadd.f32 %v475_v61, %v347_v57 }
 0x2a5   :  { %v3298_v63 = vmul.f32 -1.442695, %v481_v58  ;;  %v834_v57 = vmul.f32 %v833_v56, %v5154_v30  ;;  %v835_v58 = vmul.f32 %v833_v56, %v5159_v31  ;;  %v841_v13 = vmul.f32 %v833_v56, %v5222_v53 }
 0x2a6   :  { %v3297_v0 = vmul.f32 -1.442695, %v476_v62  ;;  %v836_v62 = vmul.f32 %v833_v56, %v5173_v35  ;;  %v845_v24 = vmul.f32 %v833_v56, %v5262_v3 }
 0x2a7   :  { %4822 = vpow2.f32 %v3298_v63  ;;  %v4504_v61 = vpack.c.bf16 %v835_v58, %v834_v57  ;;  %v837_v63 = vmul.f32 %v833_v56, %v5178_v36 }
 0x2a8   :  { %4824 = vpow2.f32 %v3297_v0  ;;  %v3301_v0 = vld [vmem:[%s6224_s6 + $0x48] sm:$0xff] }
 0x2ad   :  { %v4819_v1 = vpop.eup %4818 }
 0x2ae   :  { %v4821_v4 = vpop.eup %4820  ;;  %v497_v5 = vadd.f32 1.0, %v4819_v1  ;;  %v3302_v1 = vld [vmem:[%s6224_s6 + $0x50] sm:$0xff] }
 0x2af   :  { %v496_v6 = vadd.f32 1.0, %v4821_v4  ;;  %v4508_v4 = vpack.c.bf16 %v837_v63, %v836_v62 }
 0x2b0   :  { %4826 = vrcp.f32 %v497_v5  ;;  %v838_v5 = vmul.f32 %v833_v56, %v5197_v45 }
 0x2b1   :  { %v4823_v7 = vpop.eup %4822  ;;  %4828 = vrcp.f32 %v496_v6  ;;  %v839_v6 = vmul.f32 %v833_v56, %v5202_v46 }
 0x2b2   :  { %v4825_v8 = vpop.eup %4824  ;;  %v499_v11 = vadd.f32 1.0, %v4823_v7  ;;  %v3303_v7 = vld [vmem:[%s6224_s6 + $0x58] sm:$0xff] }
 0x2b3   :  { %v498_v12 = vadd.f32 1.0, %v4825_v8  ;;  %v3304_v8 = vld [vmem:[%s6224_s6 + $0x60] sm:$0xff] }
 0x2b4   :  { %4830 = vrcp.f32 %v499_v11  ;;  %v4512_v11 = vpack.c.bf16 %v839_v6, %v838_v5 }
 0x2b5   :  { %4832 = vrcp.f32 %v498_v12  ;;  %v840_v12 = vmul.f32 %v833_v56, %v5217_v52 }
 0x2ba   :  { %v4827_v18 = vpop.eup %4826 }
 0x2bb   :  { %v4829_v20 = vpop.eup %4828  ;;  %v509_v21 = vmul.f32 %v4827_v18, %v451_v15  ;;  %v3306_v15 = vld [vmem:[%s6224_s6 + $0x70] sm:$0xff]  ;;  %v4516_v18 = vpack.c.bf16 %v841_v13, %v840_v12 }
 0x2bc   :  { %v508_v23 = vmul.f32 %v4829_v20, %v446_v19  ;;  %v842_v19 = vmul.f32 %v833_v56, %v5237_v59  ;;  %v843_v20 = vmul.f32 %v833_v56, %v5242_v60 }
 0x2be   :  { %v4831_v28 = vpop.eup %4830  ;;  %3939 = vmatprep.mubr.f32.mxu0 %v508_v23  ;;  %v4496_v41 = vpack.c.bf16 %v509_v21, %v508_v23  ;;  %v4520_v22 = vpack.c.bf16 %v843_v20, %v842_v19  ;;  %v844_v23 = vmul.f32 %v833_v56, %v5257_v2 }
 0x2bf   :  { %v4833_v42 = vpop.eup %4832  ;;  %3940 = vmatmul.mubr.f32.vlgmr.msra.gmra.mrb[8].mxu0 %v509_v21  ;;  %v511_v43 = vmul.f32 %v4831_v28, %v461_v25  ;;  %v3307_v21 = vld [vmem:[%s6224_s6 + $0x78] sm:$0xff]  ;;  %v846_v28 = vmul.f32 %v833_v56, %v5277_v9 }
 0x2c0   :  { %v510_v44 = vmul.f32 %v4833_v42, %v456_v32  ;;  %v4524_v25 = vpack.c.bf16 %v845_v24, %v844_v23  ;;  %v847_v32 = vmul.f32 %v833_v56, %v5282_v10  ;;  %v848_v42 = vmul.f32 %v833_v56, %v5297_v16 }
 0x2c2   :  { %3942 = vmatprep.mubr.f32.mxu0 %v510_v44  ;;  %v4500_v49 = vpack.c.bf16 %v511_v43, %v510_v44 }
 0x2c3   :  { %3943 = vmatmul.mubr.f32.gmra.mrb[10].mxu0 %v511_v43  ;;  %v849_v43 = vmul.f32 %v833_v56, %v5302_v17 }
 0x2c5   :  { %v4532_v44 = vpack.c.bf16 %v849_v43, %v848_v42 }
 0x392   :  { %v3941_v38 = vpop.f32.mrb[8].mxu0 }
 0x393   :  { %v597_v50 = vpop.f32.mrb[9].mxu0 }
 0x394   :  { %v4488_v39 = vpack.c.bf16 %v3941_v38, %v597_v50 }
 0x396   :  { %v3944_v51 = vpop.f32.mrb[10].mxu0  ;;  %4489 = vmatprep.subr.bf16.mxu1 %v4488_v39 }
 0x397   :  { %v607_v54 = vpop.f32.mrb[11].mxu0  ;;  %4491 = vmatpush3.bf16.msra.mxu1 %v4488_v39 }
 0x398   :  { %v4492_v55 = vpack.c.bf16 %v3944_v51, %v607_v54 }
 0x39a   :  { %4493 = vmatprep.subr.bf16.mxu1 %v4492_v55 }
 0x39b   :  { %4495 = vmatpush3.bf16.msra.mxu1 %v4492_v55 }
 0x39c   :  { %4497 = vmatprep.subr.bf16.mxu1 %v4496_v41 }
 0x39f   :  { %4499 = vmatpush3.bf16.msra.mxu1 %v4496_v41  ;;  %v4528_v41 = vpack.c.bf16 %v847_v32, %v846_v28 }
 0x3a0   :  { %4501 = vmatprep.subr.bf16.mxu1 %v4500_v49 }
 0x3a3   :  { %4503 = vmatpush3.bf16.msra.mxu1 %v4500_v49  ;;  %v5444_v49 = vpop.permute.xlu0 %975 }
 0x3a4   :  { %4505 = vmatprep.subr.bf16.mxu1 %v4504_v61 }
 0x3a6   :  { %3962 = vmatmul.mubr.msk.f32.vlgmr.msra.gmra.mrb[8].mxu1 %vm354_vm2, %v3301_v0 }
 0x3a7   :  { %4507 = vmatpush3.bf16.msra.mxu1 %v4504_v61  ;;  %3964 = vmatprep.mubr.msk.f32.mxu1 %vm354_vm2, %v3302_v1  ;;  %v5446_v33 = vpop.permute.xlu0 %985 }
 0x3a8   :  { %4509 = vmatprep.subr.bf16.mxu1 %v4508_v4 }
 0x3aa   :  { %3965 = vmatmul.mubr.msk.f32.gmra.mrb[10].mxu1 %vm354_vm2, %v3303_v7 }
 0x3ab   :  { %4511 = vmatpush3.bf16.msra.mxu1 %v4508_v4  ;;  %3967 = vmatprep.mubr.msk.f32.mxu1 %vm354_vm2, %v3304_v8  ;;  %v5448_v38 = vpop.permute.xlu0 %955 }
 0x3ac   :  { %4513 = vmatprep.subr.bf16.mxu1 %v4512_v11 }
 0x3ae   :  { %3968 = vmatmul.mubr.msk.f32.gmra.mrb[12].mxu1 %vm354_vm2, %v3305_v14 }
 0x3af   :  { %4515 = vmatpush3.bf16.msra.mxu1 %v4512_v11  ;;  %3970 = vmatprep.mubr.msk.f32.mxu1 %vm354_vm2, %v3306_v15  ;;  %v5450_v50 = vpop.permute.xlu0 %965 }
 0x3b0   :  { %4517 = vmatprep.subr.bf16.mxu1 %v4516_v18 }
 0x3b2   :  { %3971 = vmatmul.mubr.msk.f32.gmra.mrb[14].mxu1 %vm354_vm2, %v3307_v21 }
 0x3b3   :  { %4519 = vmatpush3.bf16.msra.mxu1 %v4516_v18  ;;  %4005 = vmatprep.mubr.f32.mxu1 %v5308_v26  ;;  %v3329_v26 = vld [vmem:[%s6224_s6 + $0x80] sm:$0xff]  ;;  %v657_v39 = vpop.permute.xlu0 %656 }
 0x3b4   :  { %4521 = vmatprep.subr.bf16.mxu1 %v4520_v22  ;;  %4027 = vmatprep.mubr.msk.f32.mxu0 %vm354_vm2, %v3329_v26 }
 0x3b7   :  { %4523 = vmatpush3.bf16.msra.mxu1 %v4520_v22 }
 0x3b8   :  { %4525 = vmatprep.subr.bf16.mxu1 %v4524_v25 }
 0x3bb   :  { %4527 = vmatpush3.bf16.msra.mxu1 %v4524_v25 }
 0x3bc   :  { %4529 = vmatprep.subr.bf16.mxu1 %v4528_v41 }
 0x3bf   :  { %4531 = vmatpush3.bf16.msra.mxu1 %v4528_v41 }
 0x3c0   :  { %4533 = vmatprep.subr.bf16.mxu1 %v4532_v44 }
 0x3c3   :  { %4535 = vmatpush3.bf16.msra.mxu1 %v4532_v44 }
 0x3c6   :  { %4006 = vmatmul.mubr.f32.vlgmr.msra.gmra.mrb[16].mxu1 %v5310_v27  ;;  %v662_v27 = vpop.permute.xlu0 %661 }
 0x3c7   :  { %4008 = vmatprep.mubr.f32.mxu1 %v5314_v34 }
 0x3ca   :  { %4009 = vmatmul.mubr.f32.gmra.mrb[18].mxu1 %v5316_v37  ;;  %v667_v54 = vpop.permute.xlu0 %666 }
 0x3ce   :  { %v672_v62 = vpop.permute.xlu0 %671 }
 0x3d2   :  { %v637_v8 = vpop.permute.xlu0 %636 }
 0x3d6   :  { %v642_v15 = vpop.permute.xlu0 %641 }
 0x3da   :  { %v647_v22 = vpop.permute.xlu0 %646 }
 0x479   :  { %v3963_v40 = vpop.f32.mrb[8].mxu1 }
 0x47a   :  { %v764_v34 = vpop.f32.mrb[9].mxu1  ;;  %v770_v28 = vadd.f32 %v3963_v40, %v642_v15 }
 0x47b   :  { %v765_v41 = vadd.f32 %v764_v34, %v637_v8 }
 0x47d   :  { %v3966_v51 = vpop.f32.mrb[10].mxu1 }
 0x47e   :  { %v774_v37 = vpop.f32.mrb[11].mxu1 }
 0x481   :  { %v3969_v55 = vpop.f32.mrb[12].mxu1 }
 0x482   :  { %v790_v56 = vadd.f32 %v3969_v55, %v662_v27  ;;  %v784_v57 = vpop.f32.mrb[13].mxu1 }
 0x483   :  { %v785_v58 = vadd.f32 %v784_v57, %v657_v39  ;;  %v652_v39 = vpop.permute.xlu0 %651  ;;  %v775_v57 = vadd.f32 %v774_v37, %v647_v22  ;;  %v3331_v37 = vld [vmem:[%s6224_s6 + $0x90] sm:$0xff] }
 0x484   :  { %v3325_v61 = vmul.f32 -1.442695, %v790_v56  ;;  %v780_v55 = vadd.f32 %v3966_v51, %v652_v39  ;;  %v3330_v51 = vld [vmem:[%s6224_s6 + $0x88] sm:$0xff] }
 0x485   :  { %v3324_v63 = vmul.f32 -1.442695, %v785_v58  ;;  %v3972_v0 = vpop.f32.mrb[14].mxu1 }
 0x486   :  { %4834 = vpow2.f32 %v3325_v61  ;;  %v800_v1 = vadd.f32 %v3972_v0, %v672_v62  ;;  %v794_v4 = vpop.f32.mrb[15].mxu1  ;;  %v3334_v61 = vld [vmem:[%s6224_s6 + $0xa8] sm:$0xff]  ;;  %v3335_v62 = vld [vmem:[%s6224_s6 + $0xb0] sm:$0xff]  ;;  %v3357_v0 = vld [vmem:[%s6223_s5 + $0x18] sm:$0xff] }
 0x487   :  { %4836 = vpow2.f32 %v3324_v63  ;;  %v795_v5 = vadd.f32 %v794_v4, %v667_v54  ;;  %v3336_v63 = vld [vmem:[%s6224_s6 + $0xb8] sm:$0xff] }
 0x488   :  { %v3327_v6 = vmul.f32 -1.442695, %v800_v1  ;;  %v1152_v1 = vmul.f32 %v3357_v0, %v5149_v29 }
 0x489   :  { %v3326_v7 = vmul.f32 -1.442695, %v795_v5 }
 0x48a   :  { %4838 = vpow2.f32 %v3327_v6  ;;  %v1153_v4 = vmul.f32 %v1152_v1, %v5154_v30  ;;  %v1154_v5 = vmul.f32 %v1152_v1, %v5159_v31  ;;  %v1156_v8 = vmul.f32 %v1152_v1, %v5178_v36 }
 0x48b   :  { %4840 = vpow2.f32 %v3326_v7  ;;  %v1155_v7 = vmul.f32 %v1152_v1, %v5173_v35  ;;  %v1159_v29 = vmul.f32 %v1152_v1, %v5217_v52  ;;  %v1160_v30 = vmul.f32 %v1152_v1, %v5222_v53 }
 0x48c   :  { %v4552_v6 = vpack.c.bf16 %v1154_v5, %v1153_v4  ;;  %v1161_v35 = vmul.f32 %v1152_v1, %v5237_v59  ;;  %v1162_v36 = vmul.f32 %v1152_v1, %v5242_v60  ;;  %v1165_v52 = vmul.f32 %v1152_v1, %v5277_v9 }
 0x48d   :  { %v4564_v31 = vpack.c.bf16 %v1160_v30, %v1159_v29  ;;  %v1166_v53 = vmul.f32 %v1152_v1, %v5282_v10  ;;  %v1167_v59 = vmul.f32 %v1152_v1, %v5297_v16  ;;  %v1168_v60 = vmul.f32 %v1152_v1, %v5302_v17 }
 0x48e   :  { %v4568_v15 = vpack.c.bf16 %v1162_v36, %v1161_v35  ;;  %v3359_v36 = vld [vmem:[%s6224_s6 + $0xc8] sm:$0xff] }
 0x490   :  { %v4835_v11 = vpop.eup %4834 }
 0x491   :  { %v4837_v12 = vpop.eup %4836  ;;  %v816_v13 = vadd.f32 1.0, %v4835_v11  ;;  %v4556_v11 = vpack.c.bf16 %v1156_v8, %v1155_v7 }
 0x492   :  { %v815_v14 = vadd.f32 1.0, %v4837_v12  ;;  %v1157_v12 = vmul.f32 %v1152_v1, %v5197_v45  ;;  %v1163_v45 = vmul.f32 %v1152_v1, %v5257_v2 }
 0x493   :  { %4842 = vrcp.f32 %v816_v13  ;;  %v1158_v13 = vmul.f32 %v1152_v1, %v5202_v46  ;;  %v1164_v46 = vmul.f32 %v1152_v1, %v5262_v3 }
 0x494   :  { %v4839_v18 = vpop.eup %4838  ;;  %4844 = vrcp.f32 %v815_v14 }
 0x495   :  { %v4841_v19 = vpop.eup %4840  ;;  %v818_v20 = vadd.f32 1.0, %v4839_v18  ;;  %v4560_v14 = vpack.c.bf16 %v1158_v13, %v1157_v12  ;;  %v4572_v18 = vpack.c.bf16 %v1164_v46, %v1163_v45  ;;  %v3361_v45 = vld [vmem:[%s6224_s6 + $0xd8] sm:$0xff]  ;;  %v3362_v46 = vld [vmem:[%s6224_s6 + $0xe0] sm:$0xff] }
 0x496   :  { %v817_v21 = vadd.f32 1.0, %v4841_v19  ;;  %v4576_v19 = vpack.c.bf16 %v1166_v53, %v1165_v52  ;;  %v3364_v52 = vld [vmem:[%s6224_s6 + $0xf0] sm:$0xff]  ;;  %v3365_v53 = vld [vmem:[%s6224_s6 + $0xf8] sm:$0xff] }
 0x497   :  { %4846 = vrcp.f32 %v818_v20  ;;  %v4580_v20 = vpack.c.bf16 %v1168_v60, %v1167_v59 }
 0x498   :  { %4848 = vrcp.f32 %v817_v21 }
 0x499   :  { %v4007_v23 = vpop.f32.mrb[16].mxu1 }
 0x49a   :  { %v916_v24 = vpop.f32.mrb[17].mxu1 }
 0x49b   :  { %v4536_v25 = vpack.c.bf16 %v4007_v23, %v916_v24  ;;  %v981_v23 = vpop.permute.xlu1 %980 }
 0x49d   :  { %v4843_v32 = vpop.eup %4842  ;;  %v4010_v42 = vpop.f32.mrb[18].mxu1  ;;  %4537 = vmatprep.subr.bf16.mxu0 %v4536_v25 }
 0x49e   :  { %v4845_v43 = vpop.eup %4844  ;;  %v926_v44 = vpop.f32.mrb[19].mxu1  ;;  %4539 = vmatpush3.bf16.msra.mxu0 %v4536_v25  ;;  %v5452_v26 = vmul.f32 %v4843_v32, %v770_v28 }
 0x49f   :  { %v4540_v27 = vpack.c.bf16 %v4010_v42, %v926_v44  ;;  %v5454_v54 = vmul.f32 %v4845_v43, %v765_v41  ;;  %v991_v32 = vpop.permute.xlu1 %990 }
 0x4a1   :  { %v4847_v56 = vpop.eup %4846  ;;  %4541 = vmatprep.subr.bf16.mxu0 %v4540_v27 }
 0x4a2   :  { %v4849_v58 = vpop.eup %4848  ;;  %4543 = vmatpush3.bf16.msra.mxu0 %v4540_v27  ;;  %v5456_v40 = vmul.f32 %v4847_v56, %v780_v55 }
 0x4a3   :  { %4545 = vmatprep.subr.bf16.mxu0 %v5326_v47  ;;  %v5459_v34 = vmul.f32 %v4849_v58, %v775_v57 }
 0x4a6   :  { %4547 = vmatpush3.bf16.msra.mxu0 %v5326_v47  ;;  %v3332_v47 = vld [vmem:[%s6224_s6 + $0x98] sm:$0xff] }
 0x4a7   :  { %4549 = vmatprep.subr.bf16.mxu0 %v5331_v48 }
 0x4aa   :  { %4551 = vmatpush3.bf16.msra.mxu0 %v5331_v48  ;;  %v3333_v48 = vld [vmem:[%s6224_s6 + $0xa0] sm:$0xff] }
 0x4ab   :  { %4553 = vmatprep.subr.bf16.mxu0 %v4552_v6 }
 0x4ad   :  { %4028 = vmatmul.mubr.msk.f32.vlgmr.msra.gmra.mrb[12].mxu0 %vm354_vm2, %v3330_v51 }
 0x4ae   :  { %4030 = vmatprep.mubr.msk.f32.mxu0 %vm354_vm2, %v3331_v37  ;;  %4555 = vmatpush3.bf16.msra.mxu0 %v4552_v6 }
 0x4af   :  { %4557 = vmatprep.subr.bf16.mxu0 %v4556_v11 }
 0x4b1   :  { %4031 = vmatmul.mubr.msk.f32.gmra.mrb[14].mxu0 %vm354_vm2, %v3332_v47  ;;  %v961_v47 = vpop.permute.xlu1 %960 }
 0x4b2   :  { %4033 = vmatprep.mubr.msk.f32.mxu0 %vm354_vm2, %v3333_v48  ;;  %4559 = vmatpush3.bf16.msra.mxu0 %v4556_v11 }
 0x4b3   :  { %4561 = vmatprep.subr.bf16.mxu0 %v4560_v14 }
 0x4b5   :  { %4034 = vmatmul.mubr.msk.f32.gmra.mrb[16].mxu0 %vm354_vm2, %v3334_v61  ;;  %v971_v0 = vpop.permute.xlu1 %970 }
 0x4b6   :  { %4036 = vmatprep.mubr.msk.f32.mxu0 %vm354_vm2, %v3335_v62  ;;  %4563 = vmatpush3.bf16.msra.mxu0 %v4560_v14 }
 0x4b7   :  { %4565 = vmatprep.subr.bf16.mxu0 %v4564_v31 }
 0x4b9   :  { %4037 = vmatmul.mubr.msk.f32.gmra.mrb[18].mxu0 %vm354_vm2, %v3336_v63 }
 0x4ba   :  { %4567 = vmatpush3.bf16.msra.mxu0 %v4564_v31 }
 0x4bb   :  { %4569 = vmatprep.subr.bf16.mxu0 %v4568_v15 }
 0x4be   :  { %4571 = vmatpush3.bf16.msra.mxu0 %v4568_v15  ;;  %v3360_v15 = vld [vmem:[%s6224_s6 + $0xd0] sm:$0xff] }
 0x4bf   :  { %4573 = vmatprep.subr.bf16.mxu0 %v4572_v18 }
 0x4c2   :  { %4575 = vmatpush3.bf16.msra.mxu0 %v4572_v18  ;;  %v3363_v18 = vld [vmem:[%s6224_s6 + $0xe8] sm:$0xff] }
 0x4c3   :  { %4577 = vmatprep.subr.bf16.mxu0 %v4576_v19 }
 0x4c6   :  { %4579 = vmatpush3.bf16.msra.mxu0 %v4576_v19  ;;  %v1295_v19 = vpop.permute.xlu1 %1294 }
 0x4c7   :  { %4581 = vmatprep.subr.bf16.mxu0 %v4580_v20 }
 0x4ca   :  { %4583 = vmatpush3.bf16.msra.mxu0 %v4580_v20  ;;  %v1300_v59 = vpop.permute.xlu1 %1299 }
 0x580   :  { %v4029_v2 = vpop.f32.mrb[12].mxu0 }
 0x581   :  { %v1083_v3 = vpop.f32.mrb[13].mxu0  ;;  %v1089_v48 = vadd.f32 %v4029_v2, %v961_v47 }
 0x584   :  { %v4032_v21 = vpop.f32.mrb[14].mxu0 }
 0x585   :  { %v1093_v22 = vpop.f32.mrb[15].mxu0  ;;  %v1099_v4 = vadd.f32 %v4032_v21, %v971_v0  ;;  %v1305_v21 = vpop.permute.xlu1 %1304 }
 0x586   :  { %v1094_v6 = vadd.f32 %v1093_v22, %v5450_v50 }
 0x588   :  { %v4035_v24 = vpop.f32.mrb[16].mxu0 }
 0x589   :  { %v1109_v9 = vadd.f32 %v4035_v24, %v981_v23  ;;  %v1103_v25 = vpop.f32.mrb[17].mxu0 }
 0x58a   :  { %v1104_v10 = vadd.f32 %v1103_v25, %v5444_v49 }
 0x58b   :  { %v3354_v28 = vmul.f32 -1.442695, %v1109_v9 }
 0x58c   :  { %v3353_v16 = vmul.f32 -1.442695, %v1104_v10  ;;  %v4038_v41 = vpop.f32.mrb[18].mxu0  ;;  %v1310_v10 = vpop.permute.xlu1 %1309 }
 0x58d   :  { %4850 = vpow2.f32 %v3354_v28  ;;  %v1119_v17 = vadd.f32 %v4038_v41, %v991_v32  ;;  %v1113_v42 = vpop.f32.mrb[19].mxu0 }
 0x58e   :  { %4852 = vpow2.f32 %v3353_v16  ;;  %v1114_v43 = vadd.f32 %v1113_v42, %v5446_v33  ;;  %v1084_v33 = vadd.f32 %v1083_v3, %v5448_v38  ;;  %v3358_v38 = vld [vmem:[%s6224_s6 + $0xc0] sm:$0xff] }
 0x58f   :  { %v3356_v44 = vmul.f32 -1.442695, %v1119_v17  ;;  %4093 = vmatprep.mubr.msk.f32.mxu1 %vm354_vm2, %v3358_v38 }
 0x590   :  { %v3355_v39 = vmul.f32 -1.442695, %v1114_v43 }
 0x591   :  { %4854 = vpow2.f32 %v3356_v44  ;;  %v1275_v44 = vpop.permute.xlu1 %1274 }
 0x592   :  { %4856 = vpow2.f32 %v3355_v39 }
 0x597   :  { %v4851_v27 = vpop.eup %4850 }
 0x598   :  { %v4853_v55 = vpop.eup %4852  ;;  %v1135_v56 = vadd.f32 1.0, %v4851_v27 }
 0x599   :  { %v1134_v57 = vadd.f32 1.0, %v4853_v55 }
 0x59a   :  { %4858 = vrcp.f32 %v1135_v56 }
 0x59b   :  { %v4855_v49 = vpop.eup %4854  ;;  %4860 = vrcp.f32 %v1134_v57  ;;  %v1280_v57 = vpop.permute.xlu1 %1279 }
 0x59c   :  { %v4857_v58 = vpop.eup %4856  ;;  %v1137_v51 = vadd.f32 1.0, %v4855_v49 }
 0x59d   :  { %v1136_v37 = vadd.f32 1.0, %v4857_v58 }
 0x59e   :  { %4862 = vrcp.f32 %v1137_v51 }
 0x59f   :  { %4864 = vrcp.f32 %v1136_v37  ;;  %v1285_v47 = vpop.permute.xlu1 %1284 }
 0x5a3   :  { %v1290_v0 = vpop.permute.xlu1 %1289 }
 0x5a4   :  { %v4859_v61 = vpop.eup %4858 }
 0x5a5   :  { %v4861_v62 = vpop.eup %4860  ;;  %v1147_v63 = vmul.f32 %v4859_v61, %v1089_v48 }
 0x5a6   :  { %v1146_v1 = vmul.f32 %v4861_v62, %v1084_v33 }
 0x5a8   :  { %v4863_v5 = vpop.eup %4862  ;;  %4071 = vmatprep.mubr.f32.mxu0 %v1146_v1  ;;  %v4592_v7 = vpack.c.bf16 %v1147_v63, %v1146_v1 }
 0x5a9   :  { %v4865_v8 = vpop.eup %4864  ;;  %4072 = vmatmul.mubr.f32.vlgmr.msra.gmra.mrb[20].mxu0 %v1147_v63  ;;  %v1149_v11 = vmul.f32 %v4863_v5, %v1099_v4 }
 0x5aa   :  { %v1148_v12 = vmul.f32 %v4865_v8, %v1094_v6 }
 0x5ac   :  { %4074 = vmatprep.mubr.f32.mxu0 %v1148_v12  ;;  %v4596_v13 = vpack.c.bf16 %v1149_v11, %v1148_v12 }
 0x5ad   :  { %4075 = vmatmul.mubr.f32.gmra.mrb[22].mxu0 %v1149_v11 }
 0x67c   :  { %v4073_v14 = vpop.f32.mrb[20].mxu0 }
 0x67d   :  { %v1235_v29 = vpop.f32.mrb[21].mxu0 }
 0x67e   :  { %v4584_v30 = vpack.c.bf16 %v4073_v14, %v1235_v29 }
 0x680   :  { %v4076_v31 = vpop.f32.mrb[22].mxu0  ;;  %4585 = vmatprep.subr.bf16.mxu1 %v4584_v30 }
 0x681   :  { %v1245_v50 = vpop.f32.mrb[23].mxu0  ;;  %4587 = vmatpush3.bf16.msra.mxu1 %v4584_v30  ;;  %v5578_v30 = vld [vmem:[%s6221_s1] sm:$0xff] }
 0x682   :  { %v4588_v35 = vpack.c.bf16 %v4076_v31, %v1245_v50  ;;  %v5586_v50 = vld [vmem:[%s6222_s4] sm:$0xff] }
 0x684   :  { %4589 = vmatprep.subr.bf16.mxu1 %v4588_v35 }
 0x685   :  { %4591 = vmatpush3.bf16.msra.mxu1 %v4588_v35 }
 0x686   :  { %4593 = vmatprep.subr.bf16.mxu1 %v4592_v7 }
 0x689   :  { %4595 = vmatpush3.bf16.msra.mxu1 %v4592_v7 }
 0x68a   :  { %4597 = vmatprep.subr.bf16.mxu1 %v4596_v13 }
 0x68d   :  { %4599 = vmatpush3.bf16.msra.mxu1 %v4596_v13 }
 0x690   :  { %4094 = vmatmul.mubr.msk.f32.vlgmr.msra.gmra.mrb[20].mxu1 %vm354_vm2, %v3359_v36  ;;  %v5593_v36 = vld [vmem:[%s6222_s4 + $0x8] sm:$0xff] }
 0x691   :  { %4096 = vmatprep.mubr.msk.f32.mxu1 %vm354_vm2, %v3360_v15 }
 0x694   :  { %4097 = vmatmul.mubr.msk.f32.gmra.mrb[22].mxu1 %vm354_vm2, %v3361_v45  ;;  %v5600_v45 = vld [vmem:[%s6222_s4 + $0x10] sm:$0xff] }
 0x695   :  { %4099 = vmatprep.mubr.msk.f32.mxu1 %vm354_vm2, %v3362_v46 }
 0x698   :  { %4100 = vmatmul.mubr.msk.f32.gmra.mrb[24].mxu1 %vm354_vm2, %v3363_v18  ;;  %v5607_v18 = vld [vmem:[%s6222_s4 + $0x18] sm:$0xff] }
 0x699   :  { %4102 = vmatprep.mubr.msk.f32.mxu1 %vm354_vm2, %v3364_v52 }
 0x69c   :  { %4103 = vmatmul.mubr.msk.f32.gmra.mrb[26].mxu1 %vm354_vm2, %v3365_v53 }
 0x763   :  { %v4095_v60 = vpop.f32.mrb[20].mxu1 }
 0x764   :  { %v1402_v20 = vpop.f32.mrb[21].mxu1  ;;  %v1408_v48 = vadd.f32 %v4095_v60, %v1280_v57 }
 0x765   :  { %v1403_v33 = vadd.f32 %v1402_v20, %v1275_v44  ;;  %v5621_v20 = vld [vmem:[%s6222_s4 + $0x28] sm:$0xff] }
 0x767   :  { %v4098_v2 = vpop.f32.mrb[22].mxu1 }
 0x768   :  { %v1412_v3 = vpop.f32.mrb[23].mxu1  ;;  %v1418_v4 = vadd.f32 %v4098_v2, %v1290_v0 }
 0x769   :  { %v1413_v7 = vadd.f32 %v1412_v3, %v1285_v47 }
 0x76b   :  { %v4101_v22 = vpop.f32.mrb[24].mxu1 }
 0x76c   :  { %v1428_v23 = vadd.f32 %v4101_v22, %v1300_v59  ;;  %v1422_v24 = vpop.f32.mrb[25].mxu1  ;;  %v5614_v59 = vld [vmem:[%s6222_s4 + $0x20] sm:$0xff] }
 0x76d   :  { %v1423_v9 = vadd.f32 %v1422_v24, %v1295_v19 }
 0x76e   :  { %v3383_v25 = vmul.f32 -1.442695, %v1428_v23  ;;  %v5635_v23 = vld [vmem:[%s6222_s4 + $0x38] sm:$0xff] }
 0x76f   :  { %v3382_v28 = vmul.f32 -1.442695, %v1423_v9  ;;  %v4104_v32 = vpop.f32.mrb[26].mxu1 }
 0x770   :  { %4866 = vpow2.f32 %v3383_v25  ;;  %v1438_v16 = vadd.f32 %v4104_v32, %v1310_v10  ;;  %v1432_v41 = vpop.f32.mrb[27].mxu1  ;;  %v5642_v25 = vld [vmem:[%s6222_s4 + $0x40] sm:$0xff] }
 0x771   :  { %4868 = vpow2.f32 %v3382_v28  ;;  %v1433_v17 = vadd.f32 %v1432_v41, %v1305_v21  ;;  %v5628_v21 = vld [vmem:[%s6222_s4 + $0x30] sm:$0xff]  ;;  %v5649_v28 = vld [vmem:[%s6222_s4 + $0x48] sm:$0xff] }
 0x772   :  { %v3385_v42 = vmul.f32 -1.442695, %v1438_v16 }
 0x773   :  { %v3384_v43 = vmul.f32 -1.442695, %v1433_v17 }
 0x774   :  { %4870 = vpow2.f32 %v3385_v42 }
 0x775   :  { %4872 = vpow2.f32 %v3384_v43 }
 0x77a   :  { %v4867_v39 = vpop.eup %4866 }
 0x77b   :  { %v4869_v27 = vpop.eup %4868  ;;  %v1454_v55 = vadd.f32 1.0, %v4867_v39 }
 0x77c   :  { %v1453_v56 = vadd.f32 1.0, %v4869_v27 }
 0x77d   :  { %4874 = vrcp.f32 %v1454_v55 }
 0x77e   :  { %v4871_v49 = vpop.eup %4870  ;;  %4876 = vrcp.f32 %v1453_v56 }
 0x77f   :  { %v4873_v58 = vpop.eup %4872  ;;  %v1456_v51 = vadd.f32 1.0, %v4871_v49 }
 0x780   :  { %v1455_v37 = vadd.f32 1.0, %v4873_v58 }
 0x781   :  { %4878 = vrcp.f32 %v1456_v51 }
 0x782   :  { %4880 = vrcp.f32 %v1455_v37 }
 0x787   :  { %v4875_v61 = vpop.eup %4874 }
 0x788   :  { %v4877_v62 = vpop.eup %4876  ;;  %v1466_v63 = vmul.f32 %v4875_v61, %v1408_v48 }
 0x789   :  { %v1465_v1 = vmul.f32 %v4877_v62, %v1403_v33 }
 0x78a   :  { %v5549_v5 = vmax.f32 %v5452_v26, %v1466_v63 }
 0x78b   :  { %v4879_v6 = vpop.eup %4878  ;;  %v5552_v8 = vmax.f32 %v5454_v54, %v1465_v1 }
 0x78c   :  { %v4881_v11 = vpop.eup %4880  ;;  %1475 = vadd.xlane.f32.xlu1 %v5549_v5  ;;  %v1468_v12 = vmul.f32 %v4879_v6, %v1418_v4  ;;  %v1482_v26 = vmul.f32 %v5549_v5, %v5549_v5 }
 0x78d   :  { %1473 = vadd.xlane.f32.xlu0 %v5552_v8  ;;  %v1467_v13 = vmul.f32 %v4881_v11, %v1413_v7  ;;  %v1481_v29 = vmul.f32 %v5552_v8, %v5552_v8 }
 0x78e   :  { %v5557_v38 = vmax.f32 %v5456_v40, %v1468_v12 }
 0x78f   :  { %v5560_v14 = vmax.f32 %v5459_v34, %v1467_v13  ;;  %v3386_v34 = vld [vmem:[%s6223_s5 + $0x20] sm:$0xff] }
 0x790   :  { %v1484_v40 = vmul.f32 %v5557_v38, %v5557_v38  ;;  %v5581_v31 = vmul.f32 %v5578_v30, %v3386_v34 }
 0x791   :  { %1477 = vadd.xlane.f32.xlu1 %v5560_v14  ;;  %1487 = vadd.xlane.f32.xlu0 %v1482_v26  ;;  %v1483_v54 = vmul.f32 %v5560_v14, %v5560_v14 }
 0x792   :  { %v1592_v35 = vmul.f32 %v5586_v50, %v5581_v31  ;;  %v1593_v15 = vmul.f32 %v5593_v36, %v5581_v31  ;;  %v1594_v46 = vmul.f32 %v5600_v45, %v5581_v31  ;;  %v1595_v52 = vmul.f32 %v5607_v18, %v5581_v31 }
 0x793   :  { %v1596_v60 = vmul.f32 %v5614_v59, %v5581_v31  ;;  %v1597_v2 = vmul.f32 %v5621_v20, %v5581_v31  ;;  %v1598_v22 = vmul.f32 %v5628_v21, %v5581_v31  ;;  %v1599_v24 = vmul.f32 %v5635_v23, %v5581_v31 }
 0x794   :  { %v4600_v53 = vpack.c.bf16 %v1593_v15, %v1592_v35  ;;  %v4604_v19 = vpack.c.bf16 %v1595_v52, %v1594_v46  ;;  %v1600_v10 = vmul.f32 %v5642_v25, %v5581_v31  ;;  %v1601_v32 = vmul.f32 %v5649_v28, %v5581_v31  ;;  %v1515_v46 = vld [vmem:[%s6225_s8 + $0x10] sm:$0xff]  ;;  %v1513_v52 = vld [vmem:[%s6225_s8] sm:$0xff] }
 0x795   :  { %1489 = vadd.xlane.f32.xlu1 %v1483_v54  ;;  %1485 = vadd.xlane.f32.xlu0 %v1481_v29  ;;  %v4608_v3 = vpack.c.bf16 %v1597_v2, %v1596_v60  ;;  %v4612_v9 = vpack.c.bf16 %v1599_v24, %v1598_v22  ;;  %v5680_v60 = vld [vmem:[%s6222_s4 + $0x58] sm:$0xff] }
 0x796   :  { %4601 = vmatprep.subr.bf16.mxu1 %v4600_v53  ;;  %v4616_v17 = vpack.c.bf16 %v1601_v32, %v1600_v10  ;;  %v1603_v2 = vmul.f32 %v5680_v60, %v5581_v31  ;;  %v1555_v32 = vld [vmem:[%s6226_s9 + $0x10] sm:$0xff] }
 0x797   :  { %4603 = vmatpush3.bf16.msra.mxu1 %v4600_v53  ;;  %v5673_v53 = vld [vmem:[%s6222_s4 + $0x50] sm:$0xff] }
 0x798   :  { %4605 = vmatprep.subr.bf16.mxu1 %v4604_v19 }
 0x799   :  { %1479 = vadd.xlane.f32.xlu0 %v5557_v38 }
 0x79b   :  { %4607 = vmatpush3.bf16.msra.mxu1 %v4604_v19  ;;  %v1602_v19 = vmul.f32 %v5673_v53, %v5581_v31 }
 0x79c   :  { %4609 = vmatprep.subr.bf16.mxu1 %v4608_v3 }
 0x79d   :  { %1491 = vadd.xlane.f32.xlu0 %v1484_v40  ;;  %v1514_v40 = vld [vmem:[%s6225_s8 + $0x8] sm:$0xff] }
 0x79f   :  { %4611 = vmatpush3.bf16.msra.mxu1 %v4608_v3 }
 0x7a0   :  { %4613 = vmatprep.subr.bf16.mxu1 %v4612_v9 }
 0x7a3   :  { %4615 = vmatpush3.bf16.msra.mxu1 %v4612_v9  ;;  %v4620_v9 = vpack.c.bf16 %v1603_v2, %v1602_v19  ;;  %v3486_v19 = vld [vmem:[%s6220_s7 + $0x1e0] sm:$0xff]  ;;  %v3454_v2 = vld [vmem:[%s6220_s7 + $0x188] sm:$0xff] }
 0x7a4   :  { %4617 = vmatprep.subr.bf16.mxu1 %v4616_v17 }
 0x7a7   :  { %4619 = vmatpush3.bf16.msra.mxu1 %v4616_v17  ;;  %v1554_v17 = vld [vmem:[%s6226_s9 + $0x8] sm:$0xff] }
 0x7a8   :  { %4621 = vmatprep.subr.bf16.mxu1 %v4620_v9 }
 0x7ab   :  { %4623 = vmatpush3.bf16.msra.mxu1 %v4620_v9  ;;  %v3429_v9 = vld [vmem:[%s6220_s7 + $0x168] sm:$0xff] }
 0x819   :  { %v1476_v16 = vpop.xlane.xlu1 %1475 }
 0x81a   :  { %v1474_v41 = vpop.xlane.xlu0 %1473  ;;  %v1494_v42 = vmul.f32 0.0078125, %v1476_v16 }
 0x81b   :  { %v5653_v43 = vmul.f32 0.0078125, %v1474_v41 }
 0x81c   :  { %v1502_v27 = vmul.f32 %v1494_v42, %v1494_v42 }
 0x81d   :  { %v1501_v49 = vmul.f32 %v5653_v43, %v5653_v43 }
 0x81e   :  { %v1478_v44 = vpop.xlane.xlu1 %1477  ;;  %v1488_v39 = vpop.xlane.xlu0 %1487 }
 0x81f   :  { %v1495_v55 = vmul.f32 0.0078125, %v1478_v44  ;;  %v1498_v56 = vmul.f32 0.0078125, %v1488_v39  ;;  %v5693_v44 = vld [vmem:[%s6222_s4 + $0x60] sm:$0xff] }
 0x820   :  { %v1604_v39 = vmul.f32 %v5693_v44, %v5581_v31 }
 0x821   :  { %v1506_v57 = vsub.f32 %v1498_v56, %v1502_v27  ;;  %v1503_v37 = vmul.f32 %v1495_v55, %v1495_v55  ;;  %v5700_v27 = vld [vmem:[%s6222_s4 + $0x68] sm:$0xff] }
 0x822   :  { %v1490_v58 = vpop.xlane.xlu1 %1489  ;;  %v1486_v51 = vpop.xlane.xlu0 %1485 }
 0x823   :  { %v1510_v47 = vmax.f32 %v1506_v57, 0.0  ;;  %v1499_v48 = vmul.f32 0.0078125, %v1490_v58  ;;  %v1497_v61 = vmul.f32 0.0078125, %v1486_v51  ;;  %v1553_v58 = vld [vmem:[%s6226_s9] sm:$0xff]  ;;  %v1516_v51 = vld [vmem:[%s6225_s8 + $0x18] sm:$0xff] }
 0x825   :  { %v1518_v33 = vadd.f32 1e-05, %v1510_v47  ;;  %v1507_v62 = vsub.f32 %v1499_v48, %v1503_v37  ;;  %v1505_v63 = vsub.f32 %v1497_v61, %v1501_v49  ;;  %v5714_v37 = vld [vmem:[%s6222_s4 + $0x70] sm:$0xff] }
 0x826   :  { %v1480_v0 = vpop.xlane.xlu0 %1479  ;;  %v1606_v47 = vmul.f32 %v5714_v37, %v5581_v31 }
 0x827   :  { %4882 = vrsqrt.f32 %v1518_v33  ;;  %v1511_v1 = vmax.f32 %v1507_v62, 0.0  ;;  %v1509_v4 = vmax.f32 %v1505_v63, 0.0  ;;  %v5657_v6 = vmul.f32 0.0078125, %v1480_v0  ;;  %v3399_v33 = vld [vmem:[%s6220_s7 + $0x120] sm:$0xff] }
 0x829   :  { %v1519_v7 = vadd.f32 1e-05, %v1511_v1  ;;  %v1517_v11 = vadd.f32 1e-05, %v1509_v4  ;;  %v1504_v13 = vmul.f32 %v5657_v6, %v5657_v6  ;;  %v3401_v1 = vld [vmem:[%s6220_s7 + $0x130] sm:$0xff]  ;;  %v1556_v4 = vld [vmem:[%s6226_s9 + $0x18] sm:$0xff] }
 0x82a   :  { %v1492_v12 = vpop.xlane.xlu0 %1491 }
 0x82b   :  { %4884 = vrsqrt.f32 %v1519_v7  ;;  %v1500_v26 = vmul.f32 0.0078125, %v1492_v12  ;;  %v3395_v7 = vld [vmem:[%s6220_s7 + $0x100] sm:$0xff]  ;;  %v3397_v12 = vld [vmem:[%s6220_s7 + $0x110] sm:$0xff] }
 0x82c   :  { %4886 = vrsqrt.f32 %v1517_v11 }
 0x82d   :  { %v1508_v54 = vsub.f32 %v1500_v26, %v1504_v13  ;;  %v3457_v13 = vld [vmem:[%s6220_s7 + $0x1a0] sm:$0xff]  ;;  %v3402_v26 = vld [vmem:[%s6220_s7 + $0x138] sm:$0xff] }
 0x82f   :  { %v1512_v29 = vmax.f32 %v1508_v54, 0.0  ;;  %v3459_v54 = vld [vmem:[%s6220_s7 + $0x1b0] sm:$0xff] }
 0x831   :  { %v4883_v34 = vpop.eup %4882  ;;  %v1520_v35 = vadd.f32 1e-05, %v1512_v29  ;;  %v3396_v29 = vld [vmem:[%s6220_s7 + $0x108] sm:$0xff] }
 0x832   :  { %v1526_v15 = vmul.f32 %v4883_v34, %v1514_v40  ;;  %v3453_v40 = vld [vmem:[%s6220_s7 + $0x180] sm:$0xff]  ;;  %v3398_v34 = vld [vmem:[%s6220_s7 + $0x118] sm:$0xff] }
 0x833   :  { %4888 = vrsqrt.f32 %v1520_v35  ;;  %v3455_v35 = vld [vmem:[%s6220_s7 + $0x190] sm:$0xff] }
 0x834   :  { %1536 = vperm.xlu0 %4816, %v1526_v15   ;;  %v1558_v16 = vmul.f32 %v1526_v15, %v1494_v42  ;;  %v1605_v42 = vmul.f32 %v5700_v27, %v5581_v31  ;;  %v3458_v15 = vld [vmem:[%s6220_s7 + $0x1a8] sm:$0xff] }
 0x835   :  { %v4885_v3 = vpop.eup %4884 }
 0x836   :  { %v4887_v22 = vpop.eup %4886  ;;  %v1527_v24 = vmul.f32 %v4885_v3, %v1515_v46  ;;  %v4624_v56 = vpack.c.bf16 %v1605_v42, %v1604_v39  ;;  %v1562_v57 = vsub.f32 %v1554_v17, %v1558_v16  ;;  %v3428_v46 = vld [vmem:[%s6220_s7 + $0x160] sm:$0xff]  ;;  %v3430_v3 = vld [vmem:[%s6220_s7 + $0x170] sm:$0xff]  ;;  %v3489_v39 = vld [vmem:[%s6220_s7 + $0x1f8] sm:$0xff] }
 0x837   :  { %v1525_v10 = vmul.f32 %v4887_v22, %v1513_v52  ;;  %v3460_v52 = vld [vmem:[%s6220_s7 + $0x1b8] sm:$0xff]  ;;  %v3482_v16 = vld [vmem:[%s6220_s7 + $0x1c0] sm:$0xff]  ;;  %v3426_v17 = vld [vmem:[%s6220_s7 + $0x150] sm:$0xff] }
 0x838   :  { %1541 = vperm.xlu0 %4816, %v1527_v24   ;;  %v1559_v41 = vmul.f32 %v1527_v24, %v1495_v55  ;;  %4625 = vmatprep.subr.bf16.mxu1 %v4624_v56  ;;  %v3456_v22 = vld [vmem:[%s6220_s7 + $0x198] sm:$0xff]  ;;  %v3488_v24 = vld [vmem:[%s6220_s7 + $0x1f0] sm:$0xff] }
 0x839   :  { %1531 = vperm.xlu1 %4817, %v1525_v10   ;;  %v1557_v49 = vmul.f32 %v1525_v10, %v5653_v43  ;;  %v5721_v43 = vld [vmem:[%s6222_s4 + $0x78] sm:$0xff]  ;;  %4627 = vmatpush3.bf16.msra.mxu1 %v4624_v56  ;;  %v3424_v10 = vld [vmem:[%s6220_s7 + $0x140] sm:$0xff]  ;;  %v3484_v42 = vld [vmem:[%s6220_s7 + $0x1d0] sm:$0xff] }
 0x83a   :  { %v1563_v55 = vsub.f32 %v1555_v32, %v1559_v41  ;;  %v1607_v48 = vmul.f32 %v5721_v43, %v5581_v31  ;;  %v3487_v32 = vld [vmem:[%s6220_s7 + $0x1e8] sm:$0xff]  ;;  %v3431_v41 = vld [vmem:[%s6220_s7 + $0x178] sm:$0xff] }
 0x83b   :  { %v1561_v63 = vsub.f32 %v1553_v58, %v1557_v49  ;;  %v3483_v56 = vld [vmem:[%s6220_s7 + $0x1c8] sm:$0xff]  ;;  %v3485_v49 = vld [vmem:[%s6220_s7 + $0x1d8] sm:$0xff] }
 0x83c   :  { %1577 = vperm.xlu0 %4816, %v1563_v55   ;;  %v4628_v62 = vpack.c.bf16 %v1607_v48, %v1606_v47  ;;  %v3425_v55 = vld [vmem:[%s6220_s7 + $0x148] sm:$0xff] }
 0x83d   :  { %v4889_v61 = vpop.eup %4888  ;;  %1572 = vperm.xlu1 %4817, %v1562_v57   ;;  %v3427_v57 = vld [vmem:[%s6220_s7 + $0x158] sm:$0xff] }
 0x83e   :  { %v1528_v0 = vmul.f32 %v4889_v61, %v1516_v51  ;;  %4629 = vmatprep.subr.bf16.mxu1 %v4628_v62 }
 0x83f   :  { %4631 = vmatpush3.bf16.msra.mxu1 %v4628_v62 }
 0x840   :  { %1733 = vperm.xlu0 %4816, %v3399_v33   ;;  %v1560_v31 = vmul.f32 %v1528_v0, %v5657_v6  ;;  %v3400_v6 = vld [vmem:[%s6220_s7 + $0x128] sm:$0xff] }
 0x841   :  { %1567 = vperm.xlu1 %4817, %v1561_v63  }
 0x842   :  { %v1564_v11 = vsub.f32 %v1556_v4, %v1560_v31 }
 0x844   :  { %1743 = vperm.xlu0 %4816, %v3401_v1  }
 0x845   :  { %1546 = vperm.xlu1 %4817, %v1528_v0  }
 0x848   :  { %1713 = vperm.xlu0 %4816, %v3395_v7  }
 0x849   :  { %1582 = vperm.xlu1 %4817, %v1564_v11  }
 0x84c   :  { %1723 = vperm.xlu0 %4816, %v3397_v12  }
 0x84d   :  { %1738 = vperm.xlu1 %4817, %v3400_v6  }
 0x850   :  { %2371 = vperm.xlu0 %4816, %v3457_v13  }
 0x851   :  { %1748 = vperm.xlu1 %4817, %v3402_v26  }
 0x854   :  { %2381 = vperm.xlu0 %4816, %v3459_v54  }
 0x855   :  { %1718 = vperm.xlu1 %4817, %v3396_v29  }
 0x858   :  { %2351 = vperm.xlu0 %4816, %v3453_v40  }
 0x859   :  { %1728 = vperm.xlu1 %4817, %v3398_v34   ;;  %v3388_v34 = vld [vmem:[%s6224_s6 + $0x108] sm:$0xff] }
 0x85c   :  { %2361 = vperm.xlu0 %4816, %v3455_v35   ;;  %v3389_v35 = vld [vmem:[%s6224_s6 + $0x110] sm:$0xff] }
 0x85d   :  { %2376 = vperm.xlu1 %4817, %v3458_v15   ;;  %v3390_v15 = vld [vmem:[%s6224_s6 + $0x118] sm:$0xff] }
 0x860   :  { %2052 = vperm.xlu0 %4816, %v3428_v46   ;;  %v3391_v46 = vld [vmem:[%s6224_s6 + $0x120] sm:$0xff] }
 0x861   :  { %2386 = vperm.xlu1 %4817, %v3460_v52   ;;  %v3392_v52 = vld [vmem:[%s6224_s6 + $0x128] sm:$0xff] }
 0x864   :  { %2690 = vperm.xlu0 %4816, %v3486_v19   ;;  %v3393_v19 = vld [vmem:[%s6224_s6 + $0x130] sm:$0xff] }
 0x865   :  { %2356 = vperm.xlu1 %4817, %v3454_v2   ;;  %v3394_v2 = vld [vmem:[%s6224_s6 + $0x138] sm:$0xff] }
 0x868   :  { %2062 = vperm.xlu0 %4816, %v3430_v3   ;;  %v3415_v3 = vld [vmem:[%s6223_s5 + $0x28] sm:$0xff] }
 0x869   :  { %2366 = vperm.xlu1 %4817, %v3456_v22   ;;  %v1910_v22 = vmul.f32 %v5578_v30, %v3415_v3 }
 0x86c   :  { %2700 = vperm.xlu0 %4816, %v3488_v24   ;;  %v1911_v24 = vmul.f32 %v5586_v50, %v1910_v22 }
 0x86d   :  { %2057 = vperm.xlu1 %4817, %v3429_v9   ;;  %v1912_v9 = vmul.f32 %v5593_v36, %v1910_v22 }
 0x870   :  { %2032 = vperm.xlu0 %4816, %v3424_v10   ;;  %v4648_v10 = vpack.c.bf16 %v1912_v9, %v1911_v24 }
 0x871   :  { %2695 = vperm.xlu1 %4817, %v3487_v32   ;;  %v1913_v32 = vmul.f32 %v5600_v45, %v1910_v22 }
 0x874   :  { %2670 = vperm.xlu0 %4816, %v3482_v16   ;;  %v1914_v16 = vmul.f32 %v5607_v18, %v1910_v22 }
 0x875   :  { %2067 = vperm.xlu1 %4817, %v3431_v41  }
 0x876   :  { %v4652_v41 = vpack.c.bf16 %v1914_v16, %v1913_v32 }
 0x878   :  { %2042 = vperm.xlu0 %4816, %v3426_v17   ;;  %v1915_v17 = vmul.f32 %v5614_v59, %v1910_v22 }
 0x879   :  { %2705 = vperm.xlu1 %4817, %v3489_v39   ;;  %v1916_v39 = vmul.f32 %v5621_v20, %v1910_v22 }
 0x87c   :  { %2680 = vperm.xlu0 %4816, %v3484_v42   ;;  %v4656_v42 = vpack.c.bf16 %v1916_v39, %v1915_v17 }
 0x87d   :  { %2037 = vperm.xlu1 %4817, %v3425_v55   ;;  %v1917_v55 = vmul.f32 %v5628_v21, %v1910_v22 }
 0x881   :  { %2675 = vperm.xlu1 %4817, %v3483_v56   ;;  %v1918_v56 = vmul.f32 %v5635_v23, %v1910_v22 }
 0x885   :  { %2047 = vperm.xlu1 %4817, %v3427_v57   ;;  %v4660_v57 = vpack.c.bf16 %v1918_v56, %v1917_v55 }
 0x889   :  { %2685 = vperm.xlu1 %4817, %v3485_v49   ;;  %v1919_v49 = vmul.f32 %v5642_v25, %v1910_v22 }
 0x8b3   :  { %v1537_v58 = vpop.permute.xlu0 %1536 }
 0x8b4   :  { %v1550_v33 = vmul.f32 %v1537_v58, %v5549_v5  ;;  %v1920_v58 = vmul.f32 %v5649_v28, %v1910_v22 }
 0x8b7   :  { %v1542_v47 = vpop.permute.xlu0 %1541 }
 0x8b8   :  { %v1532_v51 = vpop.permute.xlu1 %1531  ;;  %v1551_v0 = vmul.f32 %v1542_v47, %v5560_v14  ;;  %v3387_v14 = vld [vmem:[%s6224_s6 + $0x100] sm:$0xff]  ;;  %v1921_v47 = vmul.f32 %v5673_v53, %v1910_v22 }
 0x8b9   :  { %v1549_v61 = vmul.f32 %v1532_v51, %v5552_v8  ;;  %4159 = vmatprep.mubr.msk.f32.mxu0 %vm354_vm2, %v3387_v14  ;;  %v4664_v51 = vpack.c.bf16 %v1920_v58, %v1919_v49 }
 0x8bb   :  { %v1578_v62 = vpop.permute.xlu0 %1577 }
 0x8bc   :  { %v1573_v48 = vpop.permute.xlu1 %1572  ;;  %v5832_v4 = vadd.f32 %v1578_v62, %v1551_v0  ;;  %v1924_v62 = vmul.f32 %v5700_v27, %v1910_v22  ;;  %v1925_v0 = vmul.f32 %v5714_v37, %v1910_v22 }
 0x8bd   :  { %v5830_v31 = vadd.f32 %v1573_v48, %v1550_v33  ;;  %v1922_v48 = vmul.f32 %v5680_v60, %v1910_v22  ;;  %v1923_v33 = vmul.f32 %v5693_v44, %v1910_v22 }
 0x8c0   :  { %v1568_v63 = vpop.permute.xlu1 %1567 }
 0x8c1   :  { %v5828_v1 = vadd.f32 %v1568_v63, %v1549_v61  ;;  %v4668_v61 = vpack.c.bf16 %v1922_v48, %v1921_v47  ;;  %v4672_v63 = vpack.c.bf16 %v1924_v62, %v1923_v33 }
 0x8c3   :  { %4137 = vmatprep.mubr.f32.mxu1 %v5828_v1 }
 0x8c4   :  { %v1547_v7 = vpop.permute.xlu1 %1546  ;;  %4138 = vmatmul.mubr.f32.vlgmr.msra.gmra.mrb[28].mxu1 %v5830_v31 }
 0x8c5   :  { %4140 = vmatprep.mubr.f32.mxu1 %v5832_v4  ;;  %v1552_v8 = vmul.f32 %v1547_v7, %v5557_v38  ;;  %v5847_v38 = vpack.c.bf16 %v5830_v31, %v5828_v1  ;;  %v1926_v7 = vmul.f32 %v5721_v43, %v1910_v22 }
 0x8c8   :  { %v1583_v5 = vpop.permute.xlu1 %1582 }
 0x8c9   :  { %v5838_v11 = vadd.f32 %v1583_v5, %v1552_v8  ;;  %v4676_v8 = vpack.c.bf16 %v1926_v7, %v1925_v0 }
 0x8cb   :  { %4141 = vmatmul.mubr.f32.gmra.mrb[30].mxu1 %v5838_v11  ;;  %v5852_v40 = vpack.c.bf16 %v5838_v11, %v5832_v4 }
 0x997   :  { %v4139_v12 = vpop.f32.mrb[28].mxu1 }
 0x998   :  { %v1674_v6 = vpop.f32.mrb[29].mxu1 }
 0x999   :  { %v4632_v13 = vpack.c.bf16 %v4139_v12, %v1674_v6 }
 0x99b   :  { %4633 = vmatprep.subr.bf16.mxu0 %v4632_v13 }
 0x99c   :  { %4635 = vmatpush3.bf16.msra.mxu0 %v4632_v13  ;;  %v1739_v13 = vpop.permute.xlu1 %1738 }
 0x99e   :  { %v4142_v26 = vpop.f32.mrb[30].mxu1 }
 0x99f   :  { %v1684_v54 = vpop.f32.mrb[31].mxu1 }
 0x9a0   :  { %v4636_v29 = vpack.c.bf16 %v4142_v26, %v1684_v54  ;;  %v1734_v26 = vpop.permute.xlu0 %1733 }
 0x9a2   :  { %4637 = vmatprep.subr.bf16.mxu0 %v4636_v29 }
 0x9a3   :  { %4639 = vmatpush3.bf16.msra.mxu0 %v4636_v29 }
 0x9a4   :  { %4641 = vmatprep.subr.bf16.mxu0 %v5847_v38 }
 0x9a7   :  { %4643 = vmatpush3.bf16.msra.mxu0 %v5847_v38 }
 0x9a8   :  { %4645 = vmatprep.subr.bf16.mxu0 %v5852_v40 }
 0x9ab   :  { %4647 = vmatpush3.bf16.msra.mxu0 %v5852_v40 }
 0x9ac   :  { %4649 = vmatprep.subr.bf16.mxu0 %v4648_v10 }
 0x9ae   :  { %4160 = vmatmul.mubr.msk.f32.vlgmr.msra.gmra.mrb[24].mxu0 %vm354_vm2, %v3388_v34 }
 0x9af   :  { %4162 = vmatprep.mubr.msk.f32.mxu0 %vm354_vm2, %v3389_v35  ;;  %4651 = vmatpush3.bf16.msra.mxu0 %v4648_v10 }
 0x9b0   :  { %4653 = vmatprep.subr.bf16.mxu0 %v4652_v41 }
 0x9b2   :  { %4163 = vmatmul.mubr.msk.f32.gmra.mrb[26].mxu0 %vm354_vm2, %v3390_v15 }
 0x9b3   :  { %4165 = vmatprep.mubr.msk.f32.mxu0 %vm354_vm2, %v3391_v46  ;;  %4655 = vmatpush3.bf16.msra.mxu0 %v4652_v41  ;;  %v1749_v46 = vpop.permute.xlu1 %1748 }
 0x9b4   :  { %4657 = vmatprep.subr.bf16.mxu0 %v4656_v42 }
 0x9b6   :  { %4166 = vmatmul.mubr.msk.f32.gmra.mrb[28].mxu0 %vm354_vm2, %v3392_v52 }
 0x9b7   :  { %4168 = vmatprep.mubr.msk.f32.mxu0 %vm354_vm2, %v3393_v19  ;;  %4659 = vmatpush3.bf16.msra.mxu0 %v4656_v42 }
 0x9b8   :  { %4661 = vmatprep.subr.bf16.mxu0 %v4660_v57 }
 0x9ba   :  { %4169 = vmatmul.mubr.msk.f32.gmra.mrb[30].mxu0 %vm354_vm2, %v3394_v2  ;;  %v1744_v2 = vpop.permute.xlu0 %1743 }
 0x9bb   :  { %4663 = vmatpush3.bf16.msra.mxu0 %v4660_v57  ;;  %v1719_v57 = vpop.permute.xlu1 %1718 }
 0x9bc   :  { %4665 = vmatprep.subr.bf16.mxu0 %v4664_v51 }
 0x9be   :  { %v1714_v49 = vpop.permute.xlu0 %1713 }
 0x9bf   :  { %4667 = vmatpush3.bf16.msra.mxu0 %v4664_v51  ;;  %v1729_v33 = vpop.permute.xlu1 %1728 }
 0x9c0   :  { %4669 = vmatprep.subr.bf16.mxu0 %v4668_v61 }
 0x9c3   :  { %4671 = vmatpush3.bf16.msra.mxu0 %v4668_v61 }
 0x9c4   :  { %4673 = vmatprep.subr.bf16.mxu0 %v4672_v63 }
 0x9c7   :  { %4675 = vmatpush3.bf16.msra.mxu0 %v4672_v63  ;;  %v1724_v63 = vpop.permute.xlu0 %1723 }
 0x9c8   :  { %4677 = vmatprep.subr.bf16.mxu0 %v4676_v8 }
 0x9cb   :  { %4679 = vmatpush3.bf16.msra.mxu0 %v4676_v8 }
 0xa81   :  { %v4161_v5 = vpop.f32.mrb[24].mxu0 }
 0xa82   :  { %v1841_v14 = vpop.f32.mrb[25].mxu0  ;;  %v1847_v58 = vadd.f32 %v4161_v5, %v1719_v57  ;;  %v3416_v5 = vld [vmem:[%s6224_s6 + $0x140] sm:$0xff] }
 0xa83   :  { %v1842_v47 = vadd.f32 %v1841_v14, %v1714_v49  ;;  %4225 = vmatprep.mubr.msk.f32.mxu1 %vm354_vm2, %v3416_v5  ;;  %v3421_v49 = vld [vmem:[%s6224_s6 + $0x168] sm:$0xff]  ;;  %v5967_v5 = vpop.permute.xlu0 %2371 }
 0xa85   :  { %v4164_v12 = vpop.f32.mrb[26].mxu0 }
 0xa86   :  { %v1851_v6 = vpop.f32.mrb[27].mxu0  ;;  %v1857_v0 = vadd.f32 %v4164_v12, %v1729_v33 }
 0xa87   :  { %v1852_v8 = vadd.f32 %v1851_v6, %v1724_v63  ;;  %v3444_v6 = vld [vmem:[%s6223_s5 + $0x30] sm:$0xff] }
 0xa89   :  { %v4167_v54 = vpop.f32.mrb[28].mxu0 }
 0xa8a   :  { %v1867_v29 = vadd.f32 %v4167_v54, %v1739_v13  ;;  %v1861_v34 = vpop.f32.mrb[29].mxu0 }
 0xa8b   :  { %v1862_v35 = vadd.f32 %v1861_v34, %v1734_v26 }
 0xa8c   :  { %v3412_v15 = vmul.f32 -1.442695, %v1867_v29 }
 0xa8d   :  { %v3411_v52 = vmul.f32 -1.442695, %v1862_v35  ;;  %v4170_v19 = vpop.f32.mrb[30].mxu0 }
 0xa8e   :  { %4890 = vpow2.f32 %v3412_v15  ;;  %v1877_v3 = vadd.f32 %v4170_v19, %v1749_v46  ;;  %v1871_v22 = vpop.f32.mrb[31].mxu0  ;;  %v2229_v19 = vmul.f32 %v5578_v30, %v3444_v6 }
 0xa8f   :  { %4892 = vpow2.f32 %v3411_v52  ;;  %v1872_v24 = vadd.f32 %v1871_v22, %v1744_v2 }
 0xa90   :  { %v3414_v9 = vmul.f32 -1.442695, %v1877_v3  ;;  %v2230_v2 = vmul.f32 %v5586_v50, %v2229_v19  ;;  %v2231_v3 = vmul.f32 %v5593_v36, %v2229_v19  ;;  %v2237_v57 = vmul.f32 %v5635_v23, %v2229_v19 }
 0xa91   :  { %v3413_v10 = vmul.f32 -1.442695, %v1872_v24  ;;  %v2232_v24 = vmul.f32 %v5600_v45, %v2229_v19  ;;  %v2241_v63 = vmul.f32 %v5680_v60, %v2229_v19 }
 0xa92   :  { %4894 = vpow2.f32 %v3414_v9  ;;  %v4696_v22 = vpack.c.bf16 %v2231_v3, %v2230_v2  ;;  %v2233_v9 = vmul.f32 %v5607_v18, %v2229_v19 }
 0xa93   :  { %4896 = vpow2.f32 %v3413_v10  ;;  %v3417_v10 = vld [vmem:[%s6224_s6 + $0x148] sm:$0xff] }
 0xa98   :  { %v4891_v32 = vpop.eup %4890 }
 0xa99   :  { %v4893_v16 = vpop.eup %4892  ;;  %v1893_v41 = vadd.f32 1.0, %v4891_v32  ;;  %v3418_v32 = vld [vmem:[%s6224_s6 + $0x150] sm:$0xff] }
 0xa9a   :  { %v1892_v17 = vadd.f32 1.0, %v4893_v16  ;;  %v4700_v16 = vpack.c.bf16 %v2233_v9, %v2232_v24 }
 0xa9b   :  { %4898 = vrcp.f32 %v1893_v41  ;;  %v2234_v41 = vmul.f32 %v5614_v59, %v2229_v19 }
 0xa9c   :  { %v4895_v39 = vpop.eup %4894  ;;  %4900 = vrcp.f32 %v1892_v17  ;;  %v2235_v17 = vmul.f32 %v5621_v20, %v2229_v19 }
 0xa9d   :  { %v4897_v42 = vpop.eup %4896  ;;  %v1895_v55 = vadd.f32 1.0, %v4895_v39  ;;  %v3419_v39 = vld [vmem:[%s6224_s6 + $0x158] sm:$0xff] }
 0xa9e   :  { %v1894_v56 = vadd.f32 1.0, %v4897_v42  ;;  %v3420_v42 = vld [vmem:[%s6224_s6 + $0x160] sm:$0xff] }
 0xa9f   :  { %4902 = vrcp.f32 %v1895_v55  ;;  %v4704_v55 = vpack.c.bf16 %v2235_v17, %v2234_v41 }
 0xaa0   :  { %4904 = vrcp.f32 %v1894_v56  ;;  %v2236_v56 = vmul.f32 %v5628_v21, %v2229_v19 }
 0xaa5   :  { %v4899_v51 = vpop.eup %4898 }
 0xaa6   :  { %v4901_v48 = vpop.eup %4900  ;;  %v1905_v61 = vmul.f32 %v4899_v51, %v1847_v58  ;;  %v3422_v58 = vld [vmem:[%s6224_s6 + $0x170] sm:$0xff]  ;;  %v4708_v51 = vpack.c.bf16 %v2237_v57, %v2236_v56 }
 0xaa7   :  { %v1904_v62 = vmul.f32 %v4901_v48, %v1842_v47  ;;  %v2238_v47 = vmul.f32 %v5642_v25, %v2229_v19  ;;  %v2239_v48 = vmul.f32 %v5649_v28, %v2229_v19 }
 0xaa9   :  { %v4903_v7 = vpop.eup %4902  ;;  %4203 = vmatprep.mubr.f32.mxu0 %v1904_v62  ;;  %v4688_v13 = vpack.c.bf16 %v1905_v61, %v1904_v62  ;;  %v4712_v33 = vpack.c.bf16 %v2239_v48, %v2238_v47  ;;  %v2240_v62 = vmul.f32 %v5673_v53, %v2229_v19 }
 0xaaa   :  { %v4905_v26 = vpop.eup %4904  ;;  %4204 = vmatmul.mubr.f32.vlgmr.msra.gmra.mrb[32].mxu0 %v1905_v61  ;;  %v1907_v54 = vmul.f32 %v4903_v7, %v1857_v0  ;;  %v3423_v61 = vld [vmem:[%s6224_s6 + $0x178] sm:$0xff]  ;;  %v2242_v7 = vmul.f32 %v5693_v44, %v2229_v19 }
 0xaab   :  { %v1906_v29 = vmul.f32 %v4905_v26, %v1852_v8  ;;  %v4716_v0 = vpack.c.bf16 %v2241_v63, %v2240_v62  ;;  %v2243_v8 = vmul.f32 %v5700_v27, %v2229_v19  ;;  %v2244_v26 = vmul.f32 %v5714_v37, %v2229_v19 }
 0xaad   :  { %4206 = vmatprep.mubr.f32.mxu0 %v1906_v29  ;;  %v4692_v34 = vpack.c.bf16 %v1907_v54, %v1906_v29 }
 0xaae   :  { %4207 = vmatmul.mubr.f32.gmra.mrb[34].mxu0 %v1907_v54  ;;  %v2245_v54 = vmul.f32 %v5721_v43, %v2229_v19 }
 0xab0   :  { %v4724_v29 = vpack.c.bf16 %v2245_v54, %v2244_v26 }
 0xb7d   :  { %v4205_v14 = vpop.f32.mrb[32].mxu0 }
 0xb7e   :  { %v1993_v35 = vpop.f32.mrb[33].mxu0 }
 0xb7f   :  { %v4680_v12 = vpack.c.bf16 %v4205_v14, %v1993_v35  ;;  %v5971_v35 = vpop.permute.xlu0 %2381 }
 0xb81   :  { %v4208_v15 = vpop.f32.mrb[34].mxu0  ;;  %4681 = vmatprep.subr.bf16.mxu1 %v4680_v12 }
 0xb82   :  { %v2003_v46 = vpop.f32.mrb[35].mxu0  ;;  %4683 = vmatpush3.bf16.msra.mxu1 %v4680_v12 }
 0xb83   :  { %v4684_v52 = vpack.c.bf16 %v4208_v15, %v2003_v46 }
 0xb85   :  { %4685 = vmatprep.subr.bf16.mxu1 %v4684_v52 }
 0xb86   :  { %4687 = vmatpush3.bf16.msra.mxu1 %v4684_v52 }
 0xb87   :  { %4689 = vmatprep.subr.bf16.mxu1 %v4688_v13 }
 0xb8a   :  { %4691 = vmatpush3.bf16.msra.mxu1 %v4688_v13  ;;  %v4720_v13 = vpack.c.bf16 %v2243_v8, %v2242_v7 }
 0xb8b   :  { %4693 = vmatprep.subr.bf16.mxu1 %v4692_v34 }
 0xb8e   :  { %4695 = vmatpush3.bf16.msra.mxu1 %v4692_v34  ;;  %v5965_v34 = vpop.permute.xlu1 %2376 }
 0xb8f   :  { %4697 = vmatprep.subr.bf16.mxu1 %v4696_v22 }
 0xb91   :  { %4226 = vmatmul.mubr.msk.f32.vlgmr.msra.gmra.mrb[32].mxu1 %vm354_vm2, %v3417_v10 }
 0xb92   :  { %4699 = vmatpush3.bf16.msra.mxu1 %v4696_v22  ;;  %4228 = vmatprep.mubr.msk.f32.mxu1 %vm354_vm2, %v3418_v32  ;;  %v5969_v14 = vpop.permute.xlu1 %2386 }
 0xb93   :  { %4701 = vmatprep.subr.bf16.mxu1 %v4700_v16 }
 0xb95   :  { %4229 = vmatmul.mubr.msk.f32.gmra.mrb[34].mxu1 %vm354_vm2, %v3419_v39 }
 0xb96   :  { %4703 = vmatpush3.bf16.msra.mxu1 %v4700_v16  ;;  %4231 = vmatprep.mubr.msk.f32.mxu1 %vm354_vm2, %v3420_v42  ;;  %v5973_v12 = vpop.permute.xlu1 %2356 }
 0xb97   :  { %4705 = vmatprep.subr.bf16.mxu1 %v4704_v55 }
 0xb99   :  { %4232 = vmatmul.mubr.msk.f32.gmra.mrb[36].mxu1 %vm354_vm2, %v3421_v49 }
 0xb9a   :  { %4707 = vmatpush3.bf16.msra.mxu1 %v4704_v55  ;;  %4234 = vmatprep.mubr.msk.f32.mxu1 %vm354_vm2, %v3422_v58 }
 0xb9b   :  { %4709 = vmatprep.subr.bf16.mxu1 %v4708_v51 }
 0xb9d   :  { %4235 = vmatmul.mubr.msk.f32.gmra.mrb[38].mxu1 %vm354_vm2, %v3423_v61 }
 0xb9e   :  { %4711 = vmatpush3.bf16.msra.mxu1 %v4708_v51  ;;  %4269 = vmatprep.mubr.f32.mxu1 %v5828_v1  ;;  %v3445_v1 = vld [vmem:[%s6224_s6 + $0x180] sm:$0xff] }
 0xb9f   :  { %4713 = vmatprep.subr.bf16.mxu1 %v4712_v33  ;;  %4291 = vmatprep.mubr.msk.f32.mxu0 %vm354_vm2, %v3445_v1 }
 0xba2   :  { %4715 = vmatpush3.bf16.msra.mxu1 %v4712_v33 }
 0xba3   :  { %4717 = vmatprep.subr.bf16.mxu1 %v4716_v0 }
 0xba6   :  { %4719 = vmatpush3.bf16.msra.mxu1 %v4716_v0 }
 0xba7   :  { %4721 = vmatprep.subr.bf16.mxu1 %v4720_v13 }
 0xbaa   :  { %4723 = vmatpush3.bf16.msra.mxu1 %v4720_v13 }
 0xbab   :  { %4725 = vmatprep.subr.bf16.mxu1 %v4724_v29 }
 0xbae   :  { %4727 = vmatpush3.bf16.msra.mxu1 %v4724_v29 }
 0xbb1   :  { %4270 = vmatmul.mubr.f32.vlgmr.msra.gmra.mrb[40].mxu1 %v5830_v31  ;;  %v5975_v31 = vpop.permute.xlu0 %2351 }
 0xbb2   :  { %4272 = vmatprep.mubr.f32.mxu1 %v5832_v4  ;;  %v5977_v4 = vpop.permute.xlu1 %2366 }
 0xbb5   :  { %4273 = vmatmul.mubr.f32.gmra.mrb[42].mxu1 %v5838_v11  ;;  %v5979_v11 = vpop.permute.xlu0 %2361 }
 0xbb6   :  { %v2058_v6 = vpop.permute.xlu1 %2057 }
 0xbb9   :  { %v2053_v46 = vpop.permute.xlu0 %2052 }
 0xbba   :  { %v5981_v3 = vpop.permute.xlu1 %2695 }
 0xbbd   :  { %v5983_v22 = vpop.permute.xlu0 %2690 }
 0xbbe   :  { %v2068_v41 = vpop.permute.xlu1 %2067 }
 0xbc1   :  { %v2063_v42 = vpop.permute.xlu0 %2062 }
 0xbc2   :  { %v5985_v51 = vpop.permute.xlu1 %2705 }
 0xbc5   :  { %v5987_v47 = vpop.permute.xlu0 %2700 }
 0xbc6   :  { %v2038_v63 = vpop.permute.xlu1 %2037 }
 0xbc9   :  { %v2033_v7 = vpop.permute.xlu0 %2032 }
 0xbca   :  { %v5989_v54 = vpop.permute.xlu1 %2675 }
 0xbcd   :  { %v5991_v1 = vpop.permute.xlu0 %2670 }
 0xc64   :  { %v4227_v15 = vpop.f32.mrb[32].mxu1 }
 0xc65   :  { %v2160_v52 = vpop.f32.mrb[33].mxu1 }
 0xc68   :  { %v4230_v19 = vpop.f32.mrb[34].mxu1 }
 0xc69   :  { %v2170_v2 = vpop.f32.mrb[35].mxu1 }
 0xc6c   :  { %v4233_v24 = vpop.f32.mrb[36].mxu1 }
 0xc6d   :  { %v2186_v9 = vadd.f32 %v4233_v24, %v2058_v6  ;;  %v2180_v10 = vpop.f32.mrb[37].mxu1  ;;  %v2166_v24 = vadd.f32 %v4227_v15, %v2038_v63  ;;  %v3473_v63 = vld [vmem:[%s6223_s5 + $0x38] sm:$0xff] }
 0xc6e   :  { %v2181_v32 = vadd.f32 %v2180_v10, %v2053_v46  ;;  %v2161_v10 = vadd.f32 %v2160_v52, %v2033_v7 }
 0xc6f   :  { %v3441_v16 = vmul.f32 -1.442695, %v2186_v9 }
 0xc70   :  { %v3440_v17 = vmul.f32 -1.442695, %v2181_v32  ;;  %v4236_v39 = vpop.f32.mrb[38].mxu1 }
 0xc71   :  { %4906 = vpow2.f32 %v3441_v16  ;;  %v2196_v55 = vadd.f32 %v4236_v39, %v2068_v41  ;;  %v2190_v56 = vpop.f32.mrb[39].mxu1  ;;  %v2048_v39 = vpop.permute.xlu1 %2047 }
 0xc72   :  { %4908 = vpow2.f32 %v3440_v17  ;;  %v2191_v57 = vadd.f32 %v2190_v56, %v2063_v42  ;;  %v2043_v56 = vpop.permute.xlu0 %2042 }
 0xc73   :  { %v3443_v49 = vmul.f32 -1.442695, %v2196_v55 }
 0xc74   :  { %v3442_v58 = vmul.f32 -1.442695, %v2191_v57  ;;  %v2176_v57 = vadd.f32 %v4230_v19, %v2048_v39  ;;  %v3446_v19 = vld [vmem:[%s6224_s6 + $0x188] sm:$0xff] }
 0xc75   :  { %4910 = vpow2.f32 %v3443_v49 }
 0xc76   :  { %4912 = vpow2.f32 %v3442_v58  ;;  %v2171_v58 = vadd.f32 %v2170_v2, %v2043_v56  ;;  %v3447_v2 = vld [vmem:[%s6224_s6 + $0x190] sm:$0xff] }
 0xc7b   :  { %v4907_v48 = vpop.eup %4906 }
 0xc7c   :  { %v4909_v61 = vpop.eup %4908  ;;  %v2212_v33 = vadd.f32 1.0, %v4907_v48 }
 0xc7d   :  { %v2211_v62 = vadd.f32 1.0, %v4909_v61  ;;  %v3450_v61 = vld [vmem:[%s6224_s6 + $0x1a8] sm:$0xff] }
 0xc7e   :  { %4914 = vrcp.f32 %v2212_v33  ;;  %v3451_v33 = vld [vmem:[%s6224_s6 + $0x1b0] sm:$0xff] }
 0xc7f   :  { %v4911_v0 = vpop.eup %4910  ;;  %4916 = vrcp.f32 %v2211_v62  ;;  %v3452_v62 = vld [vmem:[%s6224_s6 + $0x1b8] sm:$0xff] }
 0xc80   :  { %v4913_v8 = vpop.eup %4912  ;;  %v2214_v13 = vadd.f32 1.0, %v4911_v0  ;;  %v2548_v0 = vmul.f32 %v5578_v30, %v3473_v63 }
 0xc81   :  { %v2213_v26 = vadd.f32 1.0, %v4913_v8 }
 0xc82   :  { %4918 = vrcp.f32 %v2214_v13  ;;  %v2549_v7 = vmul.f32 %v5586_v50, %v2548_v0  ;;  %v2550_v8 = vmul.f32 %v5593_v36, %v2548_v0  ;;  %v2555_v30 = vmul.f32 %v5628_v21, %v2548_v0 }
 0xc83   :  { %4920 = vrcp.f32 %v2213_v26  ;;  %v2551_v26 = vmul.f32 %v5600_v45, %v2548_v0  ;;  %v2556_v50 = vmul.f32 %v5635_v23, %v2548_v0  ;;  %v2557_v45 = vmul.f32 %v5642_v25, %v2548_v0 }
 0xc84   :  { %v4271_v29 = vpop.f32.mrb[40].mxu1  ;;  %v4744_v13 = vpack.c.bf16 %v2550_v8, %v2549_v7  ;;  %v2561_v21 = vmul.f32 %v5693_v44, %v2548_v0  ;;  %v2562_v23 = vmul.f32 %v5700_v27, %v2548_v0  ;;  %v2563_v25 = vmul.f32 %v5714_v37, %v2548_v0 }
 0xc85   :  { %v2312_v6 = vpop.f32.mrb[41].mxu1  ;;  %v4756_v36 = vpack.c.bf16 %v2556_v50, %v2555_v30 }
 0xc86   :  { %v4728_v46 = vpack.c.bf16 %v4271_v29, %v2312_v6  ;;  %v2552_v29 = vmul.f32 %v5607_v18, %v2548_v0  ;;  %v2558_v18 = vmul.f32 %v5649_v28, %v2548_v0  ;;  %v2564_v28 = vmul.f32 %v5721_v43, %v2548_v0 }
 0xc88   :  { %v4915_v9 = vpop.eup %4914  ;;  %v4274_v32 = vpop.f32.mrb[42].mxu1  ;;  %4729 = vmatprep.subr.bf16.mxu0 %v4728_v46  ;;  %v4748_v6 = vpack.c.bf16 %v2552_v29, %v2551_v26 }
 0xc89   :  { %v4917_v16 = vpop.eup %4916  ;;  %v2322_v41 = vpop.f32.mrb[43].mxu1  ;;  %4731 = vmatpush3.bf16.msra.mxu0 %v4728_v46  ;;  %v5993_v17 = vmul.f32 %v4915_v9, %v2166_v24  ;;  %v2553_v46 = vmul.f32 %v5614_v59, %v2548_v0  ;;  %v2554_v24 = vmul.f32 %v5621_v20, %v2548_v0  ;;  %v2559_v59 = vmul.f32 %v5673_v53, %v2548_v0 }
 0xc8a   :  { %v4732_v42 = vpack.c.bf16 %v4274_v32, %v2322_v41  ;;  %v5995_v55 = vmul.f32 %v4917_v16, %v2161_v10  ;;  %v4760_v10 = vpack.c.bf16 %v2558_v18, %v2557_v45  ;;  %v2560_v20 = vmul.f32 %v5680_v60, %v2548_v0 }
 0xc8b   :  { %v4752_v9 = vpack.c.bf16 %v2554_v24, %v2553_v46  ;;  %v4768_v16 = vpack.c.bf16 %v2562_v23, %v2561_v21  ;;  %v4772_v41 = vpack.c.bf16 %v2564_v28, %v2563_v25  ;;  %v3478_v21 = vld [vmem:[%s6224_s6 + $0x1e0] sm:$0xff]  ;;  %v3479_v23 = vld [vmem:[%s6224_s6 + $0x1e8] sm:$0xff]  ;;  %v3481_v25 = vld [vmem:[%s6224_s6 + $0x1f8] sm:$0xff] }
 0xc8c   :  { %v4919_v49 = vpop.eup %4918  ;;  %4733 = vmatprep.subr.bf16.mxu0 %v4732_v42  ;;  %v4764_v32 = vpack.c.bf16 %v2560_v20, %v2559_v59  ;;  %v3475_v59 = vld [vmem:[%s6224_s6 + $0x1c8] sm:$0xff]  ;;  %v3476_v20 = vld [vmem:[%s6224_s6 + $0x1d0] sm:$0xff] }
 0xc8d   :  { %v4921_v48 = vpop.eup %4920  ;;  %4735 = vmatpush3.bf16.msra.mxu0 %v4732_v42  ;;  %v5997_v15 = vmul.f32 %v4919_v49, %v2176_v57 }
 0xc8e   :  { %4737 = vmatprep.subr.bf16.mxu0 %v5847_v38  ;;  %v6000_v52 = vmul.f32 %v4921_v48, %v2171_v58 }
 0xc91   :  { %4739 = vmatpush3.bf16.msra.mxu0 %v5847_v38  ;;  %v3448_v38 = vld [vmem:[%s6224_s6 + $0x198] sm:$0xff] }
 0xc92   :  { %4741 = vmatprep.subr.bf16.mxu0 %v5852_v40 }
 0xc95   :  { %4743 = vmatpush3.bf16.msra.mxu0 %v5852_v40  ;;  %v3449_v40 = vld [vmem:[%s6224_s6 + $0x1a0] sm:$0xff] }
 0xc96   :  { %4745 = vmatprep.subr.bf16.mxu0 %v4744_v13 }
 0xc98   :  { %4292 = vmatmul.mubr.msk.f32.vlgmr.msra.gmra.mrb[36].mxu0 %vm354_vm2, %v3446_v19 }
 0xc99   :  { %4294 = vmatprep.mubr.msk.f32.mxu0 %vm354_vm2, %v3447_v2  ;;  %4747 = vmatpush3.bf16.msra.mxu0 %v4744_v13 }
 0xc9a   :  { %4749 = vmatprep.subr.bf16.mxu0 %v4748_v6 }
 0xc9c   :  { %4295 = vmatmul.mubr.msk.f32.gmra.mrb[38].mxu0 %vm354_vm2, %v3448_v38 }
 0xc9d   :  { %4297 = vmatprep.mubr.msk.f32.mxu0 %vm354_vm2, %v3449_v40  ;;  %4751 = vmatpush3.bf16.msra.mxu0 %v4748_v6 }
 0xc9e   :  { %4753 = vmatprep.subr.bf16.mxu0 %v4752_v9 }
 0xca0   :  { %4298 = vmatmul.mubr.msk.f32.gmra.mrb[40].mxu0 %vm354_vm2, %v3450_v61 }
 0xca1   :  { %4300 = vmatprep.mubr.msk.f32.mxu0 %vm354_vm2, %v3451_v33  ;;  %4755 = vmatpush3.bf16.msra.mxu0 %v4752_v9 }
 0xca2   :  { %4757 = vmatprep.subr.bf16.mxu0 %v4756_v36 }
 0xca4   :  { %4301 = vmatmul.mubr.msk.f32.gmra.mrb[42].mxu0 %vm354_vm2, %v3452_v62 }
 0xca5   :  { %4759 = vmatpush3.bf16.msra.mxu0 %v4756_v36 }
 0xca6   :  { %4761 = vmatprep.subr.bf16.mxu0 %v4760_v10 }
 0xca9   :  { %4763 = vmatpush3.bf16.msra.mxu0 %v4760_v10 }
 0xcaa   :  { %4765 = vmatprep.subr.bf16.mxu0 %v4764_v32 }
 0xcad   :  { %4767 = vmatpush3.bf16.msra.mxu0 %v4764_v32  ;;  %v3477_v32 = vld [vmem:[%s6224_s6 + $0x1d8] sm:$0xff] }
 0xcae   :  { %4769 = vmatprep.subr.bf16.mxu0 %v4768_v16 }
 0xcb1   :  { %4771 = vmatpush3.bf16.msra.mxu0 %v4768_v16  ;;  %v3480_v16 = vld [vmem:[%s6224_s6 + $0x1f0] sm:$0xff] }
 0xcb2   :  { %4773 = vmatprep.subr.bf16.mxu0 %v4772_v41 }
 0xcb5   :  { %4775 = vmatpush3.bf16.msra.mxu0 %v4772_v41 }
 0xd6b   :  { %v4293_v53 = vpop.f32.mrb[36].mxu0 }
 0xd6c   :  { %v2479_v60 = vpop.f32.mrb[37].mxu0 }
 0xd6f   :  { %v4296_v39 = vpop.f32.mrb[38].mxu0 }
 0xd70   :  { %v2489_v42 = vpop.f32.mrb[39].mxu0  ;;  %v2495_v29 = vadd.f32 %v4296_v39, %v5977_v4 }
 0xd71   :  { %v2490_v46 = vadd.f32 %v2489_v42, %v5979_v11 }
 0xd73   :  { %v4299_v56 = vpop.f32.mrb[40].mxu0 }
 0xd74   :  { %v2505_v44 = vadd.f32 %v4299_v56, %v5965_v34  ;;  %v2499_v57 = vpop.f32.mrb[41].mxu0 }
 0xd75   :  { %v2500_v27 = vadd.f32 %v2499_v57, %v5967_v5 }
 0xd76   :  { %v3470_v49 = vmul.f32 -1.442695, %v2505_v44 }
 0xd77   :  { %v3469_v58 = vmul.f32 -1.442695, %v2500_v27  ;;  %v4302_v37 = vpop.f32.mrb[42].mxu0 }
 0xd78   :  { %4922 = vpow2.f32 %v3470_v49  ;;  %v2515_v43 = vadd.f32 %v4302_v37, %v5969_v14  ;;  %v2509_v48 = vpop.f32.mrb[43].mxu0  ;;  %v2485_v14 = vadd.f32 %v4293_v53, %v5973_v12  ;;  %v3474_v12 = vld [vmem:[%s6224_s6 + $0x1c0] sm:$0xff] }
 0xd79   :  { %4924 = vpow2.f32 %v3469_v58  ;;  %v2510_v19 = vadd.f32 %v2509_v48, %v5971_v35  ;;  %v2480_v35 = vadd.f32 %v2479_v60, %v5975_v31  ;;  %4357 = vmatprep.mubr.msk.f32.mxu1 %vm354_vm2, %v3474_v12 }
 0xd7a   :  { %v3472_v2 = vmul.f32 -1.442695, %v2515_v43 }
 0xd7b   :  { %v3471_v38 = vmul.f32 -1.442695, %v2510_v19 }
 0xd7c   :  { %4926 = vpow2.f32 %v3472_v2 }
 0xd7d   :  { %4928 = vpow2.f32 %v3471_v38 }
 0xd82   :  { %v4923_v40 = vpop.eup %4922 }
 0xd83   :  { %v4925_v61 = vpop.eup %4924  ;;  %v2531_v34 = vadd.f32 1.0, %v4923_v40 }
 0xd84   :  { %v2530_v33 = vadd.f32 1.0, %v4925_v61 }
 0xd85   :  { %4930 = vrcp.f32 %v2531_v34 }
 0xd86   :  { %v4927_v5 = vpop.eup %4926  ;;  %4932 = vrcp.f32 %v2530_v33 }
 0xd87   :  { %v4929_v62 = vpop.eup %4928  ;;  %v2533_v63 = vadd.f32 1.0, %v4927_v5 }
 0xd88   :  { %v2532_v0 = vadd.f32 1.0, %v4929_v62 }
 0xd89   :  { %4934 = vrcp.f32 %v2533_v63 }
 0xd8a   :  { %4936 = vrcp.f32 %v2532_v0  ;;  %v2686_v0 = vpop.permute.xlu1 %2685 }
 0xd8f   :  { %v4931_v7 = vpop.eup %4930 }
 0xd90   :  { %v4933_v8 = vpop.eup %4932  ;;  %v2543_v13 = vmul.f32 %v4931_v7, %v2485_v14  ;;  %v2681_v7 = vpop.permute.xlu0 %2680 }
 0xd91   :  { %v2542_v26 = vmul.f32 %v4933_v8, %v2480_v35 }
 0xd93   :  { %v4935_v6 = vpop.eup %4934  ;;  %4335 = vmatprep.mubr.f32.mxu0 %v2542_v26  ;;  %v4784_v24 = vpack.c.bf16 %v2543_v13, %v2542_v26 }
 0xd94   :  { %v4937_v9 = vpop.eup %4936  ;;  %4336 = vmatmul.mubr.f32.vlgmr.msra.gmra.mrb[44].mxu0 %v2543_v13  ;;  %v2545_v30 = vmul.f32 %v4935_v6, %v2495_v29 }
 0xd95   :  { %v2544_v50 = vmul.f32 %v4937_v9, %v2490_v46 }
 0xd97   :  { %4338 = vmatprep.mubr.f32.mxu0 %v2544_v50  ;;  %v4788_v36 = vpack.c.bf16 %v2545_v30, %v2544_v50 }
 0xd98   :  { %4339 = vmatmul.mubr.f32.gmra.mrb[46].mxu0 %v2545_v30 }
 0xe67   :  { %v4337_v31 = vpop.f32.mrb[44].mxu0 }
 0xe68   :  { %v2631_v4 = vpop.f32.mrb[45].mxu0 }
 0xe69   :  { %v4776_v45 = vpack.c.bf16 %v4337_v31, %v2631_v4 }
 0xe6b   :  { %v4340_v18 = vpop.f32.mrb[46].mxu0  ;;  %4777 = vmatprep.subr.bf16.mxu1 %v4776_v45 }
 0xe6c   :  { %v2641_v11 = vpop.f32.mrb[47].mxu0  ;;  %4779 = vmatpush3.bf16.msra.mxu1 %v4776_v45 }
 0xe6d   :  { %v4780_v10 = vpack.c.bf16 %v4340_v18, %v2641_v11 }
 0xe6f   :  { %4781 = vmatprep.subr.bf16.mxu1 %v4780_v10 }
 0xe70   :  { %4783 = vmatpush3.bf16.msra.mxu1 %v4780_v10 }
 0xe71   :  { %4785 = vmatprep.subr.bf16.mxu1 %v4784_v24 }
 0xe74   :  { %4787 = vmatpush3.bf16.msra.mxu1 %v4784_v24 }
 0xe75   :  { %4789 = vmatprep.subr.bf16.mxu1 %v4788_v36 }
 0xe78   :  { %4791 = vmatpush3.bf16.msra.mxu1 %v4788_v36 }
 0xe7b   :  { %4358 = vmatmul.mubr.msk.f32.vlgmr.msra.gmra.mrb[44].mxu1 %vm354_vm2, %v3475_v59 }
 0xe7c   :  { %4360 = vmatprep.mubr.msk.f32.mxu1 %vm354_vm2, %v3476_v20 }
 0xe7f   :  { %4361 = vmatmul.mubr.msk.f32.gmra.mrb[46].mxu1 %vm354_vm2, %v3477_v32 }
 0xe80   :  { %4363 = vmatprep.mubr.msk.f32.mxu1 %vm354_vm2, %v3478_v21 }
 0xe83   :  { %4364 = vmatmul.mubr.msk.f32.gmra.mrb[48].mxu1 %vm354_vm2, %v3479_v23 }
 0xe84   :  { %4366 = vmatprep.mubr.msk.f32.mxu1 %vm354_vm2, %v3480_v16 }
 0xe87   :  { %4367 = vmatmul.mubr.msk.f32.gmra.mrb[50].mxu1 %vm354_vm2, %v3481_v25 }
 0xf4e   :  { %v4359_v28 = vpop.f32.mrb[44].mxu1 }
 0xf4f   :  { %v2798_v41 = vpop.f32.mrb[45].mxu1 }
 0xf52   :  { %v4362_v53 = vpop.f32.mrb[46].mxu1 }
 0xf53   :  { %v2808_v60 = vpop.f32.mrb[47].mxu1  ;;  %v2814_v35 = vadd.f32 %v4362_v53, %v2686_v0  ;;  %v3505_v0 = vld [vmem:[%s6225_s8 + $0x38] sm:$0xff] }
 0xf54   :  { %v2809_v26 = vadd.f32 %v2808_v60, %v2681_v7  ;;  %v2995_v7 = vld [vmem:[%s6227_s11] sm:$0xff] }
 0xf56   :  { %v4365_v39 = vpop.f32.mrb[48].mxu1 }
 0xf57   :  { %v2824_v42 = vadd.f32 %v4365_v39, %v5981_v3  ;;  %v2818_v56 = vpop.f32.mrb[49].mxu1 }
 0xf58   :  { %v2819_v44 = vadd.f32 %v2818_v56, %v5983_v22 }
 0xf59   :  { %v3499_v57 = vmul.f32 -1.442695, %v2824_v42 }
 0xf5a   :  { %v3498_v27 = vmul.f32 -1.442695, %v2819_v44  ;;  %v4368_v49 = vpop.f32.mrb[50].mxu1 }
 0xf5b   :  { %4938 = vpow2.f32 %v3499_v57  ;;  %v2834_v58 = vadd.f32 %v4368_v49, %v5985_v51  ;;  %v2828_v37 = vpop.f32.mrb[51].mxu1  ;;  %v2804_v51 = vadd.f32 %v4359_v28, %v5989_v54 }
 0xf5c   :  { %4940 = vpow2.f32 %v3498_v27  ;;  %v2829_v43 = vadd.f32 %v2828_v37, %v5987_v47  ;;  %v2799_v47 = vadd.f32 %v2798_v41, %v5991_v1 }
 0xf5d   :  { %v3501_v48 = vmul.f32 -1.442695, %v2834_v58 }
 0xf5e   :  { %v3500_v19 = vmul.f32 -1.442695, %v2829_v43  ;;  %v3503_v43 = vld [vmem:[%s6225_s8 + $0x28] sm:$0xff] }
 0xf5f   :  { %4942 = vpow2.f32 %v3501_v48 }
 0xf60   :  { %4944 = vpow2.f32 %v3500_v19 }
 0xf65   :  { %v4939_v2 = vpop.eup %4938 }
 0xf66   :  { %v4941_v38 = vpop.eup %4940  ;;  %v2850_v3 = vadd.f32 1.0, %v4939_v2 }
 0xf67   :  { %v2849_v40 = vadd.f32 1.0, %v4941_v38  ;;  %v3504_v38 = vld [vmem:[%s6225_s8 + $0x30] sm:$0xff] }
 0xf68   :  { %4946 = vrcp.f32 %v2850_v3  ;;  %v3502_v3 = vld [vmem:[%s6225_s8 + $0x20] sm:$0xff] }
 0xf69   :  { %v4943_v22 = vpop.eup %4942  ;;  %4948 = vrcp.f32 %v2849_v40 }
 0xf6a   :  { %v4945_v61 = vpop.eup %4944  ;;  %v2852_v34 = vadd.f32 1.0, %v4943_v22 }
 0xf6b   :  { %v2851_v33 = vadd.f32 1.0, %v4945_v61 }
 0xf6c   :  { %4950 = vrcp.f32 %v2852_v34 }
 0xf6d   :  { %4952 = vrcp.f32 %v2851_v33  ;;  %v3508_v33 = vld [vmem:[%s6226_s9 + $0x30] sm:$0xff] }
 0xf72   :  { %v4947_v5 = vpop.eup %4946 }
 0xf73   :  { %v4949_v62 = vpop.eup %4948  ;;  %v2862_v63 = vmul.f32 %v4947_v5, %v2804_v51 }
 0xf74   :  { %v2861_v14 = vmul.f32 %v4949_v62, %v2799_v47  ;;  %v3507_v47 = vld [vmem:[%s6226_s9 + $0x28] sm:$0xff] }
 0xf75   :  { %v6100_v8 = vmax.f32 %v5993_v17, %v2862_v63 }
 0xf76   :  { %v4951_v13 = vpop.eup %4950  ;;  %v6103_v29 = vmax.f32 %v5995_v55, %v2861_v14 }
 0xf77   :  { %v4953_v6 = vpop.eup %4952  ;;  %2871 = vadd.xlane.f32.xlu1 %v6100_v8  ;;  %v2864_v54 = vmul.f32 %v4951_v13, %v2814_v35  ;;  %v2878_v24 = vmul.f32 %v6100_v8, %v6100_v8 }
 0xf78   :  { %2869 = vadd.xlane.f32.xlu0 %v6103_v29  ;;  %v2863_v1 = vmul.f32 %v4953_v6, %v2809_v26  ;;  %v2877_v55 = vmul.f32 %v6103_v29, %v6103_v29  ;;  %v3506_v26 = vld [vmem:[%s6226_s9 + $0x20] sm:$0xff]  ;;  %v2997_v6 = vld [vmem:[%s6227_s11 + $0x10] sm:$0xff] }
 0xf79   :  { %v6108_v46 = vmax.f32 %v5997_v15, %v2864_v54 }
 0xf7a   :  { %v6113_v17 = vmax.f32 %v6000_v52, %v2863_v1 }
 0xf7b   :  { %v2880_v15 = vmul.f32 %v6108_v46, %v6108_v46 }
 0xf7c   :  { %2883 = vadd.xlane.f32.xlu0 %v2878_v24  ;;  %2873 = vadd.xlane.f32.xlu1 %v6113_v17  ;;  %v2879_v9 = vmul.f32 %v6113_v17, %v6113_v17  ;;  %v3509_v24 = vld [vmem:[%s6226_s9 + $0x38] sm:$0xff] }
 0xf80   :  { %2881 = vadd.xlane.f32.xlu0 %v2877_v55  ;;  %2885 = vadd.xlane.f32.xlu1 %v2879_v9  ;;  %v2999_v55 = vld [vmem:[%s6227_s11 + $0x20] sm:$0xff] }
 0xf84   :  { %2875 = vadd.xlane.f32.xlu0 %v6108_v46 }
 0xf88   :  { %2887 = vadd.xlane.f32.xlu0 %v2880_v15  ;;  %v3001_v15 = vld [vmem:[%s6227_s11 + $0x30] sm:$0xff] }
0x1004   :  { %v2872_v30 = vpop.xlane.xlu1 %2871 }
0x1005   :  { %v2870_v52 = vpop.xlane.xlu0 %2869  ;;  %v2890_v50 = vmul.f32 0.0078125, %v2872_v30  ;;  %v2996_v30 = vld [vmem:[%s6227_s11 + $0x8] sm:$0xff] }
0x1006   :  { %v2889_v36 = vmul.f32 0.0078125, %v2870_v52  ;;  %v3198_v52 = vld [vmem:[%s6228_s13] sm:$0xf] }
0x1007   :  { %v2898_v4 = vmul.f32 %v2890_v50, %v2890_v50 }
0x1008   :  { %v2897_v10 = vmul.f32 %v2889_v36, %v2889_v36 }
0x1009   :  { %v2874_v12 = vpop.xlane.xlu1 %2873  ;;  %v2884_v31 = vpop.xlane.xlu0 %2883 }
0x100a   :  { %v2891_v45 = vmul.f32 0.0078125, %v2874_v12  ;;  %v2894_v18 = vmul.f32 0.0078125, %v2884_v31  ;;  %v3000_v12 = vld [vmem:[%s6227_s11 + $0x28] sm:$0xff]  ;;  %v3002_v31 = vld [vmem:[%s6227_s11 + $0x38] sm:$0xff] }
0x100c   :  { %v2902_v11 = vsub.f32 %v2894_v18, %v2898_v4  ;;  %v2899_v32 = vmul.f32 %v2891_v45, %v2891_v45 }
0x100d   :  { %v2886_v59 = vpop.xlane.xlu1 %2885  ;;  %v2882_v20 = vpop.xlane.xlu0 %2881 }
0x100e   :  { %v2906_v21 = vmax.f32 %v2902_v11, 0.0  ;;  %v2895_v23 = vmul.f32 0.0078125, %v2886_v59  ;;  %v2893_v16 = vmul.f32 0.0078125, %v2882_v20 }
0x1010   :  { %v2915_v25 = vadd.f32 1e-05, %v2906_v21  ;;  %v2903_v28 = vsub.f32 %v2895_v23, %v2899_v32  ;;  %v2901_v41 = vsub.f32 %v2893_v16, %v2897_v10 }
0x1011   :  { %v2876_v53 = vpop.xlane.xlu0 %2875 }
0x1012   :  { %4954 = vrsqrt.f32 %v2915_v25  ;;  %v2907_v60 = vmax.f32 %v2903_v28, 0.0  ;;  %v2905_v39 = vmax.f32 %v2901_v41, 0.0  ;;  %v2892_v42 = vmul.f32 0.0078125, %v2876_v53 }
0x1014   :  { %v2916_v56 = vadd.f32 1e-05, %v2907_v60  ;;  %v2914_v44 = vadd.f32 1e-05, %v2905_v39  ;;  %v2900_v27 = vmul.f32 %v2892_v42, %v2892_v42 }
0x1015   :  { %v2888_v57 = vpop.xlane.xlu0 %2887 }
0x1016   :  { %4956 = vrsqrt.f32 %v2916_v56  ;;  %v2896_v49 = vmul.f32 0.0078125, %v2888_v57  ;;  %v2992_v56 = vld [vmem:[%s6229_s10 + $0x28] sm:$0xff]  ;;  %v2994_v57 = vld [vmem:[%s6229_s10 + $0x38] sm:$0xff] }
0x1017   :  { %4958 = vrsqrt.f32 %v2914_v44  ;;  %v2993_v44 = vld [vmem:[%s6229_s10 + $0x30] sm:$0xff] }
0x1018   :  { %v2904_v58 = vsub.f32 %v2896_v49, %v2900_v27  ;;  %v4980_v27 = vmov 0.0|0.0   ;;  %v4982_v49 = vmov 0.0  }
0x1019   :  { %4800 = vmatprep.subr.bf16.mxu1 %v4980_v27  ;;  %4405 = vmatprep.mubr.msk.f32.mxu1 %vm4981_vm4, %v4982_v49 }
0x101a   :  { %v2908_v37 = vmax.f32 %v2904_v58, 0.0 }
0x101c   :  { %v4955_v48 = vpop.eup %4954  ;;  %v2917_v19 = vadd.f32 1e-05, %v2908_v37 }
0x101d   :  { %v2923_v2 = vmul.f32 %v4955_v48, %v3503_v43 }
0x101e   :  { %4960 = vrsqrt.f32 %v2917_v19 }
0x101f   :  { %2933 = vperm.xlu0 %4816, %v2923_v2   ;;  %v2956_v51 = vmul.f32 %v2923_v2, %v2890_v50  ;;  %v2998_v50 = vld [vmem:[%s6227_s11 + $0x18] sm:$0xff] }
0x1020   :  { %v4957_v40 = vpop.eup %4956 }
0x1021   :  { %v4959_v22 = vpop.eup %4958  ;;  %v2924_v61 = vmul.f32 %v4957_v40, %v3504_v38  ;;  %v2960_v63 = vsub.f32 %v3507_v47, %v2956_v51 }
0x1022   :  { %v2922_v34 = vmul.f32 %v4959_v22, %v3502_v3 }
0x1023   :  { %v2957_v5 = vmul.f32 %v2924_v61, %v2891_v45  ;;  %2938 = vperm.xlu0 %4816, %v2924_v61  }
0x1024   :  { %2928 = vperm.xlu1 %4817, %v2922_v34   ;;  %v2955_v13 = vmul.f32 %v2922_v34, %v2889_v36  ;;  %v2987_v36 = vld [vmem:[%s6229_s10] sm:$0xff] }
0x1025   :  { %v2961_v62 = vsub.f32 %v3508_v33, %v2957_v5  ;;  %4377 = vmatprep.mubr.msk.f32.mxu0 %vm3043_vm3, %v2987_v36 }
0x1026   :  { %v2959_v1 = vsub.f32 %v3506_v26, %v2955_v13 }
0x1027   :  { %2975 = vperm.xlu0 %4816, %v2961_v62  }
0x1028   :  { %v4961_v14 = vpop.eup %4960  ;;  %2970 = vperm.xlu1 %4817, %v2960_v63  }
0x1029   :  { %v2925_v35 = vmul.f32 %v4961_v14, %v3505_v0 }
0x102b   :  { %3005 = vperm.xlu0 %4816, %v2995_v7   ;;  %v2958_v54 = vmul.f32 %v2925_v35, %v2892_v42 }
0x102c   :  { %2943 = vperm.xlu1 %4817, %v2925_v35  }
0x102d   :  { %v2962_v9 = vsub.f32 %v3509_v24, %v2958_v54 }
0x102f   :  { %3015 = vperm.xlu0 %4816, %v2997_v6  }
0x1030   :  { %2965 = vperm.xlu1 %4817, %v2959_v1  }
0x1033   :  { %3025 = vperm.xlu0 %4816, %v2999_v55  }
0x1034   :  { %2980 = vperm.xlu1 %4817, %v2962_v9  }
0x1037   :  { %3035 = vperm.xlu0 %4816, %v3001_v15  }
0x1038   :  { %3010 = vperm.xlu1 %4817, %v2996_v30  }
0x103b   :  { %3201 = vperm.xlu0 %4816, %v3198_v52  }
0x103c   :  { %3020 = vperm.xlu1 %4817, %v2998_v50  }
0x1040   :  { %3030 = vperm.xlu1 %4817, %v3000_v12  }
0x1044   :  { %3040 = vperm.xlu1 %4817, %v3002_v31  }
0x109e   :  { %v2934_v45 = vpop.permute.xlu0 %2933 }
0x109f   :  { %v2947_v59 = vmul.f32 %v2934_v45, %v6100_v8  ;;  %v2988_v8 = vld [vmem:[%s6229_s10 + $0x8] sm:$0xff] }
0x10a2   :  { %v2939_v11 = vpop.permute.xlu0 %2938 }
0x10a3   :  { %v2929_v4 = vpop.permute.xlu1 %2928  ;;  %v2948_v25 = vmul.f32 %v2939_v11, %v6113_v17  ;;  %v2991_v17 = vld [vmem:[%s6229_s10 + $0x20] sm:$0xff] }
0x10a4   :  { %v2946_v20 = vmul.f32 %v2929_v4, %v6103_v29  ;;  %v2989_v29 = vld [vmem:[%s6229_s10 + $0x10] sm:$0xff] }
0x10a6   :  { %v2976_v16 = vpop.permute.xlu0 %2975 }
0x10a7   :  { %v2971_v18 = vpop.permute.xlu1 %2970  ;;  %v2985_v60 = vadd.f32 %v2976_v16, %v2948_v25 }
0x10a8   :  { %v2984_v21 = vadd.f32 %v2971_v18, %v2947_v59 }
0x10aa   :  { %v3006_v37 = vpop.permute.xlu0 %3005 }
0x10ab   :  { %v2944_v10 = vpop.permute.xlu1 %2943 }
0x10ac   :  { %v2949_v28 = vmul.f32 %v2944_v10, %v6108_v46  ;;  %v2990_v46 = vld [vmem:[%s6229_s10 + $0x18] sm:$0xff] }
0x10ae   :  { %v3016_v19 = vpop.permute.xlu0 %3015 }
0x10af   :  { %v2966_v32 = vpop.permute.xlu1 %2965 }
0x10b0   :  { %v2983_v23 = vadd.f32 %v2966_v32, %v2946_v20  ;;  %v3197_v32 = vld [vmem:[%s6230_s12] sm:$0xf] }
0x10b2   :  { %v4792_v41 = vpack.c.bf16 %v2984_v21, %v2983_v23  ;;  %v3026_v63 = vpop.permute.xlu0 %3025 }
0x10b3   :  { %v2981_v53 = vpop.permute.xlu1 %2980 }
0x10b4   :  { %v2986_v39 = vadd.f32 %v2981_v53, %v2949_v28  ;;  %4793 = vmatprep.subr.bf16.mxu0 %v4792_v41 }
0x10b5   :  { %4795 = vmatpush3.bf16.msra.mxu0 %v4792_v41 }
0x10b6   :  { %v4796_v42 = vpack.c.bf16 %v2986_v39, %v2985_v60  ;;  %v3036_v52 = vpop.permute.xlu0 %3035 }
0x10b7   :  { %v3011_v58 = vpop.permute.xlu1 %3010 }
0x10b8   :  { %4797 = vmatprep.subr.bf16.mxu0 %v4796_v42 }
0x10b9   :  { %4799 = vmatpush3.bf16.msra.mxu0 %v4796_v42 }
0x10ba   :  { %v3202_v21 = vpop.permute.xlu0 %3201 }
0x10bb   :  { %v3021_v43 = vpop.permute.xlu1 %3020 }
0x10bc   :  { %4378 = vmatmul.mubr.msk.f32.vlgmr.msra.gmra.mrb[48].mxu0 %vm3043_vm3, %v2988_v8 }
0x10bd   :  { %4380 = vmatprep.mubr.msk.f32.mxu0 %vm3043_vm3, %v2989_v29 }
0x10bf   :  { %v3031_v5 = vpop.permute.xlu1 %3030 }
0x10c0   :  { %4381 = vmatmul.mubr.msk.f32.gmra.mrb[50].mxu0 %vm3043_vm3, %v2990_v46 }
0x10c1   :  { %4383 = vmatprep.mubr.msk.f32.mxu0 %vm3043_vm3, %v2991_v17 }
0x10c3   :  { %v3041_v9 = vpop.permute.xlu1 %3040 }
0x10c4   :  { %4384 = vmatmul.mubr.msk.f32.gmra.mrb[52].mxu0 %vm3043_vm3, %v2992_v56 }
0x10c5   :  { %4386 = vmatprep.mubr.msk.f32.mxu0 %vm3043_vm3, %v2993_v44 }
0x10c8   :  { %4387 = vmatmul.mubr.msk.f32.gmra.mrb[54].mxu0 %vm3043_vm3, %v2994_v57 }
0x118f   :  { %v4379_v48 = vpop.f32.mrb[48].mxu0 }
0x1190   :  { %v3140_v2 = vadd.f32 %v4379_v48, %v3011_v58  ;;  %v3134_v38 = vpop.f32.mrb[49].mxu0 }
0x1191   :  { %v3135_v3 = vadd.f32 %v3134_v38, %v3006_v37 }
0x1192   :  { %vm3174_vm5 = vcmp.gt.f32.partialorder %v3140_v2, 0.0  ;;  %v3182_v40 = vmul.f32 0.01, %v3140_v2 }
0x1193   :  { %vm3173_vm6 = vcmp.gt.f32.partialorder %v3135_v3, 0.0  ;;  %v3181_v22 = vmul.f32 0.01, %v3135_v3  ;;  %v4382_v61 = vpop.f32.mrb[50].mxu0 }
0x1194   :  { %v3190_v34 = vsel %vm3174_vm5, %v3140_v2, %v3182_v40  ;;  %v3150_v33 = vadd.f32 %v4382_v61, %v3021_v43  ;;  %v3144_v51 = vpop.f32.mrb[51].mxu0 }
0x1195   :  { %v3189_v47 = vsel %vm3173_vm6, %v3135_v3, %v3181_v22  ;;  %v3145_v62 = vadd.f32 %v3144_v51, %v3016_v19 }
0x1196   :  { %v4801_v0 = vpack.c.bf16 %v3190_v34, %v3189_v47  ;;  %vm3176_vm7 = vcmp.gt.f32.partialorder %v3150_v33, 0.0  ;;  %v3184_v14 = vmul.f32 0.01, %v3150_v33 }
0x1197   :  { %vm3175_vm8 = vcmp.gt.f32.partialorder %v3145_v62, 0.0  ;;  %v3183_v7 = vmul.f32 0.01, %v3145_v62  ;;  %v4385_v35 = vpop.f32.mrb[52].mxu0 }
0x1198   :  { %v3192_v13 = vsel %vm3176_vm7, %v3150_v33, %v3184_v14  ;;  %v3160_v26 = vadd.f32 %v4385_v35, %v3031_v5  ;;  %v3154_v6 = vpop.f32.mrb[53].mxu0  ;;  %4802 = vmatpush3.bf16.msra.mxu1 %v4801_v0 }
0x1199   :  { %v3191_v54 = vsel %vm3175_vm8, %v3145_v62, %v3183_v7  ;;  %v3155_v1 = vadd.f32 %v3154_v6, %v3026_v63  ;;  %4803 = vmatprep.subr.bf16.mxu1 %v4980_v27 }
0x119a   :  { %v4804_v24 = vpack.c.bf16 %v3192_v13, %v3191_v54  ;;  %vm3178_vm9 = vcmp.gt.f32.partialorder %v3160_v26, 0.0  ;;  %v3186_v55 = vmul.f32 0.01, %v3160_v26 }
0x119b   :  { %vm3177_vm10 = vcmp.gt.f32.partialorder %v3155_v1, 0.0  ;;  %v3185_v15 = vmul.f32 0.01, %v3155_v1  ;;  %v4388_v30 = vpop.f32.mrb[54].mxu0 }
0x119c   :  { %v3194_v50 = vsel %vm3178_vm9, %v3160_v26, %v3186_v55  ;;  %v3170_v36 = vadd.f32 %v4388_v30, %v3041_v9  ;;  %v3164_v12 = vpop.f32.mrb[55].mxu0  ;;  %4805 = vmatpush3.bf16.msra.mxu1 %v4804_v24 }
0x119d   :  { %v3193_v31 = vsel %vm3177_vm10, %v3155_v1, %v3185_v15  ;;  %v3165_v4 = vadd.f32 %v3164_v12, %v3036_v52  ;;  %4806 = vmatprep.subr.bf16.mxu1 %v4980_v27 }
0x119e   :  { %v4807_v45 = vpack.c.bf16 %v3194_v50, %v3193_v31  ;;  %vm3180_vm11 = vcmp.gt.f32.partialorder %v3170_v36, 0.0  ;;  %v3188_v18 = vmul.f32 0.01, %v3170_v36 }
0x119f   :  { %vm3179_vm12 = vcmp.gt.f32.partialorder %v3165_v4, 0.0  ;;  %v3187_v11 = vmul.f32 0.01, %v3165_v4 }
0x11a0   :  { %v3196_v10 = vsel %vm3180_vm11, %v3170_v36, %v3188_v18  ;;  %4808 = vmatpush3.bf16.msra.mxu1 %v4807_v45 }
0x11a1   :  { %v3195_v59 = vsel %vm3179_vm12, %v3165_v4, %v3187_v11  ;;  %4809 = vmatprep.subr.bf16.mxu1 %v4980_v27 }
0x11a2   :  { %v4810_v20 = vpack.c.bf16 %v3196_v10, %v3195_v59 }
0x11a4   :  { %4811 = vmatpush3.bf16.msra.mxu1 %v4810_v20 }
0x11a7   :  { %4406 = vmatmul.mubr.msk.f32.vlgmr.msra.gmra.mrb[52].mxu1 %vm354_vm2, %v3197_v32 }
0x127a   :  { %v3273_v23 = vpop.f32.mrb[52].mxu1 }
0x127b   :  { %v3274_v16 = vadd.f32 %v3273_v23, %v3202_v21  ;;  %v4407_v25 = vpop.f32.mrb[53].mxu1 }
0x127d   :  { %3277 = vst [vmem:[%s6231_s14] sm:$0xf] %v3274_v16 }

</bundles_post_ra>
